<compile_context>
chip_gen: v7x
topology: tpu7x:2x2x1
jax: 0.10.0
libtpu: 0.0.40
codegen_flags: <defaults>
</compile_context>

<pallas_src>
import functools
import math

import jax
import jax.numpy as jnp
from jax import lax
from jax.experimental import pallas as pl
from jax.experimental.pallas import tpu as pltpu


# ---------------------------------------------------------------------------
# In-kernel helpers (traced inside Pallas kernels)
# ---------------------------------------------------------------------------

def _mm(a, b):
    """MXU matmul: bf16 operands, f32 accumulation."""
    return jnp.dot(a.astype(jnp.bfloat16), b.astype(jnp.bfloat16),
                   preferred_element_type=jnp.float32)


def _layernorm(z, g, b, eps=1e-5):
    mu = jnp.mean(z, axis=-1, keepdims=True)
    var = jnp.mean(jnp.square(z - mu), axis=-1, keepdims=True)
    return (z - mu) * lax.rsqrt(var + eps) * g + b


def _causal_mha(q2d, k2d, v2d, nhead):
    """Multi-head attention with an in-kernel causal mask.

    q2d: (Lq, D), k2d/v2d: (Lk, D) -> (Lq, D).  Heads are processed with a
    static Python loop (2D ops only, robust Mosaic lowering); the final output
    is concatenated back to a lane-dense (Lq, D) slab.
    """
    Lq, D = q2d.shape
    Lk = k2d.shape[0]
    dh = D // nhead
    scale = 1.0 / math.sqrt(dh)

    rows = lax.broadcasted_iota(jnp.int32, (Lq, Lk), 0)
    cols = lax.broadcasted_iota(jnp.int32, (Lq, Lk), 1)
    allow = cols <= rows                      # causal: attend to j <= i

    outs = []
    for h in range(nhead):
        sl = slice(h * dh, (h + 1) * dh)
        qh = q2d[:, sl] * scale
        kh = k2d[:, sl]
        vh = v2d[:, sl]
        # scores = qh @ kh^T
        s = lax.dot_general(qh, kh, (((1,), (1,)), ((), ())),
                            preferred_element_type=jnp.float32)
        s = jnp.where(allow, s, -jnp.inf)
        m = jnp.max(s, axis=-1, keepdims=True)
        p = jnp.exp(s - m)
        l = jnp.sum(p, axis=-1, keepdims=True)
        o = jnp.dot(p, vh, preferred_element_type=jnp.float32)
        outs.append(o * pl.reciprocal(l, approx=True))
    return jnp.concatenate(outs, axis=-1)     # (Lq, D)


# ---------------------------------------------------------------------------
# Fused per-layer kernels
# ---------------------------------------------------------------------------

def _encoder_layer_kernel(x_ref,
                          wqkv_ref, bqkv_ref, wo_ref, bo_ref,
                          n1g_ref, n1b_ref,
                          w1_ref, b1_ref, w2_ref, b2_ref,
                          n2g_ref, n2b_ref,
                          o_ref, *, nhead):
    D = x_ref.shape[-1]
    x = x_ref[0]                                              # (L, D) f32

    # --- self attention (fused QKV) ---
    qkv = _mm(x, wqkv_ref[...]) + bqkv_ref[...]               # (L, 3D)
    sa = _causal_mha(qkv[:, :D], qkv[:, D:2 * D], qkv[:, 2 * D:], nhead)
    sa = _mm(sa, wo_ref[...]) + bo_ref[...]
    x1 = _layernorm(x + sa, n1g_ref[...], n1b_ref[...])

    # --- feed-forward ---
    h = jnp.maximum(_mm(x1, w1_ref[...]) + b1_ref[...], 0.0)  # (L, dff)
    ff = _mm(h, w2_ref[...]) + b2_ref[...]
    x2 = _layernorm(x1 + ff, n2g_ref[...], n2b_ref[...])

    o_ref[0] = x2.astype(o_ref.dtype)


def _decoder_layer_kernel(x_ref, mem_ref,
                          sa_wqkv_ref, sa_bqkv_ref, sa_wo_ref, sa_bo_ref,
                          n1g_ref, n1b_ref,
                          ca_wq_ref, ca_bq_ref, ca_wkv_ref, ca_bkv_ref,
                          ca_wo_ref, ca_bo_ref, n2g_ref, n2b_ref,
                          w1_ref, b1_ref, w2_ref, b2_ref, n3g_ref, n3b_ref,
                          o_ref, *, nhead):
    D = x_ref.shape[-1]
    x = x_ref[0]                                              # (L, D)
    mem = mem_ref[0]                                          # (L, D)

    # --- masked self attention ---
    qkv = _mm(x, sa_wqkv_ref[...]) + sa_bqkv_ref[...]
    sa = _causal_mha(qkv[:, :D], qkv[:, D:2 * D], qkv[:, 2 * D:], nhead)
    sa = _mm(sa, sa_wo_ref[...]) + sa_bo_ref[...]
    x1 = _layernorm(x + sa, n1g_ref[...], n1b_ref[...])

    # --- cross attention (memory_mask is also causal in the reference) ---
    q = _mm(x1, ca_wq_ref[...]) + ca_bq_ref[...]
    kv = _mm(mem, ca_wkv_ref[...]) + ca_bkv_ref[...]          # (L, 2D)
    ca = _causal_mha(q, kv[:, :D], kv[:, D:], nhead)
    ca = _mm(ca, ca_wo_ref[...]) + ca_bo_ref[...]
    x2 = _layernorm(x1 + ca, n2g_ref[...], n2b_ref[...])

    # --- feed-forward ---
    h = jnp.maximum(_mm(x2, w1_ref[...]) + b1_ref[...], 0.0)
    ff = _mm(h, w2_ref[...]) + b2_ref[...]
    x3 = _layernorm(x2 + ff, n3g_ref[...], n3b_ref[...])

    o_ref[0] = x3.astype(o_ref.dtype)


def _layernorm_kernel(x_ref, g_ref, b_ref, o_ref, *, eps):
    o_ref[...] = _layernorm(x_ref[...], g_ref[...], b_ref[...], eps
                            ).astype(o_ref.dtype)


def _final_head_kernel(x_ref, g_ref, b_ref, w_ref, wb_ref, o_ref, *, eps):
    # final decoder LayerNorm + prediction linear + sigmoid, fused.
    z = _layernorm(x_ref[...], g_ref[...], b_ref[...], eps)
    y = jnp.dot(z, w_ref[...], preferred_element_type=jnp.float32) + wb_ref[...]
    o_ref[...] = jax.nn.sigmoid(y).astype(o_ref.dtype)


# ---------------------------------------------------------------------------
# pallas_call wrappers
# ---------------------------------------------------------------------------

_LAYER_COMPILER_PARAMS = pltpu.CompilerParams(
    dimension_semantics=("parallel",),          # batch axis -> 2 TCs on v7x
    vmem_limit_bytes=32 * 1024 * 1024,          # safe on v5e/v6e/v7x
)


def _rep_spec(arr):
    """Full-array block, resident across all grid steps (constant index map)."""
    nd = arr.ndim
    return pl.BlockSpec(arr.shape, lambda b, _nd=nd: (0,) * _nd)


def encoder_layer(src, p, nhead):
    B, L, D = src.shape
    weights = [p["sa_wqkv"], p["sa_bqkv"], p["sa_wo"], p["sa_bo"],
               p["n1g"], p["n1b"],
               p["w1"], p["b1"], p["w2"], p["b2"],
               p["n2g"], p["n2b"]]
    data_spec = pl.BlockSpec((1, L, D), lambda b: (b, 0, 0))
    return pl.pallas_call(
        functools.partial(_encoder_layer_kernel, nhead=nhead),
        grid=(B,),
        in_specs=[data_spec] + [_rep_spec(w) for w in weights],
        out_specs=data_spec,
        out_shape=jax.ShapeDtypeStruct((B, L, D), jnp.float32),
        compiler_params=_LAYER_COMPILER_PARAMS,
    )(src, *weights)


def decoder_layer(tgt, memory, p, nhead):
    B, L, D = tgt.shape
    weights = [p["sa_wqkv"], p["sa_bqkv"], p["sa_wo"], p["sa_bo"],
               p["n1g"], p["n1b"],
               p["ca_wq"], p["ca_bq"], p["ca_wkv"], p["ca_bkv"],
               p["ca_wo"], p["ca_bo"], p["n2g"], p["n2b"],
               p["w1"], p["b1"], p["w2"], p["b2"], p["n3g"], p["n3b"]]
    data_spec = pl.BlockSpec((1, L, D), lambda b: (b, 0, 0))
    return pl.pallas_call(
        functools.partial(_decoder_layer_kernel, nhead=nhead),
        grid=(B,),
        in_specs=[data_spec, data_spec] + [_rep_spec(w) for w in weights],
        out_specs=data_spec,
        out_shape=jax.ShapeDtypeStruct((B, L, D), jnp.float32),
        compiler_params=_LAYER_COMPILER_PARAMS,
    )(tgt, memory, *weights)


def final_layernorm(x, g, b, eps=1e-5):
    """LayerNorm over last dim of (B, L, D)."""
    B, L, D = x.shape
    # TODO(synk): tile over rows with a grid for very large B*L (fits VMEM here).
    y = pl.pallas_call(
        functools.partial(_layernorm_kernel, eps=eps),
        out_shape=jax.ShapeDtypeStruct((B * L, D), jnp.float32),
    )(x.reshape(B * L, D), g, b)
    return y.reshape(B, L, D)


def final_norm_pred(x, g, b, w, wb, eps=1e-5):
    """Final decoder LayerNorm + pred linear + sigmoid -> (B, L)."""
    B, L, D = x.shape
    y = pl.pallas_call(
        functools.partial(_final_head_kernel, eps=eps),
        out_shape=jax.ShapeDtypeStruct((B * L, 1), jnp.float32),
    )(x.reshape(B * L, D), g, b, w, wb)
    return y.reshape(B, L)


# ---------------------------------------------------------------------------
# SAINT forward (plain-JAX glue around the fused kernels)
# ---------------------------------------------------------------------------

def saint_forward(params, q_ids, r_ids, *, nhead):
    """q_ids, r_ids: int32 (B, n). Returns p: (B, n) float32 in (0, 1)."""
    B, n = q_ids.shape
    d = params["E"].shape[1]

    # Embedding gathers / start token / positions (XLA glue, batch-first).
    E = params["E"][q_ids]                                    # (B, n, d)
    R_prev = params["R"][r_ids[:, :-1]]                       # (B, n-1, d)
    S = jnp.broadcast_to(params["S"][None], (B, 1, d))        # (B, 1, d)
    R = jnp.concatenate([S, R_prev], axis=1)                  # (B, n, d)
    P = params["P"][None]                                     # (1, n, d)

    src = (E + P).astype(jnp.float32)                         # (B, n, d)
    tgt = (R + P).astype(jnp.float32)                         # (B, n, d)

    # Encoder stack + final norm.
    memory = src
    for lyr in params["enc_layers"]:
        memory = encoder_layer(memory, lyr, nhead)
    memory = final_layernorm(memory, params["enc_norm_g"], params["enc_norm_b"])

    # Decoder stack.
    out = tgt
    for lyr in params["dec_layers"]:
        out = decoder_layer(out, memory, lyr, nhead)

    # Final decoder norm + prediction head + sigmoid (one fused kernel).
    return final_norm_pred(out, params["dec_norm_g"], params["dec_norm_b"],
                           params["pred_w"], params["pred_b"])


# ---------------------------------------------------------------------------
# Deterministic parameter initialization (shapes follow SAINT.__init__)
# ---------------------------------------------------------------------------

def init_saint_params(key, num_q, n, d, nhead, dff=2048, num_layers=1):
    keys = iter(jax.random.split(key, 256))

    def nrm(shape):
        return jax.random.normal(next(keys), shape, jnp.float32)

    def xav(shape):
        fan_in, fan_out = shape
        lim = math.sqrt(6.0 / (fan_in + fan_out))
        return jax.random.uniform(next(keys), shape, jnp.float32, -lim, lim)

    zeros = lambda s: jnp.zeros(s, jnp.float32)
    ones = lambda s: jnp.ones(s, jnp.float32)

    def self_attn():
        # fused QKV projection: weight (d, 3d), bias (1, 3d)
        return dict(sa_wqkv=xav((d, 3 * d)), sa_bqkv=zeros((1, 3 * d)),
                    sa_wo=xav((d, d)), sa_bo=zeros((1, d)))

    def cross_attn():
        # q from tgt, fused KV from memory
        return dict(ca_wq=xav((d, d)), ca_bq=zeros((1, d)),
                    ca_wkv=xav((d, 2 * d)), ca_bkv=zeros((1, 2 * d)),
                    ca_wo=xav((d, d)), ca_bo=zeros((1, d)))

    def enc():
        p = dict(self_attn())
        p.update(w1=xav((d, dff)), b1=zeros((1, dff)),
                 w2=xav((dff, d)), b2=zeros((1, d)),
                 n1g=ones((1, d)), n1b=zeros((1, d)),
                 n2g=ones((1, d)), n2b=zeros((1, d)))
        return p

    def dec():
        p = dict(self_attn())
        p.update(cross_attn())
        p.update(w1=xav((d, dff)), b1=zeros((1, dff)),
                 w2=xav((dff, d)), b2=zeros((1, d)),
                 n1g=ones((1, d)), n1b=zeros((1, d)),
                 n2g=ones((1, d)), n2b=zeros((1, d)),
                 n3g=ones((1, d)), n3b=zeros((1, d)))
        return p

    return dict(
        E=nrm((num_q, d)),       # Embedding(num_q, d)
        R=nrm((2, d)),           # Embedding(2, d)
        P=nrm((n, d)),           # positional Parameter
        S=nrm((1, d)),           # start-token Parameter
        enc_layers=[enc() for _ in range(num_layers)],
        dec_layers=[dec() for _ in range(num_layers)],
        enc_norm_g=ones((1, d)), enc_norm_b=zeros((1, d)),
        dec_norm_g=ones((1, d)), dec_norm_b=zeros((1, d)),
        pred_w=xav((d, 1)), pred_b=zeros((1, 1)),
    )


# ---------------------------------------------------------------------------
# Main
# ---------------------------------------------------------------------------

if __name__ == "__main__":
    num_q, n, d, nhead = 10, 8, 32, 4
    dropout = 0.0          # eval-mode forward; dropout is identity
    num_tr_layers = 1
    B = 2

    key = jax.random.PRNGKey(0)
    kp, kq, kr = jax.random.split(key, 3)

    params = init_saint_params(kp, num_q, n, d, nhead,
                               dff=2048, num_layers=num_tr_layers)

    q_ids = jax.random.randint(kq, (B, n), 0, num_q, dtype=jnp.int32)
    r_ids = jax.random.randint(kr, (B, n), 0, 2, dtype=jnp.int32)

    fwd = jax.jit(functools.partial(saint_forward, nhead=nhead))
    p = fwd(params, q_ids, r_ids)
    jax.block_until_ready(p)

    assert p.shape == (B, n), p.shape
    assert bool(jnp.all(jnp.isfinite(p)))
    assert bool(jnp.all((p > 0) & (p < 1)))
    print("KERNEL_OK")
</pallas_src>

<mosaic_0001>
module attributes {stable_mosaic.version = 11 : i64} {
  func.func @_layernorm_kernel(%arg0: memref<16x32xf32, #tpu.memory_space<vmem>>, %arg1: memref<1x32xf32, #tpu.memory_space<vmem>>, %arg2: memref<1x32xf32, #tpu.memory_space<vmem>>, %arg3: memref<16x32xf32, #tpu.memory_space<vmem>>) attributes {dimension_semantics = [], scalar_prefetch = 0 : i64, scratch_operands = 0 : i64, tpu.core_type = #tpu.core_type<tc>} {
    %c0 = arith.constant 0 : index
    %c0_0 = arith.constant 0 : index
    %0 = vector.load %arg0[%c0, %c0_0] : memref<16x32xf32, #tpu.memory_space<vmem>>, vector<16x32xf32>
    %c0_1 = arith.constant 0 : index
    %c0_2 = arith.constant 0 : index
    %1 = vector.load %arg1[%c0_1, %c0_2] : memref<1x32xf32, #tpu.memory_space<vmem>>, vector<1x32xf32>
    %c0_3 = arith.constant 0 : index
    %c0_4 = arith.constant 0 : index
    %2 = vector.load %arg2[%c0_3, %c0_4] : memref<1x32xf32, #tpu.memory_space<vmem>>, vector<1x32xf32>
    %cst = arith.constant dense<0.000000e+00> : vector<16xf32>
    %3 = vector.multi_reduction <add>, %0, %cst [1] : vector<16x32xf32> to vector<16xf32>
    %4 = vector.shape_cast %3 : vector<16xf32> to vector<16x1xf32>
    %cst_5 = arith.constant 3.200000e+01 : f32
    %5 = vector.broadcast %cst_5 : f32 to vector<16x1xf32>
    %6 = arith.divf %4, %5 : vector<16x1xf32>
    %7 = vector.broadcast %6 : vector<16x1xf32> to vector<16x32xf32>
    %8 = arith.subf %0, %7 : vector<16x32xf32>
    %9 = arith.mulf %8, %8 : vector<16x32xf32>
    %cst_6 = arith.constant dense<0.000000e+00> : vector<16xf32>
    %10 = vector.multi_reduction <add>, %9, %cst_6 [1] : vector<16x32xf32> to vector<16xf32>
    %11 = vector.shape_cast %10 : vector<16xf32> to vector<16x1xf32>
    %cst_7 = arith.constant 3.200000e+01 : f32
    %12 = vector.broadcast %cst_7 : f32 to vector<16x1xf32>
    %13 = arith.divf %11, %12 : vector<16x1xf32>
    %14 = vector.broadcast %6 : vector<16x1xf32> to vector<16x32xf32>
    %15 = arith.subf %0, %14 : vector<16x32xf32>
    %cst_8 = arith.constant 9.99999974E-6 : f32
    %16 = vector.broadcast %cst_8 : f32 to vector<16x1xf32>
    %17 = arith.addf %13, %16 : vector<16x1xf32>
    %18 = math.rsqrt %17 : vector<16x1xf32>
    %19 = vector.broadcast %18 : vector<16x1xf32> to vector<16x32xf32>
    %20 = arith.mulf %15, %19 : vector<16x32xf32>
    %21 = vector.broadcast %1 : vector<1x32xf32> to vector<16x32xf32>
    %22 = arith.mulf %20, %21 : vector<16x32xf32>
    %23 = vector.broadcast %2 : vector<1x32xf32> to vector<16x32xf32>
    %24 = arith.addf %22, %23 : vector<16x32xf32>
    %c0_9 = arith.constant 0 : index
    %c0_10 = arith.constant 0 : index
    %25 = vector.load %arg3[%c0_9, %c0_10] : memref<16x32xf32, #tpu.memory_space<vmem>>, vector<16x32xf32>
    tpu.vector_store %arg3[%c0_9, %c0_10], %24 {strides = array<i32>} : memref<16x32xf32, #tpu.memory_space<vmem>>, vector<16x32xf32>,
    return
  }
}

module attributes {stable_mosaic.version = 11 : i64} {
  func.func @_encoder_layer_kernel(%arg0: i32, %arg1: memref<1x8x32xf32, #tpu.memory_space<vmem>>, %arg2: memref<32x96xf32, #tpu.memory_space<vmem>>, %arg3: memref<1x96xf32, #tpu.memory_space<vmem>>, %arg4: memref<32x32xf32, #tpu.memory_space<vmem>>, %arg5: memref<1x32xf32, #tpu.memory_space<vmem>>, %arg6: memref<1x32xf32, #tpu.memory_space<vmem>>, %arg7: memref<1x32xf32, #tpu.memory_space<vmem>>, %arg8: memref<32x2048xf32, #tpu.memory_space<vmem>>, %arg9: memref<1x2048xf32, #tpu.memory_space<vmem>>, %arg10: memref<2048x32xf32, #tpu.memory_space<vmem>>, %arg11: memref<1x32xf32, #tpu.memory_space<vmem>>, %arg12: memref<1x32xf32, #tpu.memory_space<vmem>>, %arg13: memref<1x32xf32, #tpu.memory_space<vmem>>, %arg14: memref<1x8x32xf32, #tpu.memory_space<vmem>>) attributes {dimension_semantics = [#tpu.dimension_semantics<parallel>], iteration_bounds = array<i64: 2>, scalar_prefetch = 0 : i64, scratch_operands = 0 : i64, tpu.core_type = #tpu.core_type<tc>, window_params = [{transform_indices = @transform_0, window_bounds = array<i64: 1, 8, 32>}, {pipeline_mode = #tpu.pipeline_mode<synchronous>, transform_indices = @transform_1, window_bounds = array<i64: 32, 96>}, {pipeline_mode = #tpu.pipeline_mode<synchronous>, transform_indices = @transform_2, window_bounds = array<i64: 1, 96>}, {pipeline_mode = #tpu.pipeline_mode<synchronous>, transform_indices = @transform_3, window_bounds = array<i64: 32, 32>}, {pipeline_mode = #tpu.pipeline_mode<synchronous>, transform_indices = @transform_4, window_bounds = array<i64: 1, 32>}, {pipeline_mode = #tpu.pipeline_mode<synchronous>, transform_indices = @transform_5, window_bounds = array<i64: 1, 32>}, {pipeline_mode = #tpu.pipeline_mode<synchronous>, transform_indices = @transform_6, window_bounds = array<i64: 1, 32>}, {pipeline_mode = #tpu.pipeline_mode<synchronous>, transform_indices = @transform_7, window_bounds = array<i64: 32, 2048>}, {pipeline_mode = #tpu.pipeline_mode<synchronous>, transform_indices = @transform_8, window_bounds = array<i64: 1, 2048>}, {pipeline_mode = #tpu.pipeline_mode<synchronous>, transform_indices = @transform_9, window_bounds = array<i64: 2048, 32>}, {pipeline_mode = #tpu.pipeline_mode<synchronous>, transform_indices = @transform_10, window_bounds = array<i64: 1, 32>}, {pipeline_mode = #tpu.pipeline_mode<synchronous>, transform_indices = @transform_11, window_bounds = array<i64: 1, 32>}, {pipeline_mode = #tpu.pipeline_mode<synchronous>, transform_indices = @transform_12, window_bounds = array<i64: 1, 32>}, {transform_indices = @transform_13, window_bounds = array<i64: 1, 8, 32>}]} {
    %c0 = arith.constant 0 : index
    %c0_0 = arith.constant 0 : index
    %c0_1 = arith.constant 0 : index
    %0 = vector.load %arg1[%c0, %c0_0, %c0_1] : memref<1x8x32xf32, #tpu.memory_space<vmem>>, vector<1x8x32xf32>
    %1 = vector.shape_cast %0 : vector<1x8x32xf32> to vector<8x32xf32>
    %c0_2 = arith.constant 0 : index
    %c0_3 = arith.constant 0 : index
    %2 = vector.load %arg2[%c0_2, %c0_3] : memref<32x96xf32, #tpu.memory_space<vmem>>, vector<32x96xf32>
    %3 = arith.truncf %1 : vector<8x32xf32> to vector<8x32xbf16>
    %4 = arith.truncf %2 : vector<32x96xf32> to vector<32x96xbf16>
    %cst = arith.constant dense<0.000000e+00> : vector<8x96xf32>
    %5 = tpu.matmul %3, %4, %cst {dimension_numbers = #tpu.dot_dimension_numbers<[1], [0], [0], [1], [0, 0, 1, 1], [], []>} : vector<8x32xbf16>, vector<32x96xbf16>, vector<8x96xf32> -> vector<8x96xf32>
    %c0_4 = arith.constant 0 : index
    %c0_5 = arith.constant 0 : index
    %6 = vector.load %arg3[%c0_4, %c0_5] : memref<1x96xf32, #tpu.memory_space<vmem>>, vector<1x96xf32>
    %7 = vector.broadcast %6 : vector<1x96xf32> to vector<8x96xf32>
    %8 = arith.addf %5, %7 : vector<8x96xf32>
    %9 = vector.extract_strided_slice %8 {offsets = [0, 0], sizes = [8, 32], strides = [1, 1]} : vector<8x96xf32> to vector<8x32xf32>
    %10 = vector.extract_strided_slice %8 {offsets = [0, 32], sizes = [8, 32], strides = [1, 1]} : vector<8x96xf32> to vector<8x32xf32>
    %11 = vector.extract_strided_slice %8 {offsets = [0, 64], sizes = [8, 32], strides = [1, 1]} : vector<8x96xf32> to vector<8x32xf32>
    %12 = tpu.iota {dimensions = array<i32: 0>} : vector<8x8xi32>
    %13 = tpu.iota {dimensions = array<i32: 1>} : vector<8x8xi32>
    %14 = arith.cmpi sle, %13, %12 : vector<8x8xi32>
    %15 = vector.extract_strided_slice %9 {offsets = [0, 0], sizes = [8, 8], strides = [1, 1]} : vector<8x32xf32> to vector<8x8xf32>
    %cst_6 = arith.constant 0.353553385 : f32
    %16 = vector.broadcast %cst_6 : f32 to vector<8x8xf32>
    %17 = arith.mulf %15, %16 : vector<8x8xf32>
    %18 = vector.extract_strided_slice %10 {offsets = [0, 0], sizes = [8, 8], strides = [1, 1]} : vector<8x32xf32> to vector<8x8xf32>
    %19 = vector.extract_strided_slice %11 {offsets = [0, 0], sizes = [8, 8], strides = [1, 1]} : vector<8x32xf32> to vector<8x8xf32>
    %cst_7 = arith.constant dense<0.000000e+00> : vector<8x8xf32>
    %20 = tpu.matmul %17, %18, %cst_7 {dimension_numbers = #tpu.dot_dimension_numbers<[1], [1], [0], [0], [0, 0, 1, 0], [], []>} : vector<8x8xf32>, vector<8x8xf32>, vector<8x8xf32> -> vector<8x8xf32>
    %cst_8 = arith.constant 0xFF800000 : f32
    %21 = vector.broadcast %cst_8 : f32 to vector<8x8xf32>
    %22 = arith.select %14, %20, %21 : vector<8x8xi1>, vector<8x8xf32>
    %cst_9 = arith.constant dense<0xFF800000> : vector<8xf32>
    %23 = vector.multi_reduction <maximumf>, %22, %cst_9 [1] : vector<8x8xf32> to vector<8xf32>
    %24 = vector.shape_cast %23 : vector<8xf32> to vector<8x1xf32>
    %25 = vector.broadcast %24 : vector<8x1xf32> to vector<8x8xf32>
    %26 = arith.subf %22, %25 : vector<8x8xf32>
    %27 = math.exp %26 : vector<8x8xf32>
    %cst_10 = arith.constant dense<0.000000e+00> : vector<8xf32>
    %28 = vector.multi_reduction <add>, %27, %cst_10 [1] : vector<8x8xf32> to vector<8xf32>
    %29 = vector.shape_cast %28 : vector<8xf32> to vector<8x1xf32>
    %cst_11 = arith.constant dense<0.000000e+00> : vector<8x8xf32>
    %30 = tpu.matmul %27, %19, %cst_11 {dimension_numbers = #tpu.dot_dimension_numbers<[1], [0], [0], [1], [0, 0, 1, 1], [], []>} : vector<8x8xf32>, vector<8x8xf32>, vector<8x8xf32> -> vector<8x8xf32>
    %31 = tpu.reciprocal %29 {approx = true} : vector<8x1xf32> -> vector<8x1xf32>
    %32 = vector.broadcast %31 : vector<8x1xf32> to vector<8x8xf32>
    %33 = arith.mulf %30, %32 : vector<8x8xf32>
    %34 = vector.extract_strided_slice %9 {offsets = [0, 8], sizes = [8, 8], strides = [1, 1]} : vector<8x32xf32> to vector<8x8xf32>
    %cst_12 = arith.constant 0.353553385 : f32
    %35 = vector.broadcast %cst_12 : f32 to vector<8x8xf32>
    %36 = arith.mulf %34, %35 : vector<8x8xf32>
    %37 = vector.extract_strided_slice %10 {offsets = [0, 8], sizes = [8, 8], strides = [1, 1]} : vector<8x32xf32> to vector<8x8xf32>
    %38 = vector.extract_strided_slice %11 {offsets = [0, 8], sizes = [8, 8], strides = [1, 1]} : vector<8x32xf32> to vector<8x8xf32>
    %cst_13 = arith.constant dense<0.000000e+00> : vector<8x8xf32>
    %39 = tpu.matmul %36, %37, %cst_13 {dimension_numbers = #tpu.dot_dimension_numbers<[1], [1], [0], [0], [0, 0, 1, 0], [], []>} : vector<8x8xf32>, vector<8x8xf32>, vector<8x8xf32> -> vector<8x8xf32>
    %cst_14 = arith.constant 0xFF800000 : f32
    %40 = vector.broadcast %cst_14 : f32 to vector<8x8xf32>
    %41 = arith.select %14, %39, %40 : vector<8x8xi1>, vector<8x8xf32>
    %cst_15 = arith.constant dense<0xFF800000> : vector<8xf32>
    %42 = vector.multi_reduction <maximumf>, %41, %cst_15 [1] : vector<8x8xf32> to vector<8xf32>
    %43 = vector.shape_cast %42 : vector<8xf32> to vector<8x1xf32>
    %44 = vector.broadcast %43 : vector<8x1xf32> to vector<8x8xf32>
    %45 = arith.subf %41, %44 : vector<8x8xf32>
    %46 = math.exp %45 : vector<8x8xf32>
    %cst_16 = arith.constant dense<0.000000e+00> : vector<8xf32>
    %47 = vector.multi_reduction <add>, %46, %cst_16 [1] : vector<8x8xf32> to vector<8xf32>
    %48 = vector.shape_cast %47 : vector<8xf32> to vector<8x1xf32>
    %cst_17 = arith.constant dense<0.000000e+00> : vector<8x8xf32>
    %49 = tpu.matmul %46, %38, %cst_17 {dimension_numbers = #tpu.dot_dimension_numbers<[1], [0], [0], [1], [0, 0, 1, 1], [], []>} : vector<8x8xf32>, vector<8x8xf32>, vector<8x8xf32> -> vector<8x8xf32>
    %50 = tpu.reciprocal %48 {approx = true} : vector<8x1xf32> -> vector<8x1xf32>
    %51 = vector.broadcast %50 : vector<8x1xf32> to vector<8x8xf32>
    %52 = arith.mulf %49, %51 : vector<8x8xf32>
    %53 = vector.extract_strided_slice %9 {offsets = [0, 16], sizes = [8, 8], strides = [1, 1]} : vector<8x32xf32> to vector<8x8xf32>
    %cst_18 = arith.constant 0.353553385 : f32
    %54 = vector.broadcast %cst_18 : f32 to vector<8x8xf32>
    %55 = arith.mulf %53, %54 : vector<8x8xf32>
    %56 = vector.extract_strided_slice %10 {offsets = [0, 16], sizes = [8, 8], strides = [1, 1]} : vector<8x32xf32> to vector<8x8xf32>
    %57 = vector.extract_strided_slice %11 {offsets = [0, 16], sizes = [8, 8], strides = [1, 1]} : vector<8x32xf32> to vector<8x8xf32>
    %cst_19 = arith.constant dense<0.000000e+00> : vector<8x8xf32>
    %58 = tpu.matmul %55, %56, %cst_19 {dimension_numbers = #tpu.dot_dimension_numbers<[1], [1], [0], [0], [0, 0, 1, 0], [], []>} : vector<8x8xf32>, vector<8x8xf32>, vector<8x8xf32> -> vector<8x8xf32>
    %cst_20 = arith.constant 0xFF800000 : f32
    %59 = vector.broadcast %cst_20 : f32 to vector<8x8xf32>
    %60 = arith.select %14, %58, %59 : vector<8x8xi1>, vector<8x8xf32>
    %cst_21 = arith.constant dense<0xFF800000> : vector<8xf32>
    %61 = vector.multi_reduction <maximumf>, %60, %cst_21 [1] : vector<8x8xf32> to vector<8xf32>
    %62 = vector.shape_cast %61 : vector<8xf32> to vector<8x1xf32>
    %63 = vector.broadcast %62 : vector<8x1xf32> to vector<8x8xf32>
    %64 = arith.subf %60, %63 : vector<8x8xf32>
    %65 = math.exp %64 : vector<8x8xf32>
    %cst_22 = arith.constant dense<0.000000e+00> : vector<8xf32>
    %66 = vector.multi_reduction <add>, %65, %cst_22 [1] : vector<8x8xf32> to vector<8xf32>
    %67 = vector.shape_cast %66 : vector<8xf32> to vector<8x1xf32>
    %cst_23 = arith.constant dense<0.000000e+00> : vector<8x8xf32>
    %68 = tpu.matmul %65, %57, %cst_23 {dimension_numbers = #tpu.dot_dimension_numbers<[1], [0], [0], [1], [0, 0, 1, 1], [], []>} : vector<8x8xf32>, vector<8x8xf32>, vector<8x8xf32> -> vector<8x8xf32>
    %69 = tpu.reciprocal %67 {approx = true} : vector<8x1xf32> -> vector<8x1xf32>
    %70 = vector.broadcast %69 : vector<8x1xf32> to vector<8x8xf32>
    %71 = arith.mulf %68, %70 : vector<8x8xf32>
    %72 = vector.extract_strided_slice %9 {offsets = [0, 24], sizes = [8, 8], strides = [1, 1]} : vector<8x32xf32> to vector<8x8xf32>
    %cst_24 = arith.constant 0.353553385 : f32
    %73 = vector.broadcast %cst_24 : f32 to vector<8x8xf32>
    %74 = arith.mulf %72, %73 : vector<8x8xf32>
    %75 = vector.extract_strided_slice %10 {offsets = [0, 24], sizes = [8, 8], strides = [1, 1]} : vector<8x32xf32> to vector<8x8xf32>
    %76 = vector.extract_strided_slice %11 {offsets = [0, 24], sizes = [8, 8], strides = [1, 1]} : vector<8x32xf32> to vector<8x8xf32>
    %cst_25 = arith.constant dense<0.000000e+00> : vector<8x8xf32>
    %77 = tpu.matmul %74, %75, %cst_25 {dimension_numbers = #tpu.dot_dimension_numbers<[1], [1], [0], [0], [0, 0, 1, 0], [], []>} : vector<8x8xf32>, vector<8x8xf32>, vector<8x8xf32> -> vector<8x8xf32>
    %cst_26 = arith.constant 0xFF800000 : f32
    %78 = vector.broadcast %cst_26 : f32 to vector<8x8xf32>
    %79 = arith.select %14, %77, %78 : vector<8x8xi1>, vector<8x8xf32>
    %cst_27 = arith.constant dense<0xFF800000> : vector<8xf32>
    %80 = vector.multi_reduction <maximumf>, %79, %cst_27 [1] : vector<8x8xf32> to vector<8xf32>
    %81 = vector.shape_cast %80 : vector<8xf32> to vector<8x1xf32>
    %82 = vector.broadcast %81 : vector<8x1xf32> to vector<8x8xf32>
    %83 = arith.subf %79, %82 : vector<8x8xf32>
    %84 = math.exp %83 : vector<8x8xf32>
    %cst_28 = arith.constant dense<0.000000e+00> : vector<8xf32>
    %85 = vector.multi_reduction <add>, %84, %cst_28 [1] : vector<8x8xf32> to vector<8xf32>
    %86 = vector.shape_cast %85 : vector<8xf32> to vector<8x1xf32>
    %cst_29 = arith.constant dense<0.000000e+00> : vector<8x8xf32>
    %87 = tpu.matmul %84, %76, %cst_29 {dimension_numbers = #tpu.dot_dimension_numbers<[1], [0], [0], [1], [0, 0, 1, 1], [], []>} : vector<8x8xf32>, vector<8x8xf32>, vector<8x8xf32> -> vector<8x8xf32>
    %88 = tpu.reciprocal %86 {approx = true} : vector<8x1xf32> -> vector<8x1xf32>
    %89 = vector.broadcast %88 : vector<8x1xf32> to vector<8x8xf32>
    %90 = arith.mulf %87, %89 : vector<8x8xf32>
    %91 = tpu.concatenate %33, %52, %71, %90 in 1 : vector<8x8xf32>, vector<8x8xf32>, vector<8x8xf32>, vector<8x8xf32> -> vector<8x32xf32>
    %c0_30 = arith.constant 0 : index
    %c0_31 = arith.constant 0 : index
    %92 = vector.load %arg4[%c0_30, %c0_31] : memref<32x32xf32, #tpu.memory_space<vmem>>, vector<32x32xf32>
    %93 = arith.truncf %91 : vector<8x32xf32> to vector<8x32xbf16>
    %94 = arith.truncf %92 : vector<32x32xf32> to vector<32x32xbf16>
    %cst_32 = arith.constant dense<0.000000e+00> : vector<8x32xf32>
    %95 = tpu.matmul %93, %94, %cst_32 {dimension_numbers = #tpu.dot_dimension_numbers<[1], [0], [0], [1], [0, 0, 1, 1], [], []>} : vector<8x32xbf16>, vector<32x32xbf16>, vector<8x32xf32> -> vector<8x32xf32>
    %c0_33 = arith.constant 0 : index
    %c0_34 = arith.constant 0 : index
    %96 = vector.load %arg5[%c0_33, %c0_34] : memref<1x32xf32, #tpu.memory_space<vmem>>, vector<1x32xf32>
    %97 = vector.broadcast %96 : vector<1x32xf32> to vector<8x32xf32>
    %98 = arith.addf %95, %97 : vector<8x32xf32>
    %99 = arith.addf %1, %98 : vector<8x32xf32>
    %c0_35 = arith.constant 0 : index
    %c0_36 = arith.constant 0 : index
    %100 = vector.load %arg6[%c0_35, %c0_36] : memref<1x32xf32, #tpu.memory_space<vmem>>, vector<1x32xf32>
    %c0_37 = arith.constant 0 : index
    %c0_38 = arith.constant 0 : index
    %101 = vector.load %arg7[%c0_37, %c0_38] : memref<1x32xf32, #tpu.memory_space<vmem>>, vector<1x32xf32>
    %cst_39 = arith.constant dense<0.000000e+00> : vector<8xf32>
    %102 = vector.multi_reduction <add>, %99, %cst_39 [1] : vector<8x32xf32> to vector<8xf32>
    %103 = vector.shape_cast %102 : vector<8xf32> to vector<8x1xf32>
    %cst_40 = arith.constant 3.200000e+01 : f32
    %104 = vector.broadcast %cst_40 : f32 to vector<8x1xf32>
    %105 = arith.divf %103, %104 : vector<8x1xf32>
    %106 = vector.broadcast %105 : vector<8x1xf32> to vector<8x32xf32>
    %107 = arith.subf %99, %106 : vector<8x32xf32>
    %108 = arith.mulf %107, %107 : vector<8x32xf32>
    %cst_41 = arith.constant dense<0.000000e+00> : vector<8xf32>
    %109 = vector.multi_reduction <add>, %108, %cst_41 [1] : vector<8x32xf32> to vector<8xf32>
    %110 = vector.shape_cast %109 : vector<8xf32> to vector<8x1xf32>
    %cst_42 = arith.constant 3.200000e+01 : f32
    %111 = vector.broadcast %cst_42 : f32 to vector<8x1xf32>
    %112 = arith.divf %110, %111 : vector<8x1xf32>
    %113 = vector.broadcast %105 : vector<8x1xf32> to vector<8x32xf32>
    %114 = arith.subf %99, %113 : vector<8x32xf32>
    %cst_43 = arith.constant 9.99999974E-6 : f32
    %115 = vector.broadcast %cst_43 : f32 to vector<8x1xf32>
    %116 = arith.addf %112, %115 : vector<8x1xf32>
    %117 = math.rsqrt %116 : vector<8x1xf32>
    %118 = vector.broadcast %117 : vector<8x1xf32> to vector<8x32xf32>
    %119 = arith.mulf %114, %118 : vector<8x32xf32>
    %120 = vector.broadcast %100 : vector<1x32xf32> to vector<8x32xf32>
    %121 = arith.mulf %119, %120 : vector<8x32xf32>
    %122 = vector.broadcast %101 : vector<1x32xf32> to vector<8x32xf32>
    %123 = arith.addf %121, %122 : vector<8x32xf32>
    %c0_44 = arith.constant 0 : index
    %c0_45 = arith.constant 0 : index
    %124 = vector.load %arg8[%c0_44, %c0_45] : memref<32x2048xf32, #tpu.memory_space<vmem>>, vector<32x2048xf32>
    %125 = arith.truncf %123 : vector<8x32xf32> to vector<8x32xbf16>
    %126 = arith.truncf %124 : vector<32x2048xf32> to vector<32x2048xbf16>
    %cst_46 = arith.constant dense<0.000000e+00> : vector<8x2048xf32>
    %127 = tpu.matmul %125, %126, %cst_46 {dimension_numbers = #tpu.dot_dimension_numbers<[1], [0], [0], [1], [0, 0, 1, 1], [], []>} : vector<8x32xbf16>, vector<32x2048xbf16>, vector<8x2048xf32> -> vector<8x2048xf32>
    %c0_47 = arith.constant 0 : index
    %c0_48 = arith.constant 0 : index
    %128 = vector.load %arg9[%c0_47, %c0_48] : memref<1x2048xf32, #tpu.memory_space<vmem>>, vector<1x2048xf32>
    %129 = vector.broadcast %128 : vector<1x2048xf32> to vector<8x2048xf32>
    %130 = arith.addf %127, %129 : vector<8x2048xf32>
    %cst_49 = arith.constant 0.000000e+00 : f32
    %131 = vector.broadcast %cst_49 : f32 to vector<8x2048xf32>
    %132 = arith.maximumf %130, %131 : vector<8x2048xf32>
    %c0_50 = arith.constant 0 : index
    %c0_51 = arith.constant 0 : index
    %133 = vector.load %arg10[%c0_50, %c0_51] : memref<2048x32xf32, #tpu.memory_space<vmem>>, vector<2048x32xf32>
    %134 = arith.truncf %132 : vector<8x2048xf32> to vector<8x2048xbf16>
    %135 = arith.truncf %133 : vector<2048x32xf32> to vector<2048x32xbf16>
    %cst_52 = arith.constant dense<0.000000e+00> : vector<8x32xf32>
    %136 = tpu.matmul %134, %135, %cst_52 {dimension_numbers = #tpu.dot_dimension_numbers<[1], [0], [0], [1], [0, 0, 1, 1], [], []>} : vector<8x2048xbf16>, vector<2048x32xbf16>, vector<8x32xf32> -> vector<8x32xf32>
    %c0_53 = arith.constant 0 : index
    %c0_54 = arith.constant 0 : index
    %137 = vector.load %arg11[%c0_53, %c0_54] : memref<1x32xf32, #tpu.memory_space<vmem>>, vector<1x32xf32>
    %138 = vector.broadcast %137 : vector<1x32xf32> to vector<8x32xf32>
    %139 = arith.addf %136, %138 : vector<8x32xf32>
    %140 = arith.addf %123, %139 : vector<8x32xf32>
    %c0_55 = arith.constant 0 : index
    %c0_56 = arith.constant 0 : index
    %141 = vector.load %arg12[%c0_55, %c0_56] : memref<1x32xf32, #tpu.memory_space<vmem>>, vector<1x32xf32>
    %c0_57 = arith.constant 0 : index
    %c0_58 = arith.constant 0 : index
    %142 = vector.load %arg13[%c0_57, %c0_58] : memref<1x32xf32, #tpu.memory_space<vmem>>, vector<1x32xf32>
    %cst_59 = arith.constant dense<0.000000e+00> : vector<8xf32>
    %143 = vector.multi_reduction <add>, %140, %cst_59 [1] : vector<8x32xf32> to vector<8xf32>
    %144 = vector.shape_cast %143 : vector<8xf32> to vector<8x1xf32>
    %cst_60 = arith.constant 3.200000e+01 : f32
    %145 = vector.broadcast %cst_60 : f32 to vector<8x1xf32>
    %146 = arith.divf %144, %145 : vector<8x1xf32>
    %147 = vector.broadcast %146 : vector<8x1xf32> to vector<8x32xf32>
    %148 = arith.subf %140, %147 : vector<8x32xf32>
    %149 = arith.mulf %148, %148 : vector<8x32xf32>
    %cst_61 = arith.constant dense<0.000000e+00> : vector<8xf32>
    %150 = vector.multi_reduction <add>, %149, %cst_61 [1] : vector<8x32xf32> to vector<8xf32>
    %151 = vector.shape_cast %150 : vector<8xf32> to vector<8x1xf32>
    %cst_62 = arith.constant 3.200000e+01 : f32
    %152 = vector.broadcast %cst_62 : f32 to vector<8x1xf32>
    %153 = arith.divf %151, %152 : vector<8x1xf32>
    %154 = vector.broadcast %146 : vector<8x1xf32> to vector<8x32xf32>
    %155 = arith.subf %140, %154 : vector<8x32xf32>
    %cst_63 = arith.constant 9.99999974E-6 : f32
    %156 = vector.broadcast %cst_63 : f32 to vector<8x1xf32>
    %157 = arith.addf %153, %156 : vector<8x1xf32>
    %158 = math.rsqrt %157 : vector<8x1xf32>
    %159 = vector.broadcast %158 : vector<8x1xf32> to vector<8x32xf32>
    %160 = arith.mulf %155, %159 : vector<8x32xf32>
    %161 = vector.broadcast %141 : vector<1x32xf32> to vector<8x32xf32>
    %162 = arith.mulf %160, %161 : vector<8x32xf32>
    %163 = vector.broadcast %142 : vector<1x32xf32> to vector<8x32xf32>
    %164 = arith.addf %162, %163 : vector<8x32xf32>
    %c0_64 = arith.constant 0 : index
    %c0_65 = arith.constant 0 : index
    %c0_66 = arith.constant 0 : index
    %165 = vector.load %arg14[%c0_64, %c0_65, %c0_66] : memref<1x8x32xf32, #tpu.memory_space<vmem>>, vector<1x8x32xf32>
    %166 = vector.shape_cast %165 : vector<1x8x32xf32> to vector<8x32xf32>
    %167 = vector.shape_cast %164 : vector<8x32xf32> to vector<1x8x32xf32>
    tpu.vector_store %arg14[%c0_64, %c0_65, %c0_66], %167 {strides = array<i32>} : memref<1x8x32xf32, #tpu.memory_space<vmem>>, vector<1x8x32xf32>,
    return
  }
  func.func @transform_0(%arg0: i32) -> (i32, i32, i32) {
    %c0_i32 = arith.constant 0 : i32
    %c0_i32_0 = arith.constant 0 : i32
    %c0_i32_1 = arith.constant 0 : i32
    return %arg0, %c0_i32, %c0_i32_0 : i32, i32, i32
  }
  func.func @transform_1(%arg0: i32) -> (i32, i32) {
    %c0_i32 = arith.constant 0 : i32
    %c0_i32_0 = arith.constant 0 : i32
    %c0_i32_1 = arith.constant 0 : i32
    return %c0_i32, %c0_i32_0 : i32, i32
  }
  func.func @transform_2(%arg0: i32) -> (i32, i32) {
    %c0_i32 = arith.constant 0 : i32
    %c0_i32_0 = arith.constant 0 : i32
    %c0_i32_1 = arith.constant 0 : i32
    return %c0_i32, %c0_i32_0 : i32, i32
  }
  func.func @transform_3(%arg0: i32) -> (i32, i32) {
    %c0_i32 = arith.constant 0 : i32
    %c0_i32_0 = arith.constant 0 : i32
    %c0_i32_1 = arith.constant 0 : i32
    return %c0_i32, %c0_i32_0 : i32, i32
  }
  func.func @transform_4(%arg0: i32) -> (i32, i32) {
    %c0_i32 = arith.constant 0 : i32
    %c0_i32_0 = arith.constant 0 : i32
    %c0_i32_1 = arith.constant 0 : i32
    return %c0_i32, %c0_i32_0 : i32, i32
  }
  func.func @transform_5(%arg0: i32) -> (i32, i32) {
    %c0_i32 = arith.constant 0 : i32
    %c0_i32_0 = arith.constant 0 : i32
    %c0_i32_1 = arith.constant 0 : i32
    return %c0_i32, %c0_i32_0 : i32, i32
  }
  func.func @transform_6(%arg0: i32) -> (i32, i32) {
    %c0_i32 = arith.constant 0 : i32
    %c0_i32_0 = arith.constant 0 : i32
    %c0_i32_1 = arith.constant 0 : i32
    return %c0_i32, %c0_i32_0 : i32, i32
  }
  func.func @transform_7(%arg0: i32) -> (i32, i32) {
    %c0_i32 = arith.constant 0 : i32
    %c0_i32_0 = arith.constant 0 : i32
    %c0_i32_1 = arith.constant 0 : i32
    return %c0_i32, %c0_i32_0 : i32, i32
  }
  func.func @transform_8(%arg0: i32) -> (i32, i32) {
    %c0_i32 = arith.constant 0 : i32
    %c0_i32_0 = arith.constant 0 : i32
    %c0_i32_1 = arith.constant 0 : i32
    return %c0_i32, %c0_i32_0 : i32, i32
  }
  func.func @transform_9(%arg0: i32) -> (i32, i32) {
    %c0_i32 = arith.constant 0 : i32
    %c0_i32_0 = arith.constant 0 : i32
    %c0_i32_1 = arith.constant 0 : i32
    return %c0_i32, %c0_i32_0 : i32, i32
  }
  func.func @transform_10(%arg0: i32) -> (i32, i32) {
    %c0_i32 = arith.constant 0 : i32
    %c0_i32_0 = arith.constant 0 : i32
    %c0_i32_1 = arith.constant 0 : i32
    return %c0_i32, %c0_i32_0 : i32, i32
  }
  func.func @transform_11(%arg0: i32) -> (i32, i32) {
    %c0_i32 = arith.constant 0 : i32
    %c0_i32_0 = arith.constant 0 : i32
    %c0_i32_1 = arith.constant 0 : i32
    return %c0_i32, %c0_i32_0 : i32, i32
  }
  func.func @transform_12(%arg0: i32) -> (i32, i32) {
    %c0_i32 = arith.constant 0 : i32
    %c0_i32_0 = arith.constant 0 : i32
    %c0_i32_1 = arith.constant 0 : i32
    return %c0_i32, %c0_i32_0 : i32, i32
  }
  func.func @transform_13(%arg0: i32) -> (i32, i32, i32) {
    %c0_i32 = arith.constant 0 : i32
    %c0_i32_0 = arith.constant 0 : i32
    %c0_i32_1 = arith.constant 0 : i32
    return %arg0, %c0_i32, %c0_i32_0 : i32, i32, i32
  }
}

module attributes {stable_mosaic.version = 11 : i64} {
  func.func @_final_head_kernel(%arg0: memref<16x32xf32, #tpu.memory_space<vmem>>, %arg1: memref<1x32xf32, #tpu.memory_space<vmem>>, %arg2: memref<1x32xf32, #tpu.memory_space<vmem>>, %arg3: memref<32x1xf32, #tpu.memory_space<vmem>>, %arg4: memref<1x1xf32, #tpu.memory_space<vmem>>, %arg5: memref<16x1xf32, #tpu.memory_space<vmem>>) attributes {dimension_semantics = [], scalar_prefetch = 0 : i64, scratch_operands = 0 : i64, tpu.core_type = #tpu.core_type<tc>} {
    %c0 = arith.constant 0 : index
    %c0_0 = arith.constant 0 : index
    %0 = vector.load %arg0[%c0, %c0_0] : memref<16x32xf32, #tpu.memory_space<vmem>>, vector<16x32xf32>
    %c0_1 = arith.constant 0 : index
    %c0_2 = arith.constant 0 : index
    %1 = vector.load %arg1[%c0_1, %c0_2] : memref<1x32xf32, #tpu.memory_space<vmem>>, vector<1x32xf32>
    %c0_3 = arith.constant 0 : index
    %c0_4 = arith.constant 0 : index
    %2 = vector.load %arg2[%c0_3, %c0_4] : memref<1x32xf32, #tpu.memory_space<vmem>>, vector<1x32xf32>
    %cst = arith.constant dense<0.000000e+00> : vector<16xf32>
    %3 = vector.multi_reduction <add>, %0, %cst [1] : vector<16x32xf32> to vector<16xf32>
    %4 = vector.shape_cast %3 : vector<16xf32> to vector<16x1xf32>
    %cst_5 = arith.constant 3.200000e+01 : f32
    %5 = vector.broadcast %cst_5 : f32 to vector<16x1xf32>
    %6 = arith.divf %4, %5 : vector<16x1xf32>
    %7 = vector.broadcast %6 : vector<16x1xf32> to vector<16x32xf32>
    %8 = arith.subf %0, %7 : vector<16x32xf32>
    %9 = arith.mulf %8, %8 : vector<16x32xf32>
    %cst_6 = arith.constant dense<0.000000e+00> : vector<16xf32>
    %10 = vector.multi_reduction <add>, %9, %cst_6 [1] : vector<16x32xf32> to vector<16xf32>
    %11 = vector.shape_cast %10 : vector<16xf32> to vector<16x1xf32>
    %cst_7 = arith.constant 3.200000e+01 : f32
    %12 = vector.broadcast %cst_7 : f32 to vector<16x1xf32>
    %13 = arith.divf %11, %12 : vector<16x1xf32>
    %14 = vector.broadcast %6 : vector<16x1xf32> to vector<16x32xf32>
    %15 = arith.subf %0, %14 : vector<16x32xf32>
    %cst_8 = arith.constant 9.99999974E-6 : f32
    %16 = vector.broadcast %cst_8 : f32 to vector<16x1xf32>
    %17 = arith.addf %13, %16 : vector<16x1xf32>
    %18 = math.rsqrt %17 : vector<16x1xf32>
    %19 = vector.broadcast %18 : vector<16x1xf32> to vector<16x32xf32>
    %20 = arith.mulf %15, %19 : vector<16x32xf32>
    %21 = vector.broadcast %1 : vector<1x32xf32> to vector<16x32xf32>
    %22 = arith.mulf %20, %21 : vector<16x32xf32>
    %23 = vector.broadcast %2 : vector<1x32xf32> to vector<16x32xf32>
    %24 = arith.addf %22, %23 : vector<16x32xf32>
    %c0_9 = arith.constant 0 : index
    %c0_10 = arith.constant 0 : index
    %25 = vector.load %arg3[%c0_9, %c0_10] : memref<32x1xf32, #tpu.memory_space<vmem>>, vector<32x1xf32>
    %cst_11 = arith.constant dense<0.000000e+00> : vector<16x1xf32>
    %26 = tpu.matmul %24, %25, %cst_11 {dimension_numbers = #tpu.dot_dimension_numbers<[1], [0], [0], [1], [0, 0, 1, 1], [], []>} : vector<16x32xf32>, vector<32x1xf32>, vector<16x1xf32> -> vector<16x1xf32>
    %c0_12 = arith.constant 0 : index
    %c0_13 = arith.constant 0 : index
    %27 = vector.load %arg4[%c0_12, %c0_13] : memref<1x1xf32, #tpu.memory_space<vmem>>, vector<1x1xf32>
    %28 = vector.broadcast %27 : vector<1x1xf32> to vector<16x1xf32>
    %29 = arith.addf %26, %28 : vector<16x1xf32>
    %30 = arith.negf %29 : vector<16x1xf32>
    %31 = math.exp %30 : vector<16x1xf32>
    %cst_14 = arith.constant 1.000000e+00 : f32
    %32 = vector.broadcast %cst_14 : f32 to vector<16x1xf32>
    %33 = arith.addf %32, %31 : vector<16x1xf32>
    %34 = arith.divf %32, %33 : vector<16x1xf32>
    %c0_15 = arith.constant 0 : index
    %c0_16 = arith.constant 0 : index
    %35 = vector.load %arg5[%c0_15, %c0_16] : memref<16x1xf32, #tpu.memory_space<vmem>>, vector<16x1xf32>
    tpu.vector_store %arg5[%c0_15, %c0_16], %34 {strides = array<i32>} : memref<16x1xf32, #tpu.memory_space<vmem>>, vector<16x1xf32>,
    return
  }
}

module attributes {stable_mosaic.version = 11 : i64} {
  func.func @_decoder_layer_kernel(%arg0: i32, %arg1: memref<1x8x32xf32, #tpu.memory_space<vmem>>, %arg2: memref<1x8x32xf32, #tpu.memory_space<vmem>>, %arg3: memref<32x96xf32, #tpu.memory_space<vmem>>, %arg4: memref<1x96xf32, #tpu.memory_space<vmem>>, %arg5: memref<32x32xf32, #tpu.memory_space<vmem>>, %arg6: memref<1x32xf32, #tpu.memory_space<vmem>>, %arg7: memref<1x32xf32, #tpu.memory_space<vmem>>, %arg8: memref<1x32xf32, #tpu.memory_space<vmem>>, %arg9: memref<32x32xf32, #tpu.memory_space<vmem>>, %arg10: memref<1x32xf32, #tpu.memory_space<vmem>>, %arg11: memref<32x64xf32, #tpu.memory_space<vmem>>, %arg12: memref<1x64xf32, #tpu.memory_space<vmem>>, %arg13: memref<32x32xf32, #tpu.memory_space<vmem>>, %arg14: memref<1x32xf32, #tpu.memory_space<vmem>>, %arg15: memref<1x32xf32, #tpu.memory_space<vmem>>, %arg16: memref<1x32xf32, #tpu.memory_space<vmem>>, %arg17: memref<32x2048xf32, #tpu.memory_space<vmem>>, %arg18: memref<1x2048xf32, #tpu.memory_space<vmem>>, %arg19: memref<2048x32xf32, #tpu.memory_space<vmem>>, %arg20: memref<1x32xf32, #tpu.memory_space<vmem>>, %arg21: memref<1x32xf32, #tpu.memory_space<vmem>>, %arg22: memref<1x32xf32, #tpu.memory_space<vmem>>, %arg23: memref<1x8x32xf32, #tpu.memory_space<vmem>>) attributes {dimension_semantics = [#tpu.dimension_semantics<parallel>], iteration_bounds = array<i64: 2>, scalar_prefetch = 0 : i64, scratch_operands = 0 : i64, tpu.core_type = #tpu.core_type<tc>, window_params = [{transform_indices = @transform_0, window_bounds = array<i64: 1, 8, 32>}, {transform_indices = @transform_1, window_bounds = array<i64: 1, 8, 32>}, {pipeline_mode = #tpu.pipeline_mode<synchronous>, transform_indices = @transform_2, window_bounds = array<i64: 32, 96>}, {pipeline_mode = #tpu.pipeline_mode<synchronous>, transform_indices = @transform_3, window_bounds = array<i64: 1, 96>}, {pipeline_mode = #tpu.pipeline_mode<synchronous>, transform_indices = @transform_4, window_bounds = array<i64: 32, 32>}, {pipeline_mode = #tpu.pipeline_mode<synchronous>, transform_indices = @transform_5, window_bounds = array<i64: 1, 32>}, {pipeline_mode = #tpu.pipeline_mode<synchronous>, transform_indices = @transform_6, window_bounds = array<i64: 1, 32>}, {pipeline_mode = #tpu.pipeline_mode<synchronous>, transform_indices = @transform_7, window_bounds = array<i64: 1, 32>}, {pipeline_mode = #tpu.pipeline_mode<synchronous>, transform_indices = @transform_8, window_bounds = array<i64: 32, 32>}, {pipeline_mode = #tpu.pipeline_mode<synchronous>, transform_indices = @transform_9, window_bounds = array<i64: 1, 32>}, {pipeline_mode = #tpu.pipeline_mode<synchronous>, transform_indices = @transform_10, window_bounds = array<i64: 32, 64>}, {pipeline_mode = #tpu.pipeline_mode<synchronous>, transform_indices = @transform_11, window_bounds = array<i64: 1, 64>}, {pipeline_mode = #tpu.pipeline_mode<synchronous>, transform_indices = @transform_12, window_bounds = array<i64: 32, 32>}, {pipeline_mode = #tpu.pipeline_mode<synchronous>, transform_indices = @transform_13, window_bounds = array<i64: 1, 32>}, {pipeline_mode = #tpu.pipeline_mode<synchronous>, transform_indices = @transform_14, window_bounds = array<i64: 1, 32>}, {pipeline_mode = #tpu.pipeline_mode<synchronous>, transform_indices = @transform_15, window_bounds = array<i64: 1, 32>}, {pipeline_mode = #tpu.pipeline_mode<synchronous>, transform_indices = @transform_16, window_bounds = array<i64: 32, 2048>}, {pipeline_mode = #tpu.pipeline_mode<synchronous>, transform_indices = @transform_17, window_bounds = array<i64: 1, 2048>}, {pipeline_mode = #tpu.pipeline_mode<synchronous>, transform_indices = @transform_18, window_bounds = array<i64: 2048, 32>}, {pipeline_mode = #tpu.pipeline_mode<synchronous>, transform_indices = @transform_19, window_bounds = array<i64: 1, 32>}, {pipeline_mode = #tpu.pipeline_mode<synchronous>, transform_indices = @transform_20, window_bounds = array<i64: 1, 32>}, {pipeline_mode = #tpu.pipeline_mode<synchronous>, transform_indices = @transform_21, window_bounds = array<i64: 1, 32>}, {transform_indices = @transform_22, window_bounds = array<i64: 1, 8, 32>}]} {
    %c0 = arith.constant 0 : index
    %c0_0 = arith.constant 0 : index
    %c0_1 = arith.constant 0 : index
    %0 = vector.load %arg1[%c0, %c0_0, %c0_1] : memref<1x8x32xf32, #tpu.memory_space<vmem>>, vector<1x8x32xf32>
    %1 = vector.shape_cast %0 : vector<1x8x32xf32> to vector<8x32xf32>
    %c0_2 = arith.constant 0 : index
    %c0_3 = arith.constant 0 : index
    %c0_4 = arith.constant 0 : index
    %2 = vector.load %arg2[%c0_2, %c0_3, %c0_4] : memref<1x8x32xf32, #tpu.memory_space<vmem>>, vector<1x8x32xf32>
    %3 = vector.shape_cast %2 : vector<1x8x32xf32> to vector<8x32xf32>
    %c0_5 = arith.constant 0 : index
    %c0_6 = arith.constant 0 : index
    %4 = vector.load %arg3[%c0_5, %c0_6] : memref<32x96xf32, #tpu.memory_space<vmem>>, vector<32x96xf32>
    %5 = arith.truncf %1 : vector<8x32xf32> to vector<8x32xbf16>
    %6 = arith.truncf %4 : vector<32x96xf32> to vector<32x96xbf16>
    %cst = arith.constant dense<0.000000e+00> : vector<8x96xf32>
    %7 = tpu.matmul %5, %6, %cst {dimension_numbers = #tpu.dot_dimension_numbers<[1], [0], [0], [1], [0, 0, 1, 1], [], []>} : vector<8x32xbf16>, vector<32x96xbf16>, vector<8x96xf32> -> vector<8x96xf32>
    %c0_7 = arith.constant 0 : index
    %c0_8 = arith.constant 0 : index
    %8 = vector.load %arg4[%c0_7, %c0_8] : memref<1x96xf32, #tpu.memory_space<vmem>>, vector<1x96xf32>
    %9 = vector.broadcast %8 : vector<1x96xf32> to vector<8x96xf32>
    %10 = arith.addf %7, %9 : vector<8x96xf32>
    %11 = vector.extract_strided_slice %10 {offsets = [0, 0], sizes = [8, 32], strides = [1, 1]} : vector<8x96xf32> to vector<8x32xf32>
    %12 = vector.extract_strided_slice %10 {offsets = [0, 32], sizes = [8, 32], strides = [1, 1]} : vector<8x96xf32> to vector<8x32xf32>
    %13 = vector.extract_strided_slice %10 {offsets = [0, 64], sizes = [8, 32], strides = [1, 1]} : vector<8x96xf32> to vector<8x32xf32>
    %14 = tpu.iota {dimensions = array<i32: 0>} : vector<8x8xi32>
    %15 = tpu.iota {dimensions = array<i32: 1>} : vector<8x8xi32>
    %16 = arith.cmpi sle, %15, %14 : vector<8x8xi32>
    %17 = vector.extract_strided_slice %11 {offsets = [0, 0], sizes = [8, 8], strides = [1, 1]} : vector<8x32xf32> to vector<8x8xf32>
    %cst_9 = arith.constant 0.353553385 : f32
    %18 = vector.broadcast %cst_9 : f32 to vector<8x8xf32>
    %19 = arith.mulf %17, %18 : vector<8x8xf32>
    %20 = vector.extract_strided_slice %12 {offsets = [0, 0], sizes = [8, 8], strides = [1, 1]} : vector<8x32xf32> to vector<8x8xf32>
    %21 = vector.extract_strided_slice %13 {offsets = [0, 0], sizes = [8, 8], strides = [1, 1]} : vector<8x32xf32> to vector<8x8xf32>
    %cst_10 = arith.constant dense<0.000000e+00> : vector<8x8xf32>
    %22 = tpu.matmul %19, %20, %cst_10 {dimension_numbers = #tpu.dot_dimension_numbers<[1], [1], [0], [0], [0, 0, 1, 0], [], []>} : vector<8x8xf32>, vector<8x8xf32>, vector<8x8xf32> -> vector<8x8xf32>
    %cst_11 = arith.constant 0xFF800000 : f32
    %23 = vector.broadcast %cst_11 : f32 to vector<8x8xf32>
    %24 = arith.select %16, %22, %23 : vector<8x8xi1>, vector<8x8xf32>
    %cst_12 = arith.constant dense<0xFF800000> : vector<8xf32>
    %25 = vector.multi_reduction <maximumf>, %24, %cst_12 [1] : vector<8x8xf32> to vector<8xf32>
    %26 = vector.shape_cast %25 : vector<8xf32> to vector<8x1xf32>
    %27 = vector.broadcast %26 : vector<8x1xf32> to vector<8x8xf32>
    %28 = arith.subf %24, %27 : vector<8x8xf32>
    %29 = math.exp %28 : vector<8x8xf32>
    %cst_13 = arith.constant dense<0.000000e+00> : vector<8xf32>
    %30 = vector.multi_reduction <add>, %29, %cst_13 [1] : vector<8x8xf32> to vector<8xf32>
    %31 = vector.shape_cast %30 : vector<8xf32> to vector<8x1xf32>
    %cst_14 = arith.constant dense<0.000000e+00> : vector<8x8xf32>
    %32 = tpu.matmul %29, %21, %cst_14 {dimension_numbers = #tpu.dot_dimension_numbers<[1], [0], [0], [1], [0, 0, 1, 1], [], []>} : vector<8x8xf32>, vector<8x8xf32>, vector<8x8xf32> -> vector<8x8xf32>
    %33 = tpu.reciprocal %31 {approx = true} : vector<8x1xf32> -> vector<8x1xf32>
    %34 = vector.broadcast %33 : vector<8x1xf32> to vector<8x8xf32>
    %35 = arith.mulf %32, %34 : vector<8x8xf32>
    %36 = vector.extract_strided_slice %11 {offsets = [0, 8], sizes = [8, 8], strides = [1, 1]} : vector<8x32xf32> to vector<8x8xf32>
    %cst_15 = arith.constant 0.353553385 : f32
    %37 = vector.broadcast %cst_15 : f32 to vector<8x8xf32>
    %38 = arith.mulf %36, %37 : vector<8x8xf32>
    %39 = vector.extract_strided_slice %12 {offsets = [0, 8], sizes = [8, 8], strides = [1, 1]} : vector<8x32xf32> to vector<8x8xf32>
    %40 = vector.extract_strided_slice %13 {offsets = [0, 8], sizes = [8, 8], strides = [1, 1]} : vector<8x32xf32> to vector<8x8xf32>
    %cst_16 = arith.constant dense<0.000000e+00> : vector<8x8xf32>
    %41 = tpu.matmul %38, %39, %cst_16 {dimension_numbers = #tpu.dot_dimension_numbers<[1], [1], [0], [0], [0, 0, 1, 0], [], []>} : vector<8x8xf32>, vector<8x8xf32>, vector<8x8xf32> -> vector<8x8xf32>
    %cst_17 = arith.constant 0xFF800000 : f32
    %42 = vector.broadcast %cst_17 : f32 to vector<8x8xf32>
    %43 = arith.select %16, %41, %42 : vector<8x8xi1>, vector<8x8xf32>
    %cst_18 = arith.constant dense<0xFF800000> : vector<8xf32>
    %44 = vector.multi_reduction <maximumf>, %43, %cst_18 [1] : vector<8x8xf32> to vector<8xf32>
    %45 = vector.shape_cast %44 : vector<8xf32> to vector<8x1xf32>
    %46 = vector.broadcast %45 : vector<8x1xf32> to vector<8x8xf32>
    %47 = arith.subf %43, %46 : vector<8x8xf32>
    %48 = math.exp %47 : vector<8x8xf32>
    %cst_19 = arith.constant dense<0.000000e+00> : vector<8xf32>
    %49 = vector.multi_reduction <add>, %48, %cst_19 [1] : vector<8x8xf32> to vector<8xf32>
    %50 = vector.shape_cast %49 : vector<8xf32> to vector<8x1xf32>
    %cst_20 = arith.constant dense<0.000000e+00> : vector<8x8xf32>
    %51 = tpu.matmul %48, %40, %cst_20 {dimension_numbers = #tpu.dot_dimension_numbers<[1], [0], [0], [1], [0, 0, 1, 1], [], []>} : vector<8x8xf32>, vector<8x8xf32>, vector<8x8xf32> -> vector<8x8xf32>
    %52 = tpu.reciprocal %50 {approx = true} : vector<8x1xf32> -> vector<8x1xf32>
    %53 = vector.broadcast %52 : vector<8x1xf32> to vector<8x8xf32>
    %54 = arith.mulf %51, %53 : vector<8x8xf32>
    %55 = vector.extract_strided_slice %11 {offsets = [0, 16], sizes = [8, 8], strides = [1, 1]} : vector<8x32xf32> to vector<8x8xf32>
    %cst_21 = arith.constant 0.353553385 : f32
    %56 = vector.broadcast %cst_21 : f32 to vector<8x8xf32>
    %57 = arith.mulf %55, %56 : vector<8x8xf32>
    %58 = vector.extract_strided_slice %12 {offsets = [0, 16], sizes = [8, 8], strides = [1, 1]} : vector<8x32xf32> to vector<8x8xf32>
    %59 = vector.extract_strided_slice %13 {offsets = [0, 16], sizes = [8, 8], strides = [1, 1]} : vector<8x32xf32> to vector<8x8xf32>
    %cst_22 = arith.constant dense<0.000000e+00> : vector<8x8xf32>
    %60 = tpu.matmul %57, %58, %cst_22 {dimension_numbers = #tpu.dot_dimension_numbers<[1], [1], [0], [0], [0, 0, 1, 0], [], []>} : vector<8x8xf32>, vector<8x8xf32>, vector<8x8xf32> -> vector<8x8xf32>
    %cst_23 = arith.constant 0xFF800000 : f32
    %61 = vector.broadcast %cst_23 : f32 to vector<8x8xf32>
    %62 = arith.select %16, %60, %61 : vector<8x8xi1>, vector<8x8xf32>
    %cst_24 = arith.constant dense<0xFF800000> : vector<8xf32>
    %63 = vector.multi_reduction <maximumf>, %62, %cst_24 [1] : vector<8x8xf32> to vector<8xf32>
    %64 = vector.shape_cast %63 : vector<8xf32> to vector<8x1xf32>
    %65 = vector.broadcast %64 : vector<8x1xf32> to vector<8x8xf32>
    %66 = arith.subf %62, %65 : vector<8x8xf32>
    %67 = math.exp %66 : vector<8x8xf32>
    %cst_25 = arith.constant dense<0.000000e+00> : vector<8xf32>
    %68 = vector.multi_reduction <add>, %67, %cst_25 [1] : vector<8x8xf32> to vector<8xf32>
    %69 = vector.shape_cast %68 : vector<8xf32> to vector<8x1xf32>
    %cst_26 = arith.constant dense<0.000000e+00> : vector<8x8xf32>
    %70 = tpu.matmul %67, %59, %cst_26 {dimension_numbers = #tpu.dot_dimension_numbers<[1], [0], [0], [1], [0, 0, 1, 1], [], []>} : vector<8x8xf32>, vector<8x8xf32>, vector<8x8xf32> -> vector<8x8xf32>
    %71 = tpu.reciprocal %69 {approx = true} : vector<8x1xf32> -> vector<8x1xf32>
    %72 = vector.broadcast %71 : vector<8x1xf32> to vector<8x8xf32>
    %73 = arith.mulf %70, %72 : vector<8x8xf32>
    %74 = vector.extract_strided_slice %11 {offsets = [0, 24], sizes = [8, 8], strides = [1, 1]} : vector<8x32xf32> to vector<8x8xf32>
    %cst_27 = arith.constant 0.353553385 : f32
    %75 = vector.broadcast %cst_27 : f32 to vector<8x8xf32>
    %76 = arith.mulf %74, %75 : vector<8x8xf32>
    %77 = vector.extract_strided_slice %12 {offsets = [0, 24], sizes = [8, 8], strides = [1, 1]} : vector<8x32xf32> to vector<8x8xf32>
    %78 = vector.extract_strided_slice %13 {offsets = [0, 24], sizes = [8, 8], strides = [1, 1]} : vector<8x32xf32> to vector<8x8xf32>
    %cst_28 = arith.constant dense<0.000000e+00> : vector<8x8xf32>
    %79 = tpu.matmul %76, %77, %cst_28 {dimension_numbers = #tpu.dot_dimension_numbers<[1], [1], [0], [0], [0, 0, 1, 0], [], []>} : vector<8x8xf32>, vector<8x8xf32>, vector<8x8xf32> -> vector<8x8xf32>
    %cst_29 = arith.constant 0xFF800000 : f32
    %80 = vector.broadcast %cst_29 : f32 to vector<8x8xf32>
    %81 = arith.select %16, %79, %80 : vector<8x8xi1>, vector<8x8xf32>
    %cst_30 = arith.constant dense<0xFF800000> : vector<8xf32>
    %82 = vector.multi_reduction <maximumf>, %81, %cst_30 [1] : vector<8x8xf32> to vector<8xf32>
    %83 = vector.shape_cast %82 : vector<8xf32> to vector<8x1xf32>
    %84 = vector.broadcast %83 : vector<8x1xf32> to vector<8x8xf32>
    %85 = arith.subf %81, %84 : vector<8x8xf32>
    %86 = math.exp %85 : vector<8x8xf32>
    %cst_31 = arith.constant dense<0.000000e+00> : vector<8xf32>
    %87 = vector.multi_reduction <add>, %86, %cst_31 [1] : vector<8x8xf32> to vector<8xf32>
    %88 = vector.shape_cast %87 : vector<8xf32> to vector<8x1xf32>
    %cst_32 = arith.constant dense<0.000000e+00> : vector<8x8xf32>
    %89 = tpu.matmul %86, %78, %cst_32 {dimension_numbers = #tpu.dot_dimension_numbers<[1], [0], [0], [1], [0, 0, 1, 1], [], []>} : vector<8x8xf32>, vector<8x8xf32>, vector<8x8xf32> -> vector<8x8xf32>
    %90 = tpu.reciprocal %88 {approx = true} : vector<8x1xf32> -> vector<8x1xf32>
    %91 = vector.broadcast %90 : vector<8x1xf32> to vector<8x8xf32>
    %92 = arith.mulf %89, %91 : vector<8x8xf32>
    %93 = tpu.concatenate %35, %54, %73, %92 in 1 : vector<8x8xf32>, vector<8x8xf32>, vector<8x8xf32>, vector<8x8xf32> -> vector<8x32xf32>
    %c0_33 = arith.constant 0 : index
    %c0_34 = arith.constant 0 : index
    %94 = vector.load %arg5[%c0_33, %c0_34] : memref<32x32xf32, #tpu.memory_space<vmem>>, vector<32x32xf32>
    %95 = arith.truncf %93 : vector<8x32xf32> to vector<8x32xbf16>
    %96 = arith.truncf %94 : vector<32x32xf32> to vector<32x32xbf16>
    %cst_35 = arith.constant dense<0.000000e+00> : vector<8x32xf32>
    %97 = tpu.matmul %95, %96, %cst_35 {dimension_numbers = #tpu.dot_dimension_numbers<[1], [0], [0], [1], [0, 0, 1, 1], [], []>} : vector<8x32xbf16>, vector<32x32xbf16>, vector<8x32xf32> -> vector<8x32xf32>
    %c0_36 = arith.constant 0 : index
    %c0_37 = arith.constant 0 : index
    %98 = vector.load %arg6[%c0_36, %c0_37] : memref<1x32xf32, #tpu.memory_space<vmem>>, vector<1x32xf32>
    %99 = vector.broadcast %98 : vector<1x32xf32> to vector<8x32xf32>
    %100 = arith.addf %97, %99 : vector<8x32xf32>
    %101 = arith.addf %1, %100 : vector<8x32xf32>
    %c0_38 = arith.constant 0 : index
    %c0_39 = arith.constant 0 : index
    %102 = vector.load %arg7[%c0_38, %c0_39] : memref<1x32xf32, #tpu.memory_space<vmem>>, vector<1x32xf32>
    %c0_40 = arith.constant 0 : index
    %c0_41 = arith.constant 0 : index
    %103 = vector.load %arg8[%c0_40, %c0_41] : memref<1x32xf32, #tpu.memory_space<vmem>>, vector<1x32xf32>
    %cst_42 = arith.constant dense<0.000000e+00> : vector<8xf32>
    %104 = vector.multi_reduction <add>, %101, %cst_42 [1] : vector<8x32xf32> to vector<8xf32>
    %105 = vector.shape_cast %104 : vector<8xf32> to vector<8x1xf32>
    %cst_43 = arith.constant 3.200000e+01 : f32
    %106 = vector.broadcast %cst_43 : f32 to vector<8x1xf32>
    %107 = arith.divf %105, %106 : vector<8x1xf32>
    %108 = vector.broadcast %107 : vector<8x1xf32> to vector<8x32xf32>
    %109 = arith.subf %101, %108 : vector<8x32xf32>
    %110 = arith.mulf %109, %109 : vector<8x32xf32>
    %cst_44 = arith.constant dense<0.000000e+00> : vector<8xf32>
    %111 = vector.multi_reduction <add>, %110, %cst_44 [1] : vector<8x32xf32> to vector<8xf32>
    %112 = vector.shape_cast %111 : vector<8xf32> to vector<8x1xf32>
    %cst_45 = arith.constant 3.200000e+01 : f32
    %113 = vector.broadcast %cst_45 : f32 to vector<8x1xf32>
    %114 = arith.divf %112, %113 : vector<8x1xf32>
    %115 = vector.broadcast %107 : vector<8x1xf32> to vector<8x32xf32>
    %116 = arith.subf %101, %115 : vector<8x32xf32>
    %cst_46 = arith.constant 9.99999974E-6 : f32
    %117 = vector.broadcast %cst_46 : f32 to vector<8x1xf32>
    %118 = arith.addf %114, %117 : vector<8x1xf32>
    %119 = math.rsqrt %118 : vector<8x1xf32>
    %120 = vector.broadcast %119 : vector<8x1xf32> to vector<8x32xf32>
    %121 = arith.mulf %116, %120 : vector<8x32xf32>
    %122 = vector.broadcast %102 : vector<1x32xf32> to vector<8x32xf32>
    %123 = arith.mulf %121, %122 : vector<8x32xf32>
    %124 = vector.broadcast %103 : vector<1x32xf32> to vector<8x32xf32>
    %125 = arith.addf %123, %124 : vector<8x32xf32>
    %c0_47 = arith.constant 0 : index
    %c0_48 = arith.constant 0 : index
    %126 = vector.load %arg9[%c0_47, %c0_48] : memref<32x32xf32, #tpu.memory_space<vmem>>, vector<32x32xf32>
    %127 = arith.truncf %125 : vector<8x32xf32> to vector<8x32xbf16>
    %128 = arith.truncf %126 : vector<32x32xf32> to vector<32x32xbf16>
    %cst_49 = arith.constant dense<0.000000e+00> : vector<8x32xf32>
    %129 = tpu.matmul %127, %128, %cst_49 {dimension_numbers = #tpu.dot_dimension_numbers<[1], [0], [0], [1], [0, 0, 1, 1], [], []>} : vector<8x32xbf16>, vector<32x32xbf16>, vector<8x32xf32> -> vector<8x32xf32>
    %c0_50 = arith.constant 0 : index
    %c0_51 = arith.constant 0 : index
    %130 = vector.load %arg10[%c0_50, %c0_51] : memref<1x32xf32, #tpu.memory_space<vmem>>, vector<1x32xf32>
    %131 = vector.broadcast %130 : vector<1x32xf32> to vector<8x32xf32>
    %132 = arith.addf %129, %131 : vector<8x32xf32>
    %c0_52 = arith.constant 0 : index
    %c0_53 = arith.constant 0 : index
    %133 = vector.load %arg11[%c0_52, %c0_53] : memref<32x64xf32, #tpu.memory_space<vmem>>, vector<32x64xf32>
    %134 = arith.truncf %3 : vector<8x32xf32> to vector<8x32xbf16>
    %135 = arith.truncf %133 : vector<32x64xf32> to vector<32x64xbf16>
    %cst_54 = arith.constant dense<0.000000e+00> : vector<8x64xf32>
    %136 = tpu.matmul %134, %135, %cst_54 {dimension_numbers = #tpu.dot_dimension_numbers<[1], [0], [0], [1], [0, 0, 1, 1], [], []>} : vector<8x32xbf16>, vector<32x64xbf16>, vector<8x64xf32> -> vector<8x64xf32>
    %c0_55 = arith.constant 0 : index
    %c0_56 = arith.constant 0 : index
    %137 = vector.load %arg12[%c0_55, %c0_56] : memref<1x64xf32, #tpu.memory_space<vmem>>, vector<1x64xf32>
    %138 = vector.broadcast %137 : vector<1x64xf32> to vector<8x64xf32>
    %139 = arith.addf %136, %138 : vector<8x64xf32>
    %140 = vector.extract_strided_slice %139 {offsets = [0, 0], sizes = [8, 32], strides = [1, 1]} : vector<8x64xf32> to vector<8x32xf32>
    %141 = vector.extract_strided_slice %139 {offsets = [0, 32], sizes = [8, 32], strides = [1, 1]} : vector<8x64xf32> to vector<8x32xf32>
    %142 = tpu.iota {dimensions = array<i32: 0>} : vector<8x8xi32>
    %143 = tpu.iota {dimensions = array<i32: 1>} : vector<8x8xi32>
    %144 = arith.cmpi sle, %143, %142 : vector<8x8xi32>
    %145 = vector.extract_strided_slice %132 {offsets = [0, 0], sizes = [8, 8], strides = [1, 1]} : vector<8x32xf32> to vector<8x8xf32>
    %cst_57 = arith.constant 0.353553385 : f32
    %146 = vector.broadcast %cst_57 : f32 to vector<8x8xf32>
    %147 = arith.mulf %145, %146 : vector<8x8xf32>
    %148 = vector.extract_strided_slice %140 {offsets = [0, 0], sizes = [8, 8], strides = [1, 1]} : vector<8x32xf32> to vector<8x8xf32>
    %149 = vector.extract_strided_slice %141 {offsets = [0, 0], sizes = [8, 8], strides = [1, 1]} : vector<8x32xf32> to vector<8x8xf32>
    %cst_58 = arith.constant dense<0.000000e+00> : vector<8x8xf32>
    %150 = tpu.matmul %147, %148, %cst_58 {dimension_numbers = #tpu.dot_dimension_numbers<[1], [1], [0], [0], [0, 0, 1, 0], [], []>} : vector<8x8xf32>, vector<8x8xf32>, vector<8x8xf32> -> vector<8x8xf32>
    %cst_59 = arith.constant 0xFF800000 : f32
    %151 = vector.broadcast %cst_59 : f32 to vector<8x8xf32>
    %152 = arith.select %144, %150, %151 : vector<8x8xi1>, vector<8x8xf32>
    %cst_60 = arith.constant dense<0xFF800000> : vector<8xf32>
    %153 = vector.multi_reduction <maximumf>, %152, %cst_60 [1] : vector<8x8xf32> to vector<8xf32>
    %154 = vector.shape_cast %153 : vector<8xf32> to vector<8x1xf32>
    %155 = vector.broadcast %154 : vector<8x1xf32> to vector<8x8xf32>
    %156 = arith.subf %152, %155 : vector<8x8xf32>
    %157 = math.exp %156 : vector<8x8xf32>
    %cst_61 = arith.constant dense<0.000000e+00> : vector<8xf32>
    %158 = vector.multi_reduction <add>, %157, %cst_61 [1] : vector<8x8xf32> to vector<8xf32>
    %159 = vector.shape_cast %158 : vector<8xf32> to vector<8x1xf32>
    %cst_62 = arith.constant dense<0.000000e+00> : vector<8x8xf32>
    %160 = tpu.matmul %157, %149, %cst_62 {dimension_numbers = #tpu.dot_dimension_numbers<[1], [0], [0], [1], [0, 0, 1, 1], [], []>} : vector<8x8xf32>, vector<8x8xf32>, vector<8x8xf32> -> vector<8x8xf32>
    %161 = tpu.reciprocal %159 {approx = true} : vector<8x1xf32> -> vector<8x1xf32>
    %162 = vector.broadcast %161 : vector<8x1xf32> to vector<8x8xf32>
    %163 = arith.mulf %160, %162 : vector<8x8xf32>
    %164 = vector.extract_strided_slice %132 {offsets = [0, 8], sizes = [8, 8], strides = [1, 1]} : vector<8x32xf32> to vector<8x8xf32>
    %cst_63 = arith.constant 0.353553385 : f32
    %165 = vector.broadcast %cst_63 : f32 to vector<8x8xf32>
    %166 = arith.mulf %164, %165 : vector<8x8xf32>
    %167 = vector.extract_strided_slice %140 {offsets = [0, 8], sizes = [8, 8], strides = [1, 1]} : vector<8x32xf32> to vector<8x8xf32>
    %168 = vector.extract_strided_slice %141 {offsets = [0, 8], sizes = [8, 8], strides = [1, 1]} : vector<8x32xf32> to vector<8x8xf32>
    %cst_64 = arith.constant dense<0.000000e+00> : vector<8x8xf32>
    %169 = tpu.matmul %166, %167, %cst_64 {dimension_numbers = #tpu.dot_dimension_numbers<[1], [1], [0], [0], [0, 0, 1, 0], [], []>} : vector<8x8xf32>, vector<8x8xf32>, vector<8x8xf32> -> vector<8x8xf32>
    %cst_65 = arith.constant 0xFF800000 : f32
    %170 = vector.broadcast %cst_65 : f32 to vector<8x8xf32>
    %171 = arith.select %144, %169, %170 : vector<8x8xi1>, vector<8x8xf32>
    %cst_66 = arith.constant dense<0xFF800000> : vector<8xf32>
    %172 = vector.multi_reduction <maximumf>, %171, %cst_66 [1] : vector<8x8xf32> to vector<8xf32>
    %173 = vector.shape_cast %172 : vector<8xf32> to vector<8x1xf32>
    %174 = vector.broadcast %173 : vector<8x1xf32> to vector<8x8xf32>
    %175 = arith.subf %171, %174 : vector<8x8xf32>
    %176 = math.exp %175 : vector<8x8xf32>
    %cst_67 = arith.constant dense<0.000000e+00> : vector<8xf32>
    %177 = vector.multi_reduction <add>, %176, %cst_67 [1] : vector<8x8xf32> to vector<8xf32>
    %178 = vector.shape_cast %177 : vector<8xf32> to vector<8x1xf32>
    %cst_68 = arith.constant dense<0.000000e+00> : vector<8x8xf32>
    %179 = tpu.matmul %176, %168, %cst_68 {dimension_numbers = #tpu.dot_dimension_numbers<[1], [0], [0], [1], [0, 0, 1, 1], [], []>} : vector<8x8xf32>, vector<8x8xf32>, vector<8x8xf32> -> vector<8x8xf32>
    %180 = tpu.reciprocal %178 {approx = true} : vector<8x1xf32> -> vector<8x1xf32>
    %181 = vector.broadcast %180 : vector<8x1xf32> to vector<8x8xf32>
    %182 = arith.mulf %179, %181 : vector<8x8xf32>
    %183 = vector.extract_strided_slice %132 {offsets = [0, 16], sizes = [8, 8], strides = [1, 1]} : vector<8x32xf32> to vector<8x8xf32>
    %cst_69 = arith.constant 0.353553385 : f32
    %184 = vector.broadcast %cst_69 : f32 to vector<8x8xf32>
    %185 = arith.mulf %183, %184 : vector<8x8xf32>
    %186 = vector.extract_strided_slice %140 {offsets = [0, 16], sizes = [8, 8], strides = [1, 1]} : vector<8x32xf32> to vector<8x8xf32>
    %187 = vector.extract_strided_slice %141 {offsets = [0, 16], sizes = [8, 8], strides = [1, 1]} : vector<8x32xf32> to vector<8x8xf32>
    %cst_70 = arith.constant dense<0.000000e+00> : vector<8x8xf32>
    %188 = tpu.matmul %185, %186, %cst_70 {dimension_numbers = #tpu.dot_dimension_numbers<[1], [1], [0], [0], [0, 0, 1, 0], [], []>} : vector<8x8xf32>, vector<8x8xf32>, vector<8x8xf32> -> vector<8x8xf32>
    %cst_71 = arith.constant 0xFF800000 : f32
    %189 = vector.broadcast %cst_71 : f32 to vector<8x8xf32>
    %190 = arith.select %144, %188, %189 : vector<8x8xi1>, vector<8x8xf32>
    %cst_72 = arith.constant dense<0xFF800000> : vector<8xf32>
    %191 = vector.multi_reduction <maximumf>, %190, %cst_72 [1] : vector<8x8xf32> to vector<8xf32>
    %192 = vector.shape_cast %191 : vector<8xf32> to vector<8x1xf32>
    %193 = vector.broadcast %192 : vector<8x1xf32> to vector<8x8xf32>
    %194 = arith.subf %190, %193 : vector<8x8xf32>
    %195 = math.exp %194 : vector<8x8xf32>
    %cst_73 = arith.constant dense<0.000000e+00> : vector<8xf32>
    %196 = vector.multi_reduction <add>, %195, %cst_73 [1] : vector<8x8xf32> to vector<8xf32>
    %197 = vector.shape_cast %196 : vector<8xf32> to vector<8x1xf32>
    %cst_74 = arith.constant dense<0.000000e+00> : vector<8x8xf32>
    %198 = tpu.matmul %195, %187, %cst_74 {dimension_numbers = #tpu.dot_dimension_numbers<[1], [0], [0], [1], [0, 0, 1, 1], [], []>} : vector<8x8xf32>, vector<8x8xf32>, vector<8x8xf32> -> vector<8x8xf32>
    %199 = tpu.reciprocal %197 {approx = true} : vector<8x1xf32> -> vector<8x1xf32>
    %200 = vector.broadcast %199 : vector<8x1xf32> to vector<8x8xf32>
    %201 = arith.mulf %198, %200 : vector<8x8xf32>
    %202 = vector.extract_strided_slice %132 {offsets = [0, 24], sizes = [8, 8], strides = [1, 1]} : vector<8x32xf32> to vector<8x8xf32>
    %cst_75 = arith.constant 0.353553385 : f32
    %203 = vector.broadcast %cst_75 : f32 to vector<8x8xf32>
    %204 = arith.mulf %202, %203 : vector<8x8xf32>
    %205 = vector.extract_strided_slice %140 {offsets = [0, 24], sizes = [8, 8], strides = [1, 1]} : vector<8x32xf32> to vector<8x8xf32>
    %206 = vector.extract_strided_slice %141 {offsets = [0, 24], sizes = [8, 8], strides = [1, 1]} : vector<8x32xf32> to vector<8x8xf32>
    %cst_76 = arith.constant dense<0.000000e+00> : vector<8x8xf32>
    %207 = tpu.matmul %204, %205, %cst_76 {dimension_numbers = #tpu.dot_dimension_numbers<[1], [1], [0], [0], [0, 0, 1, 0], [], []>} : vector<8x8xf32>, vector<8x8xf32>, vector<8x8xf32> -> vector<8x8xf32>
    %cst_77 = arith.constant 0xFF800000 : f32
    %208 = vector.broadcast %cst_77 : f32 to vector<8x8xf32>
    %209 = arith.select %144, %207, %208 : vector<8x8xi1>, vector<8x8xf32>
    %cst_78 = arith.constant dense<0xFF800000> : vector<8xf32>
    %210 = vector.multi_reduction <maximumf>, %209, %cst_78 [1] : vector<8x8xf32> to vector<8xf32>
    %211 = vector.shape_cast %210 : vector<8xf32> to vector<8x1xf32>
    %212 = vector.broadcast %211 : vector<8x1xf32> to vector<8x8xf32>
    %213 = arith.subf %209, %212 : vector<8x8xf32>
    %214 = math.exp %213 : vector<8x8xf32>
    %cst_79 = arith.constant dense<0.000000e+00> : vector<8xf32>
    %215 = vector.multi_reduction <add>, %214, %cst_79 [1] : vector<8x8xf32> to vector<8xf32>
    %216 = vector.shape_cast %215 : vector<8xf32> to vector<8x1xf32>
    %cst_80 = arith.constant dense<0.000000e+00> : vector<8x8xf32>
    %217 = tpu.matmul %214, %206, %cst_80 {dimension_numbers = #tpu.dot_dimension_numbers<[1], [0], [0], [1], [0, 0, 1, 1], [], []>} : vector<8x8xf32>, vector<8x8xf32>, vector<8x8xf32> -> vector<8x8xf32>
    %218 = tpu.reciprocal %216 {approx = true} : vector<8x1xf32> -> vector<8x1xf32>
    %219 = vector.broadcast %218 : vector<8x1xf32> to vector<8x8xf32>
    %220 = arith.mulf %217, %219 : vector<8x8xf32>
    %221 = tpu.concatenate %163, %182, %201, %220 in 1 : vector<8x8xf32>, vector<8x8xf32>, vector<8x8xf32>, vector<8x8xf32> -> vector<8x32xf32>
    %c0_81 = arith.constant 0 : index
    %c0_82 = arith.constant 0 : index
    %222 = vector.load %arg13[%c0_81, %c0_82] : memref<32x32xf32, #tpu.memory_space<vmem>>, vector<32x32xf32>
    %223 = arith.truncf %221 : vector<8x32xf32> to vector<8x32xbf16>
    %224 = arith.truncf %222 : vector<32x32xf32> to vector<32x32xbf16>
    %cst_83 = arith.constant dense<0.000000e+00> : vector<8x32xf32>
    %225 = tpu.matmul %223, %224, %cst_83 {dimension_numbers = #tpu.dot_dimension_numbers<[1], [0], [0], [1], [0, 0, 1, 1], [], []>} : vector<8x32xbf16>, vector<32x32xbf16>, vector<8x32xf32> -> vector<8x32xf32>
    %c0_84 = arith.constant 0 : index
    %c0_85 = arith.constant 0 : index
    %226 = vector.load %arg14[%c0_84, %c0_85] : memref<1x32xf32, #tpu.memory_space<vmem>>, vector<1x32xf32>
    %227 = vector.broadcast %226 : vector<1x32xf32> to vector<8x32xf32>
    %228 = arith.addf %225, %227 : vector<8x32xf32>
    %229 = arith.addf %125, %228 : vector<8x32xf32>
    %c0_86 = arith.constant 0 : index
    %c0_87 = arith.constant 0 : index
    %230 = vector.load %arg15[%c0_86, %c0_87] : memref<1x32xf32, #tpu.memory_space<vmem>>, vector<1x32xf32>
    %c0_88 = arith.constant 0 : index
    %c0_89 = arith.constant 0 : index
    %231 = vector.load %arg16[%c0_88, %c0_89] : memref<1x32xf32, #tpu.memory_space<vmem>>, vector<1x32xf32>
    %cst_90 = arith.constant dense<0.000000e+00> : vector<8xf32>
    %232 = vector.multi_reduction <add>, %229, %cst_90 [1] : vector<8x32xf32> to vector<8xf32>
    %233 = vector.shape_cast %232 : vector<8xf32> to vector<8x1xf32>
    %cst_91 = arith.constant 3.200000e+01 : f32
    %234 = vector.broadcast %cst_91 : f32 to vector<8x1xf32>
    %235 = arith.divf %233, %234 : vector<8x1xf32>
    %236 = vector.broadcast %235 : vector<8x1xf32> to vector<8x32xf32>
    %237 = arith.subf %229, %236 : vector<8x32xf32>
    %238 = arith.mulf %237, %237 : vector<8x32xf32>
    %cst_92 = arith.constant dense<0.000000e+00> : vector<8xf32>
    %239 = vector.multi_reduction <add>, %238, %cst_92 [1] : vector<8x32xf32> to vector<8xf32>
    %240 = vector.shape_cast %239 : vector<8xf32> to vector<8x1xf32>
    %cst_93 = arith.constant 3.200000e+01 : f32
    %241 = vector.broadcast %cst_93 : f32 to vector<8x1xf32>
    %242 = arith.divf %240, %241 : vector<8x1xf32>
    %243 = vector.broadcast %235 : vector<8x1xf32> to vector<8x32xf32>
    %244 = arith.subf %229, %243 : vector<8x32xf32>
    %cst_94 = arith.constant 9.99999974E-6 : f32
    %245 = vector.broadcast %cst_94 : f32 to vector<8x1xf32>
    %246 = arith.addf %242, %245 : vector<8x1xf32>
    %247 = math.rsqrt %246 : vector<8x1xf32>
    %248 = vector.broadcast %247 : vector<8x1xf32> to vector<8x32xf32>
    %249 = arith.mulf %244, %248 : vector<8x32xf32>
    %250 = vector.broadcast %230 : vector<1x32xf32> to vector<8x32xf32>
    %251 = arith.mulf %249, %250 : vector<8x32xf32>
    %252 = vector.broadcast %231 : vector<1x32xf32> to vector<8x32xf32>
    %253 = arith.addf %251, %252 : vector<8x32xf32>
    %c0_95 = arith.constant 0 : index
    %c0_96 = arith.constant 0 : index
    %254 = vector.load %arg17[%c0_95, %c0_96] : memref<32x2048xf32, #tpu.memory_space<vmem>>, vector<32x2048xf32>
    %255 = arith.truncf %253 : vector<8x32xf32> to vector<8x32xbf16>
    %256 = arith.truncf %254 : vector<32x2048xf32> to vector<32x2048xbf16>
    %cst_97 = arith.constant dense<0.000000e+00> : vector<8x2048xf32>
    %257 = tpu.matmul %255, %256, %cst_97 {dimension_numbers = #tpu.dot_dimension_numbers<[1], [0], [0], [1], [0, 0, 1, 1], [], []>} : vector<8x32xbf16>, vector<32x2048xbf16>, vector<8x2048xf32> -> vector<8x2048xf32>
    %c0_98 = arith.constant 0 : index
    %c0_99 = arith.constant 0 : index
    %258 = vector.load %arg18[%c0_98, %c0_99] : memref<1x2048xf32, #tpu.memory_space<vmem>>, vector<1x2048xf32>
    %259 = vector.broadcast %258 : vector<1x2048xf32> to vector<8x2048xf32>
    %260 = arith.addf %257, %259 : vector<8x2048xf32>
    %cst_100 = arith.constant 0.000000e+00 : f32
    %261 = vector.broadcast %cst_100 : f32 to vector<8x2048xf32>
    %262 = arith.maximumf %260, %261 : vector<8x2048xf32>
    %c0_101 = arith.constant 0 : index
    %c0_102 = arith.constant 0 : index
    %263 = vector.load %arg19[%c0_101, %c0_102] : memref<2048x32xf32, #tpu.memory_space<vmem>>, vector<2048x32xf32>
    %264 = arith.truncf %262 : vector<8x2048xf32> to vector<8x2048xbf16>
    %265 = arith.truncf %263 : vector<2048x32xf32> to vector<2048x32xbf16>
    %cst_103 = arith.constant dense<0.000000e+00> : vector<8x32xf32>
    %266 = tpu.matmul %264, %265, %cst_103 {dimension_numbers = #tpu.dot_dimension_numbers<[1], [0], [0], [1], [0, 0, 1, 1], [], []>} : vector<8x2048xbf16>, vector<2048x32xbf16>, vector<8x32xf32> -> vector<8x32xf32>
    %c0_104 = arith.constant 0 : index
    %c0_105 = arith.constant 0 : index
    %267 = vector.load %arg20[%c0_104, %c0_105] : memref<1x32xf32, #tpu.memory_space<vmem>>, vector<1x32xf32>
    %268 = vector.broadcast %267 : vector<1x32xf32> to vector<8x32xf32>
    %269 = arith.addf %266, %268 : vector<8x32xf32>
    %270 = arith.addf %253, %269 : vector<8x32xf32>
    %c0_106 = arith.constant 0 : index
    %c0_107 = arith.constant 0 : index
    %271 = vector.load %arg21[%c0_106, %c0_107] : memref<1x32xf32, #tpu.memory_space<vmem>>, vector<1x32xf32>
    %c0_108 = arith.constant 0 : index
    %c0_109 = arith.constant 0 : index
    %272 = vector.load %arg22[%c0_108, %c0_109] : memref<1x32xf32, #tpu.memory_space<vmem>>, vector<1x32xf32>
    %cst_110 = arith.constant dense<0.000000e+00> : vector<8xf32>
    %273 = vector.multi_reduction <add>, %270, %cst_110 [1] : vector<8x32xf32> to vector<8xf32>
    %274 = vector.shape_cast %273 : vector<8xf32> to vector<8x1xf32>
    %cst_111 = arith.constant 3.200000e+01 : f32
    %275 = vector.broadcast %cst_111 : f32 to vector<8x1xf32>
    %276 = arith.divf %274, %275 : vector<8x1xf32>
    %277 = vector.broadcast %276 : vector<8x1xf32> to vector<8x32xf32>
    %278 = arith.subf %270, %277 : vector<8x32xf32>
    %279 = arith.mulf %278, %278 : vector<8x32xf32>
    %cst_112 = arith.constant dense<0.000000e+00> : vector<8xf32>
    %280 = vector.multi_reduction <add>, %279, %cst_112 [1] : vector<8x32xf32> to vector<8xf32>
    %281 = vector.shape_cast %280 : vector<8xf32> to vector<8x1xf32>
    %cst_113 = arith.constant 3.200000e+01 : f32
    %282 = vector.broadcast %cst_113 : f32 to vector<8x1xf32>
    %283 = arith.divf %281, %282 : vector<8x1xf32>
    %284 = vector.broadcast %276 : vector<8x1xf32> to vector<8x32xf32>
    %285 = arith.subf %270, %284 : vector<8x32xf32>
    %cst_114 = arith.constant 9.99999974E-6 : f32
    %286 = vector.broadcast %cst_114 : f32 to vector<8x1xf32>
    %287 = arith.addf %283, %286 : vector<8x1xf32>
    %288 = math.rsqrt %287 : vector<8x1xf32>
    %289 = vector.broadcast %288 : vector<8x1xf32> to vector<8x32xf32>
    %290 = arith.mulf %285, %289 : vector<8x32xf32>
    %291 = vector.broadcast %271 : vector<1x32xf32> to vector<8x32xf32>
    %292 = arith.mulf %290, %291 : vector<8x32xf32>
    %293 = vector.broadcast %272 : vector<1x32xf32> to vector<8x32xf32>
    %294 = arith.addf %292, %293 : vector<8x32xf32>
    %c0_115 = arith.constant 0 : index
    %c0_116 = arith.constant 0 : index
    %c0_117 = arith.constant 0 : index
    %295 = vector.load %arg23[%c0_115, %c0_116, %c0_117] : memref<1x8x32xf32, #tpu.memory_space<vmem>>, vector<1x8x32xf32>
    %296 = vector.shape_cast %295 : vector<1x8x32xf32> to vector<8x32xf32>
    %297 = vector.shape_cast %294 : vector<8x32xf32> to vector<1x8x32xf32>
    tpu.vector_store %arg23[%c0_115, %c0_116, %c0_117], %297 {strides = array<i32>} : memref<1x8x32xf32, #tpu.memory_space<vmem>>, vector<1x8x32xf32>,
    return
  }
  func.func @transform_0(%arg0: i32) -> (i32, i32, i32) {
    %c0_i32 = arith.constant 0 : i32
    %c0_i32_0 = arith.constant 0 : i32
    %c0_i32_1 = arith.constant 0 : i32
    return %arg0, %c0_i32, %c0_i32_0 : i32, i32, i32
  }
  func.func @transform_1(%arg0: i32) -> (i32, i32, i32) {
    %c0_i32 = arith.constant 0 : i32
    %c0_i32_0 = arith.constant 0 : i32
    %c0_i32_1 = arith.constant 0 : i32
    return %arg0, %c0_i32, %c0_i32_0 : i32, i32, i32
  }
  func.func @transform_2(%arg0: i32) -> (i32, i32) {
    %c0_i32 = arith.constant 0 : i32
    %c0_i32_0 = arith.constant 0 : i32
    %c0_i32_1 = arith.constant 0 : i32
    return %c0_i32, %c0_i32_0 : i32, i32
  }
  func.func @transform_3(%arg0: i32) -> (i32, i32) {
    %c0_i32 = arith.constant 0 : i32
    %c0_i32_0 = arith.constant 0 : i32
    %c0_i32_1 = arith.constant 0 : i32
    return %c0_i32, %c0_i32_0 : i32, i32
  }
  func.func @transform_4(%arg0: i32) -> (i32, i32) {
    %c0_i32 = arith.constant 0 : i32
    %c0_i32_0 = arith.constant 0 : i32
    %c0_i32_1 = arith.constant 0 : i32
    return %c0_i32, %c0_i32_0 : i32, i32
  }
  func.func @transform_5(%arg0: i32) -> (i32, i32) {
    %c0_i32 = arith.constant 0 : i32
    %c0_i32_0 = arith.constant 0 : i32
    %c0_i32_1 = arith.constant 0 : i32
    return %c0_i32, %c0_i32_0 : i32, i32
  }
  func.func @transform_6(%arg0: i32) -> (i32, i32) {
    %c0_i32 = arith.constant 0 : i32
    %c0_i32_0 = arith.constant 0 : i32
    %c0_i32_1 = arith.constant 0 : i32
    return %c0_i32, %c0_i32_0 : i32, i32
  }
  func.func @transform_7(%arg0: i32) -> (i32, i32) {
    %c0_i32 = arith.constant 0 : i32
    %c0_i32_0 = arith.constant 0 : i32
    %c0_i32_1 = arith.constant 0 : i32
    return %c0_i32, %c0_i32_0 : i32, i32
  }
  func.func @transform_8(%arg0: i32) -> (i32, i32) {
    %c0_i32 = arith.constant 0 : i32
    %c0_i32_0 = arith.constant 0 : i32
    %c0_i32_1 = arith.constant 0 : i32
    return %c0_i32, %c0_i32_0 : i32, i32
  }
  func.func @transform_9(%arg0: i32) -> (i32, i32) {
    %c0_i32 = arith.constant 0 : i32
    %c0_i32_0 = arith.constant 0 : i32
    %c0_i32_1 = arith.constant 0 : i32
    return %c0_i32, %c0_i32_0 : i32, i32
  }
  func.func @transform_10(%arg0: i32) -> (i32, i32) {
    %c0_i32 = arith.constant 0 : i32
    %c0_i32_0 = arith.constant 0 : i32
    %c0_i32_1 = arith.constant 0 : i32
    return %c0_i32, %c0_i32_0 : i32, i32
  }
  func.func @transform_11(%arg0: i32) -> (i32, i32) {
    %c0_i32 = arith.constant 0 : i32
    %c0_i32_0 = arith.constant 0 : i32
    %c0_i32_1 = arith.constant 0 : i32
    return %c0_i32, %c0_i32_0 : i32, i32
  }
  func.func @transform_12(%arg0: i32) -> (i32, i32) {
    %c0_i32 = arith.constant 0 : i32
    %c0_i32_0 = arith.constant 0 : i32
    %c0_i32_1 = arith.constant 0 : i32
    return %c0_i32, %c0_i32_0 : i32, i32
  }
  func.func @transform_13(%arg0: i32) -> (i32, i32) {
    %c0_i32 = arith.constant 0 : i32
    %c0_i32_0 = arith.constant 0 : i32
    %c0_i32_1 = arith.constant 0 : i32
    return %c0_i32, %c0_i32_0 : i32, i32
  }
  func.func @transform_14(%arg0: i32) -> (i32, i32) {
    %c0_i32 = arith.constant 0 : i32
    %c0_i32_0 = arith.constant 0 : i32
    %c0_i32_1 = arith.constant 0 : i32
    return %c0_i32, %c0_i32_0 : i32, i32
  }
  func.func @transform_15(%arg0: i32) -> (i32, i32) {
    %c0_i32 = arith.constant 0 : i32
    %c0_i32_0 = arith.constant 0 : i32
    %c0_i32_1 = arith.constant 0 : i32
    return %c0_i32, %c0_i32_0 : i32, i32
  }
  func.func @transform_16(%arg0: i32) -> (i32, i32) {
    %c0_i32 = arith.constant 0 : i32
    %c0_i32_0 = arith.constant 0 : i32
    %c0_i32_1 = arith.constant 0 : i32
    return %c0_i32, %c0_i32_0 : i32, i32
  }
  func.func @transform_17(%arg0: i32) -> (i32, i32) {
    %c0_i32 = arith.constant 0 : i32
    %c0_i32_0 = arith.constant 0 : i32
    %c0_i32_1 = arith.constant 0 : i32
    return %c0_i32, %c0_i32_0 : i32, i32
  }
  func.func @transform_18(%arg0: i32) -> (i32, i32) {
    %c0_i32 = arith.constant 0 : i32
    %c0_i32_0 = arith.constant 0 : i32
    %c0_i32_1 = arith.constant 0 : i32
    return %c0_i32, %c0_i32_0 : i32, i32
  }
  func.func @transform_19(%arg0: i32) -> (i32, i32) {
    %c0_i32 = arith.constant 0 : i32
    %c0_i32_0 = arith.constant 0 : i32
    %c0_i32_1 = arith.constant 0 : i32
    return %c0_i32, %c0_i32_0 : i32, i32
  }
  func.func @transform_20(%arg0: i32) -> (i32, i32) {
    %c0_i32 = arith.constant 0 : i32
    %c0_i32_0 = arith.constant 0 : i32
    %c0_i32_1 = arith.constant 0 : i32
    return %c0_i32, %c0_i32_0 : i32, i32
  }
  func.func @transform_21(%arg0: i32) -> (i32, i32) {
    %c0_i32 = arith.constant 0 : i32
    %c0_i32_0 = arith.constant 0 : i32
    %c0_i32_1 = arith.constant 0 : i32
    return %c0_i32, %c0_i32_0 : i32, i32
  }
  func.func @transform_22(%arg0: i32) -> (i32, i32, i32) {
    %c0_i32 = arith.constant 0 : i32
    %c0_i32_0 = arith.constant 0 : i32
    %c0_i32_1 = arith.constant 0 : i32
    return %arg0, %c0_i32, %c0_i32_0 : i32, i32, i32
  }
}

</mosaic_0001>

<bundles_post_ra>
// kernel: saint_forward.5
= control target key start
LH: loop header
LB: loop body
LE: loop exit
PB: predicated region body
PF: predicated region fallthrough
CT: control target
= control target key end

     0   :  { %vm18_vm0 = vcmask 261120   ;;  %s118_s0 = inlined_call_operand.vmem [shape: f32[16,32], index: 0, kind: input, shape index: {}]   ;;  %s119_s1 = inlined_call_operand.vmem [shape: f32[1,32], index: 1, kind: input, shape index: {}]   ;;  %s120_s2 = inlined_call_operand.vmem [shape: f32[1,32], index: 2, kind: input, shape index: {}]   ;;  %s121_s3 = inlined_call_operand.vmem [shape: f32[16,32], index: 3, kind: output, shape index: {}]  }
   0x1   :  { %v14_v0 = vld [vmem:[%s118_s0] sm:$0xff]  ;;  %v15_v1 = vld [vmem:[%s118_s0 + $0x8] sm:$0xff] }
   0x2   :  { %v19_v2 = vsel %vm18_vm0, %v14_v0, 0.0  ;;  %v22_v3 = vsel %vm18_vm0, %v15_v1, 0.0  ;;  %v68_v21 = vld [vmem:[%s119_s1] ss:$0 sm:$0xff] }
   0x3   :  { %20 = vadd.xlane.f32.xlu0 %v19_v2  ;;  %v69_v23 = vld [vmem:[%s120_s2] ss:$0 sm:$0xff] }
   0x7   :  { %23 = vadd.xlane.f32.xlu0 %v22_v3 }
  0x90   :  { %v21_v4 = vpop.xlane.xlu0 %20 }
  0x91   :  { %v26_v5 = vmul.f32 0.03125, %v21_v4 }
  0x93   :  { %v28_v6 = vsub.f32 %v14_v0, %v26_v5 }
  0x94   :  { %v24_v7 = vpop.xlane.xlu0 %23 }
  0x95   :  { %v27_v8 = vmul.f32 0.03125, %v24_v7  ;;  %v30_v9 = vmul.f32 %v28_v6, %v28_v6 }
  0x97   :  { %v29_v10 = vsub.f32 %v15_v1, %v27_v8  ;;  %v32_v11 = vsel %vm18_vm0, %v30_v9, 0.0 }
  0x98   :  { %33 = vadd.xlane.f32.xlu1 %v32_v11 }
  0x99   :  { %v31_v12 = vmul.f32 %v29_v10, %v29_v10 }
  0x9b   :  { %v35_v13 = vsel %vm18_vm0, %v31_v12, 0.0 }
  0x9c   :  { %36 = vadd.xlane.f32.xlu1 %v35_v13 }
 0x125   :  { %v34_v14 = vpop.xlane.xlu1 %33 }
 0x126   :  { %v38_v15 = vmul.f32 0.03125, %v34_v14 }
 0x128   :  { %v40_v16 = vadd.f32 1e-05, %v38_v15 }
 0x129   :  { %v37_v17 = vpop.xlane.xlu1 %36 }
 0x12a   :  { %70 = vrsqrt.f32 %v40_v16  ;;  %v39_v18 = vmul.f32 0.03125, %v37_v17 }
 0x12c   :  { %v41_v19 = vadd.f32 1e-05, %v39_v18 }
 0x12e   :  { %72 = vrsqrt.f32 %v41_v19 }
 0x134   :  { %v71_v20 = vpop.eup %70 }
 0x135   :  { %v44_v22 = vmul.f32 %v71_v20, %v28_v6 }
 0x137   :  { %v52_v24 = vmul.f32 %v68_v21, %v44_v22 }
 0x138   :  { %v73_v25 = vpop.eup %72 }
 0x139   :  { %v60_v26 = vadd.f32 %v69_v23, %v52_v24  ;;  %v45_v27 = vmul.f32 %v73_v25, %v29_v10 }
 0x13b   :  { %62 = vst.msk [vmem:[%s121_s3] sm:$0xff] %vm18_vm0, %v60_v26  ;;  %v53_v28 = vmul.f32 %v68_v21, %v45_v27 }
 0x13d   :  { %v61_v29 = vadd.f32 %v69_v23, %v53_v28 }
 0x13f   :  { %63 = vst.msk [vmem:[%s121_s3 + $0x8] sm:$0xff] %vm18_vm0, %v61_v29 }

// kernel: saint_forward.7
= control target key start
LH: loop header
LB: loop body
LE: loop exit
PB: predicated region body
PF: predicated region fallthrough
CT: control target
= control target key end

     0   :  { %vm26_vm0 = vcmask 261120   ;;  %vm174_vm1 = vcmask 7168   ;;  %s294_s0 = inlined_call_operand.vmem [shape: f32[16,32], index: 0, kind: input, shape index: {}]   ;;  %s295_s3 = inlined_call_operand.vmem [shape: f32[32,1], index: 3, kind: input, shape index: {}]   ;;  %s296_s4 = inlined_call_operand.<no memory space> [shape: f32[1,1], index: 4, kind: input, shape index: {}]   ;;  %s297_s1 = inlined_call_operand.vmem [shape: f32[1,32], index: 1, kind: input, shape index: {}]   ;;  %s298_s2 = inlined_call_operand.vmem [shape: f32[1,32], index: 2, kind: input, shape index: {}]   ;;  %s299_s5 = inlined_call_operand.vmem [shape: f32[16,1], index: 5, kind: output, shape index: {}]  }
   0x1   :  { %v22_v0 = vld [vmem:[%s294_s0] sm:$0xff]  ;;  %v23_v1 = vld [vmem:[%s294_s0 + $0x8] sm:$0xff]  ;;  %v72_v16 = vld [vmem:[%s295_s3 + $0x10] sm:$0xff]  ;;  %v10_v20 = vstv %s296_s4 }
   0x2   :  { %v27_v2 = vsel %vm26_vm0, %v22_v0, 0.0  ;;  %v30_v3 = vsel %vm26_vm0, %v23_v1, 0.0  ;;  %v70_v14 = vld [vmem:[%s295_s3] sm:$0xff]  ;;  %v71_v15 = vld [vmem:[%s295_s3 + $0x8] sm:$0xff]  ;;  %v73_v18 = vld [vmem:[%s295_s3 + $0x18] sm:$0xff] }
   0x3   :  { %28 = vadd.xlane.f32.xlu0 %v27_v2  ;;  %v205_v17 = vpack.c.bf16 %v71_v15, %v70_v14  ;;  %v209_v19 = vpack.c.bf16 %v73_v18, %v72_v16  ;;  %11 = vst [vmem:[#allocation2] sm:$0x1] %v10_v20  ;;  %v181_v28 = vld [vmem:[%s297_s1] ss:$0 sm:$0xff] }
   0x4   :  { %v182_v30 = vld [vmem:[%s298_s2] ss:$0 sm:$0xff] }
   0x5   :  { %206 = vmatprep.subr.bf16.mxu0 %v205_v17 }
   0x6   :  { %208 = vmatpush3.bf16.msra.mxu0 %v205_v17 }
   0x7   :  { %31 = vadd.xlane.f32.xlu0 %v30_v3  ;;  %210 = vmatprep.subr.bf16.mxu0 %v209_v19 }
   0xa   :  { %212 = vmatpush3.bf16.msra.mxu0 %v209_v19  ;;  %v183_v37 = vld [vmem:[#allocation2] ss:$0 sm:$0xff] }
  0x90   :  { %v29_v4 = vpop.xlane.xlu0 %28 }
  0x91   :  { %v34_v5 = vmul.f32 0.03125, %v29_v4 }
  0x93   :  { %v36_v6 = vsub.f32 %v22_v0, %v34_v5 }
  0x94   :  { %v32_v7 = vpop.xlane.xlu0 %31 }
  0x95   :  { %v35_v8 = vmul.f32 0.03125, %v32_v7  ;;  %v38_v9 = vmul.f32 %v36_v6, %v36_v6 }
  0x97   :  { %v37_v10 = vsub.f32 %v23_v1, %v35_v8  ;;  %v40_v11 = vsel %vm26_vm0, %v38_v9, 0.0 }
  0x98   :  { %41 = vadd.xlane.f32.xlu1 %v40_v11 }
  0x99   :  { %v39_v12 = vmul.f32 %v37_v10, %v37_v10 }
  0x9b   :  { %v43_v13 = vsel %vm26_vm0, %v39_v12, 0.0 }
  0x9c   :  { %44 = vadd.xlane.f32.xlu1 %v43_v13 }
 0x125   :  { %v42_v21 = vpop.xlane.xlu1 %41 }
 0x126   :  { %v46_v22 = vmul.f32 0.03125, %v42_v21 }
 0x128   :  { %v48_v23 = vadd.f32 1e-05, %v46_v22 }
 0x129   :  { %v45_v24 = vpop.xlane.xlu1 %44 }
 0x12a   :  { %213 = vrsqrt.f32 %v48_v23  ;;  %v47_v25 = vmul.f32 0.03125, %v45_v24 }
 0x12c   :  { %v49_v26 = vadd.f32 1e-05, %v47_v25 }
 0x12e   :  { %215 = vrsqrt.f32 %v49_v26 }
 0x134   :  { %v214_v27 = vpop.eup %213 }
 0x135   :  { %v52_v29 = vmul.f32 %v214_v27, %v36_v6 }
 0x137   :  { %v60_v31 = vmul.f32 %v181_v28, %v52_v29 }
 0x138   :  { %v216_v32 = vpop.eup %215 }
 0x139   :  { %v53_v33 = vmul.f32 %v216_v32, %v37_v10  ;;  %v68_v34 = vadd.f32 %v182_v30, %v60_v31 }
 0x13b   :  { %v61_v35 = vmul.f32 %v181_v28, %v53_v33  ;;  %202 = vmatprep.mubr.msk.f32.mxu0 %vm26_vm0, %v68_v34 }
 0x13d   :  { %v69_v36 = vadd.f32 %v182_v30, %v61_v35 }
 0x13f   :  { %203 = vmatmul.mubr.msk.f32.vlgmr.msra.gmra.mrb[0].mxu0 %vm26_vm0, %v69_v36 }
 0x212   :  { %v204_v38 = vpop.f32.mrb[0].mxu0 }
 0x213   :  { %v159_v39 = vadd.f32 %v204_v38, %v183_v37  ;;  %v153_v40 = vpop.f32.mrb[1].mxu0 }
 0x214   :  { %v154_v41 = vadd.f32 %v183_v37, %v153_v40 }
 0x215   :  { %v187_v42 = vmul.f32 -1.442695, %v159_v39 }
 0x216   :  { %v186_v43 = vmul.f32 -1.442695, %v154_v41 }
 0x217   :  { %217 = vpow2.f32 %v187_v42 }
 0x218   :  { %219 = vpow2.f32 %v186_v43 }
 0x221   :  { %v218_v44 = vpop.eup %217 }
 0x222   :  { %v220_v45 = vpop.eup %219  ;;  %v169_v46 = vadd.f32 1.0, %v218_v44 }
 0x223   :  { %v168_v47 = vadd.f32 1.0, %v220_v45 }
 0x224   :  { %221 = vrcp.f32 %v169_v46 }
 0x225   :  { %223 = vrcp.f32 %v168_v47 }
 0x22e   :  { %v222_v48 = vpop.eup %221 }
 0x22f   :  { %v224_v49 = vpop.eup %223  ;;  %176 = vst.msk [vmem:[%s299_s5 + $0x8] sm:$0xff] %vm174_vm1, %v222_v48 }
 0x230   :  { %175 = vst.msk [vmem:[%s299_s5] sm:$0xff] %vm174_vm1, %v224_v49 }

// kernel: saint_forward.4
= control target key start
LH: loop header
LB: loop body
LE: loop exit
PB: predicated region body
PF: predicated region fallthrough
CT: control target
= control target key end

     0   :  { %s3043_s25 = smov 0   ;;  %s4292_s0 = inlined_call_operand.vmem [shape: f32[2,8,32], index: 0, kind: input, shape index: {}]   ;;  %s4293_s1 = inlined_call_operand.vmem [shape: f32[32,96], index: 1, kind: input, shape index: {}]   ;;  %s4294_s2 = inlined_call_operand.vmem [shape: f32[1,96], index: 2, kind: input, shape index: {}]   ;;  %s4295_s3 = inlined_call_operand.vmem [shape: f32[32,32], index: 3, kind: input, shape index: {}]   ;;  %s4296_s4 = inlined_call_operand.vmem [shape: f32[1,32], index: 4, kind: input, shape index: {}]   ;;  %s4297_s5 = inlined_call_operand.vmem [shape: f32[1,32], index: 5, kind: input, shape index: {}]   ;;  %s4298_s6 = inlined_call_operand.vmem [shape: f32[1,32], index: 6, kind: input, shape index: {}]   ;;  %s4299_s7 = inlined_call_operand.vmem [shape: f32[32,2048], index: 7, kind: input, shape index: {}]   ;;  %s4300_s8 = inlined_call_operand.vmem [shape: f32[1,2048], index: 8, kind: input, shape index: {}]   ;;  %s4301_s9 = inlined_call_operand.vmem [shape: f32[2048,32], index: 9, kind: input, shape index: {}]   ;;  %s4302_s10 = inlined_call_operand.vmem [shape: f32[1,32], index: 10, kind: input, shape index: {}]   ;;  %s4303_s11 = inlined_call_operand.vmem [shape: f32[1,32], index: 11, kind: input, shape index: {}]   ;;  %s4304_s12 = inlined_call_operand.vmem [shape: f32[1,32], index: 12, kind: input, shape index: {}]   ;;  %s4305_s13 = inlined_call_operand.vmem [shape: f32[2,8,32], index: 13, kind: output, shape index: {}]  }
   0x1 LB: > { %s2611_s26 = sadd.s32 4294967295, %s2954_s25   ;;  %p2615_p0 = scmp.ge.s32.totalorder %s2954_s25, 1  ;;  %s2954_s25 = sphi %s3043_s25, %s23_s25  }
   0x2   : > { %p386_p1 = scmp.lt.s32.totalorder %s2954_s25, 3 }
   0x4   : > { %p387_p2 = pnand %p2615_p0, %p386_p1 }
   0x5   : > { %v438_v0 = vld [vmem:[%s4293_s1] sm:$0xff] (!%p387_p2)  ;;  %v439_v1 = vld [vmem:[%s4293_s1 + $0x8] sm:$0xff] (!%p387_p2)  ;;  %v440_v2 = vld [vmem:[%s4293_s1 + $0x10] sm:$0xff] (!%p387_p2)  ;;  %p428_p3 = scmp.lt.s32.totalorder (!%p387_p2), %s2611_s26, 1  ;;  %v2956_v3 = vmov (!%p387_p2), 0.0   ;;  %vm2957_vm0 = vmmov (!%p387_p2), 0   ;;  %v496_v18 = vlaneseq (!%p387_p2) }
   0x6   : > { %390 = sbr.rel (%p387_p2) target bundleno = 2819 (0xb03), region = 72  ;;  %2847 = vmatprep.subr.bf16.mxu0 (!%p387_p2), %v2956_v3  ;;  %v443_v4 = vpack.c.bf16 (!%p387_p2), %v439_v1, %v438_v0  ;;  %v441_v5 = vld [vmem:[%s4293_s1 + $0x18] sm:$0xff] (!%p387_p2)  ;;  %2851 = vmatprep.mubr.msk.bf16.mxu0 (!%p387_p2), %vm2957_vm0, %v2956_v3  ;;  %vm452_vm1 = vcmask (!%p387_p2), 261120   ;;  %v2618_v9 = vld [vmem:[%s4294_s2] ss:$0 sm:$0xff] (!%p387_p2)  ;;  %s2958_s24 = smov (!%p387_p2), 64  }
   0x7   : > { %2855 = vmatprep.subr.mxu1 (!%p387_p2), %v2956_v3  ;;  %2857 = vmatprep.mubr.msk.f32.mxu1 (!%p387_p2), %vm2957_vm0, %v2956_v3  ;;  %v444_v6 = vpack.c.bf16 (!%p387_p2), %v441_v5, %v440_v2  ;;  %s2959_s27 = smov (!%p387_p2), 96   ;;  %s2960_s28 = smov (!%p387_p2), 88   ;;  %vm505_vm2 = vcmask (!%p387_p2), 64512   ;;  %v3103_v19 = vshrl.u32 (!%p387_p2), %v496_v18, 7  ;;  %v499_v20 = vand.u32 (!%p387_p2), 127, %v496_v18 }
   0x8   : > { %2848 = vmatpush3.bf16.msra.mxu0 (!%p387_p2), %v443_v4  ;;  %s2961_s29 = smov (!%p387_p2), 120   ;;  %s2962_s30 = smov (!%p387_p2), 80   ;;  %vm1180_vm4 = vcmask (!%p387_p2), 130048   ;;  %vm1182_vm5 = vcmask (!%p387_p2), 195584  }
   0x9   : > { %2849 = vmatprep.subr.bf16.mxu0 (!%p387_p2), %v2956_v3  ;;  %s2963_s14 = smov (!%p387_p2), 112   ;;  %s2964_s15 = smov (!%p387_p2), 72   ;;  %vm500_vm3 = vcmp.le.s32.totalorder (!%p387_p2), %v499_v20, %v3103_v19 }
   0xa   : > { %s2965_s16 = smov (!%p387_p2), 104   ;;  %s2966_s17 = smov (!%p387_p2), 56  }
   0xb   : > { %s2967_s19 = smov (!%p387_p2), 48   ;;  %s2968_s20 = smov (!%p387_p2), 40  }
   0xc   : > { %2850 = vmatpush3.bf16.msra.mxu0 (!%p387_p2), %v444_v6 }
   0xd   : > { %s4307_s26 = smov (!%p428_p3, %s2611_s26), 1  ;;  %2870 = vmatprep.subr.mxu0 %v2956_v3 }
   0xe   : > { %s2616_s18 = sshll.u32 %s4307_s26, 3 }
   0xf   : > { %s431_s21 = scalar_lea.vmem %s4292_s0, %s2616_s18 }
  0x10   : > { %v3078_v7 = vld [vmem:[%s431_s21] sm:$0xff] }
  0x11   : > { %v442_v8 = vpack.c.bf16 %v3078_v7, %v3078_v7 }
  0x13   : > { %2852 = vmatmul.mubr.msk.bf16.vlgmr.msra.gmra.mrb[0].mxu0 %vm452_vm1, %v442_v8  ;;  %v1184_v8 = vld [vmem:[%s4295_s3] sm:$0xff] }
  0x14   : > { %2872 = vmatprep.mubr.msk.f32.mxu0 %vm2957_vm0, %v2956_v3 }
  0xe6   : > { %v490_v10 = vpop.f32.mrb[0].mxu0 }
  0xe7   : > { %v3089_v11 = vadd.f32 %v2618_v9, %v490_v10  ;;  %v2853_v12 = vpop.f32.mrb[1].mxu0  ;;  %v1185_v9 = vld [vmem:[%s4295_s3 + $0x8] sm:$0xff] }
  0xe8   : > { %v493_v13 = vpop.f32.mrb[2].mxu0  ;;  %v1189_v10 = vpack.c.bf16 %v1185_v9, %v1184_v8  ;;  %v1186_v12 = vld [vmem:[%s4295_s3 + $0x10] sm:$0xff] }
  0xe9   : > { %591 = vrot.lane.b32.xlu1 %v3089_v11, %s2958_s24  ;;  %503 = vrot.lane.b32.xlu0 %v3089_v11, %s2959_s27  ;;  %v2854_v14 = vpop.f32.mrb[3].mxu0  ;;  %v501_v15 = vmul.f32 0.35355338, %v3089_v11  ;;  %v1187_v13 = vld [vmem:[%s4295_s3 + $0x18] sm:$0xff]  ;;  %v1306_v8 = vld [vmem:[%s4299_s7 + $0x110] sm:$0xff] }
  0xea   : > { %v1190_v14 = vpack.c.bf16 %v1187_v13, %v1186_v12  ;;  %v1322_v9 = vld [vmem:[%s4299_s7 + $0x190] sm:$0xff]  ;;  %v1293_v12 = vld [vmem:[%s4299_s7 + $0xa8] sm:$0xff]  ;;  %v1279_v13 = vld [vmem:[%s4299_s7 + $0x38] sm:$0xff] }
  0xed   : > { %671 = vrot.lane.b32.xlu1 %v3089_v11, %s2960_s28 }
  0xf1   : > { %669 = vrot.lane.b32.xlu1 %v501_v15, %s2961_s29 }
  0xf5   : > { %837 = vrot.lane.b32.xlu1 %v3089_v11, %s2962_s30 }
  0xf9   : > { %835 = vrot.lane.b32.xlu1 %v501_v15, %s2963_s14  ;;  %s2969_s14 = smov 8  }
  0xfd   : > { %1003 = vrot.lane.b32.xlu1 %v3089_v11, %s2964_s15  ;;  %s2970_s15 = smov 16  }
 0x101   : > { %1001 = vrot.lane.b32.xlu1 %v501_v15, %s2965_s16  ;;  %s2971_s16 = smov 24  }
 0x15b   : > { %v504_v16 = vpop.permute.xlu0 %503  ;;  %v592_v17 = vpop.permute.xlu1 %591 }
 0x15c   : > { %2856 = vmatpush3.xpose.msk.msra.mxu1 %vm505_vm2, %v504_v16 }
 0x15d   : > { %2860 = vmatprep.subr.mxu1 %v2956_v3 }
 0x15f   : > { %2858 = vmatmul.mubr.msk.f32.vlgmr.msra.gmra.mrb[0].mxu1 %vm505_vm2, %v501_v15  ;;  %v672_v25 = vpop.permute.xlu1 %671 }
 0x160   : > { %2861 = vmatpush3.msra.mxu1 %v592_v17  ;;  %2862 = vmatprep.mubr.msk.f32.mxu1 %vm2957_vm0, %v2956_v3 }
 0x161   : > { %2865 = vmatprep.subr.mxu1 %v2956_v3 }
 0x163   : > { %v670_v28 = vpop.permute.xlu1 %669 }
 0x167   : > { %v838_v31 = vpop.permute.xlu1 %837 }
 0x16b   : > { %v836_v33 = vpop.permute.xlu1 %835 }
 0x16f   : > { %v1004_v34 = vpop.permute.xlu1 %1003 }
 0x173   : > { %v1002_v35 = vpop.permute.xlu1 %1001 }
 0x232   : > { %v577_v21 = vpop.f32.mrb[0].mxu1 }
 0x233   : > { %v581_v22 = vsel %vm500_vm3, %v577_v21, -inf  ;;  %v2859_v23 = vpop.f32.mrb[1].mxu1 }
 0x234   : > { %v582_v24 = vsel %vm505_vm2, %v581_v22, -inf }
 0x235   : > { %583 = vmax.xlane.f32.xlu0 %v582_v24 }
 0x24b   : > { %757 = vrot.lane.b32.xlu0 %v3089_v11, %s2966_s17  ;;  %s435_s17 = scalar_lea.vmem %s4305_s13, %s2616_s18 }
 0x2c2   : > { %v584_v26 = vpop.xlane.xlu0 %583 }
 0x2c3   : > { %v585_v27 = vsub.f32 %v581_v22, %v584_v26 }
 0x2c5   : > { %v586_v29 = vmul.f32 1.442695, %v585_v27 }
 0x2c6   : > { %v758_v30 = vpop.permute.xlu0 %757 }
 0x2c7   : > { %2928 = vpow2.f32 %v586_v29  ;;  %2871 = vmatpush3.msra.mxu0 %v758_v30 }
 0x2c8   : > { %2880 = vmatprep.subr.mxu0 %v2956_v3 }
 0x2d1   : > { %v3111_v32 = vpop.eup %2928 }
 0x2d2   : > { %2863 = vmatmul.mubr.msk.f32.vlgmr.msra.gmra.mrb[2].mxu1 %vm505_vm2, %v3111_v32  ;;  %v588_v4 = vsel %vm505_vm2, %v3111_v32, 0.0 }
 0x2d3   : > { %2866 = vmatpush3.xpose.msk.msra.mxu1 %vm505_vm2, %v672_v25  ;;  %2867 = vmatprep.mubr.msk.f32.mxu1 %vm2957_vm0, %v2956_v3 }
 0x2d4   : > { %2875 = vmatprep.subr.mxu1 %v2956_v3 }
 0x2d6   : > { %2868 = vmatmul.mubr.msk.f32.vlgmr.msra.gmra.mrb[4].mxu1 %vm505_vm2, %v670_v28 }
 0x2d7   : > { %2876 = vmatpush3.xpose.msk.msra.mxu1 %vm505_vm2, %v838_v31  ;;  %2877 = vmatprep.mubr.msk.f32.mxu1 %vm2957_vm0, %v2956_v3 }
 0x2d8   : > { %2885 = vmatprep.subr.mxu1 %v2956_v3 }
 0x2da   : > { %2878 = vmatmul.mubr.msk.f32.vlgmr.msra.gmra.mrb[6].mxu1 %vm505_vm2, %v836_v33 }
 0x2db   : > { %2886 = vmatpush3.xpose.msk.msra.mxu1 %vm505_vm2, %v1004_v34  ;;  %2887 = vmatprep.mubr.msk.f32.mxu1 %vm2957_vm0, %v2956_v3 }
 0x2dc   : > { %2895 = vmatprep.subr.bf16.mxu1 %v2956_v3 }
 0x2de   : > { %2888 = vmatmul.mubr.msk.f32.vlgmr.msra.gmra.mrb[8].mxu1 %vm505_vm2, %v1002_v35 }
 0x2df   : > { %2899 = vmatprep.mubr.msk.bf16.mxu1 %vm2957_vm0, %v2956_v3  ;;  %2896 = vmatpush3.bf16.msra.mxu1 %v1189_v10  ;;  %v1355_v10 = vpack.c.bf16 %v1322_v9, %v1306_v8  ;;  %v1303_v8 = vld [vmem:[%s4299_s7 + $0xf8] sm:$0xff] }
 0x2e0   : > { %2897 = vmatprep.subr.bf16.mxu1 %v2956_v3 }
 0x2e3   : > { %2898 = vmatpush3.bf16.msra.mxu1 %v1190_v14  ;;  %v2972_v14 = vmov 0  }
 0x3a5   : > { %v3132_v36 = vpop.f32.mrb[2].mxu1 }
 0x3a6   : > { %v2864_v37 = vpop.f32.mrb[3].mxu1 }
 0x3a9   : > { %v743_v38 = vpop.f32.mrb[4].mxu1 }
 0x3aa   : > { %v747_v39 = vsel %vm500_vm3, %v743_v38, -inf  ;;  %v2869_v40 = vpop.f32.mrb[5].mxu1  ;;  %v2632_v38 = vld [vmem:[%s4296_s4] ss:$0 sm:$0xff] }
 0x3ab   : > { %v748_v41 = vsel %vm505_vm2, %v747_v39, -inf }
 0x3ac   : > { %749 = vmax.xlane.f32.xlu1 %v748_v41 }
 0x3ad   : > { %v909_v42 = vpop.f32.mrb[6].mxu1 }
 0x3ae   : > { %v913_v43 = vsel %vm500_vm3, %v909_v42, -inf  ;;  %v2879_v44 = vpop.f32.mrb[7].mxu1 }
 0x3af   : > { %v914_v45 = vsel %vm505_vm2, %v913_v43, -inf }
 0x3b0   : > { %915 = vmax.xlane.f32.xlu0 %v914_v45 }
 0x3b1   : > { %v1075_v46 = vpop.f32.mrb[8].mxu1 }
 0x3b2   : > { %v1079_v47 = vsel %vm500_vm3, %v1075_v46, -inf  ;;  %v2889_v48 = vpop.f32.mrb[9].mxu1 }
 0x3b3   : > { %v1080_v49 = vsel %vm505_vm2, %v1079_v47, -inf }
 0x3b4   : > { %1081 = vmax.xlane.f32.xlu0 %v1080_v49 }
 0x3bd   : > { %923 = vrot.lane.b32.xlu1 %v3089_v11, %s2967_s19 }
 0x3ca   : > { %1089 = vrot.lane.b32.xlu0 %v3089_v11, %s2968_s20 }
 0x439   : > { %v750_v50 = vpop.xlane.xlu1 %749 }
 0x43a   : > { %v751_v51 = vsub.f32 %v747_v39, %v750_v50  ;;  %v1273_v50 = vld [vmem:[%s4299_s7 + $0x8] sm:$0xff] }
 0x43c   : > { %v752_v52 = vmul.f32 1.442695, %v751_v51  ;;  %v1289_v51 = vld [vmem:[%s4299_s7 + $0x88] sm:$0xff] }
 0x43d   : > { %v916_v53 = vpop.xlane.xlu0 %915  ;;  %v924_v60 = vpop.permute.xlu1 %923 }
 0x43e   : > { %2930 = vpow2.f32 %v752_v52  ;;  %v917_v54 = vsub.f32 %v913_v43, %v916_v53  ;;  %v1338_v52 = vpack.c.bf16 %v1289_v51, %v1273_v50  ;;  %v1291_v53 = vld [vmem:[%s4299_s7 + $0x98] sm:$0xff]  ;;  %v1280_v50 = vld [vmem:[%s4299_s7 + $0x40] sm:$0xff] }
 0x43f   : > { %v1296_v51 = vld [vmem:[%s4299_s7 + $0xc0] sm:$0xff] }
 0x440   : > { %v918_v55 = vmul.f32 1.442695, %v917_v54  ;;  %v1272_v54 = vld [vmem:[%s4299_s7] sm:$0xff] }
 0x441   : > { %v1082_v56 = vpop.xlane.xlu0 %1081 }
 0x442   : > { %2932 = vpow2.f32 %v918_v55  ;;  %v1083_v57 = vsub.f32 %v1079_v47, %v1082_v56  ;;  %v1288_v55 = vld [vmem:[%s4299_s7 + $0x80] sm:$0xff] }
 0x444   : > { %v1084_v58 = vmul.f32 1.442695, %v1083_v57  ;;  %v1337_v57 = vpack.c.bf16 %v1288_v55, %v1272_v54  ;;  %v1298_v54 = vld [vmem:[%s4299_s7 + $0xd0] sm:$0xff]  ;;  %v1313_v55 = vld [vmem:[%s4299_s7 + $0x148] sm:$0xff] }
 0x445   : > { %v1090_v63 = vpop.permute.xlu0 %1089 }
 0x446   : > { %2934 = vpow2.f32 %v1084_v58  ;;  %v1274_v58 = vld [vmem:[%s4299_s7 + $0x10] sm:$0xff] }
 0x448   : > { %v2931_v59 = vpop.eup %2930 }
 0x449   : > { %2873 = vmatmul.mubr.msk.f32.vlgmr.msra.gmra.mrb[4].mxu0 %vm505_vm2, %v2931_v59  ;;  %v754_v61 = vsel %vm505_vm2, %v2931_v59, 0.0  ;;  %v1290_v59 = vld [vmem:[%s4299_s7 + $0x90] sm:$0xff] }
 0x44a   : > { %2881 = vmatpush3.msra.mxu0 %v924_v60  ;;  %755 = vadd.xlane.f32.xlu0 %v754_v61  ;;  %v1339_v60 = vpack.c.bf16 %v1290_v59, %v1274_v58  ;;  %v1305_v61 = vld [vmem:[%s4299_s7 + $0x108] sm:$0xff]  ;;  %v1331_v58 = vld [vmem:[%s4299_s7 + $0x1d8] sm:$0xff]  ;;  %v1345_v59 = vpack.c.bf16 %v1296_v51, %v1280_v50 }
 0x44b   : > { %2882 = vmatprep.mubr.msk.f32.mxu0 %vm2957_vm0, %v2956_v3  ;;  %2890 = vmatprep.subr.mxu0 %v2956_v3  ;;  %v1803_v50 = vld [vmem:[%s4301_s9 + $0x18] sm:$0xff] }
 0x44c   : > { %v2933_v62 = vpop.eup %2932 }
 0x44d   : > { %2883 = vmatmul.mubr.msk.f32.vlgmr.msra.gmra.mrb[6].mxu0 %vm505_vm2, %v2933_v62  ;;  %v920_v0 = vsel %vm505_vm2, %v2933_v62, 0.0  ;;  %v1321_v62 = vld [vmem:[%s4299_s7 + $0x188] sm:$0xff] }
 0x44e   : > { %2891 = vmatpush3.msra.mxu0 %v1090_v63  ;;  %921 = vadd.xlane.f32.xlu1 %v920_v0  ;;  %v1307_v63 = vld [vmem:[%s4299_s7 + $0x118] sm:$0xff]  ;;  %v1354_v0 = vpack.c.bf16 %v1321_v62, %v1305_v61  ;;  %v1312_v61 = vld [vmem:[%s4299_s7 + $0x140] sm:$0xff] }
 0x44f   : > { %2892 = vmatprep.mubr.msk.f32.mxu0 %vm2957_vm0, %v2956_v3  ;;  %1456 = vmatprep.subr.bf16.mxu0 %v1338_v52  ;;  %v1328_v62 = vld [vmem:[%s4299_s7 + $0x1c0] sm:$0xff] }
 0x450   : > { %v2935_v1 = vpop.eup %2934  ;;  %v1361_v9 = vpack.c.bf16 %v1328_v62, %v1312_v61  ;;  %v1805_v61 = vld [vmem:[%s4301_s9 + $0x28] sm:$0xff] }
 0x451   : > { %2893 = vmatmul.mubr.msk.f32.vlgmr.msra.gmra.mrb[8].mxu0 %vm505_vm2, %v2935_v1  ;;  %v1086_v2 = vsel %vm505_vm2, %v2935_v1, 0.0  ;;  %v1323_v1 = vld [vmem:[%s4299_s7 + $0x198] sm:$0xff] }
 0x452   : > { %1087 = vadd.xlane.f32.xlu0 %v1086_v2  ;;  %1457 = vmatpush1.bf16.msra.mxu0 %v1337_v57  ;;  %v1304_v2 = vld [vmem:[%s4299_s7 + $0x100] sm:$0xff]  ;;  %v1315_v57 = vld [vmem:[%s4299_s7 + $0x158] sm:$0xff] }
 0x453   : > { %1458 = vmatprep.subr.bf16.mxu0 %v1354_v0  ;;  %1488 = vmatprep.mubr.bf16.mxu0 %v2972_v14  ;;  %v1364_v0 = vpack.c.bf16 %v1331_v58, %v1315_v57  ;;  %v1853_v57 = vld [vmem:[%s4301_s9 + $0x1a8] sm:$0xff] }
 0x456   : > { %589 = vadd.xlane.f32.xlu0 %v588_v4  ;;  %v1320_v4 = vld [vmem:[%s4299_s7 + $0x180] sm:$0xff] }
 0x4d7   : > { %v756_v5 = vpop.xlane.xlu0 %755 }
 0x4d8   : > { %2936 = vrcp.f32 %v756_v5  ;;  %v1356_v5 = vpack.c.bf16 %v1323_v1, %v1307_v63  ;;  %v1314_v1 = vld [vmem:[%s4299_s7 + $0x150] sm:$0xff] }
 0x4db   : > { %v922_v6 = vpop.xlane.xlu1 %921 }
 0x4dc   : > { %2938 = vrcp.f32 %v922_v6  ;;  %v1353_v6 = vpack.c.bf16 %v1320_v4, %v1304_v2  ;;  %v1330_v2 = vld [vmem:[%s4299_s7 + $0x1d0] sm:$0xff]  ;;  %v1285_v4 = vld [vmem:[%s4299_s7 + $0x68] sm:$0xff] }
 0x4de   : > { %1459 = vmatpush1.bf16.msra.mxu0 %v1353_v6  ;;  %v1287_v6 = vld [vmem:[%s4299_s7 + $0x78] sm:$0xff] }
 0x4df   : > { %v1088_v11 = vpop.xlane.xlu0 %1087 }
 0x4e0   : > { %2940 = vrcp.f32 %v1088_v11  ;;  %v1277_v11 = vld [vmem:[%s4299_s7 + $0x28] sm:$0xff] }
 0x4e2   : > { %v2937_v15 = vpop.eup %2936 }
 0x4e3   : > { %v590_v27 = vpop.xlane.xlu0 %589 }
 0x4e4   : > { %2942 = vrcp.f32 %v590_v27 }
 0x4e6   : > { %v2939_v20 = vpop.eup %2938 }
 0x4ea   : > { %v2941_v23 = vpop.eup %2940 }
 0x4ee   : > { %v2943_v28 = vpop.eup %2942 }
 0x4ef   : > { %v668_v30 = vmul.f32 %v2943_v28, %v3132_v36  ;;  %v1278_v28 = vld [vmem:[%s4299_s7 + $0x30] sm:$0xff] }
 0x51c   : > { %v829_v16 = vpop.f32.mrb[4].mxu0 }
 0x51d   : > { %v834_v17 = vmul.f32 %v2937_v15, %v829_v16  ;;  %v2874_v18 = vpop.f32.mrb[5].mxu0  ;;  %v1342_v15 = vpack.c.bf16 %v1293_v12, %v1277_v11  ;;  %v1295_v16 = vld [vmem:[%s4299_s7 + $0xb8] sm:$0xff]  ;;  %v1284_v11 = vld [vmem:[%s4299_s7 + $0x60] sm:$0xff] }
 0x51e   : > { %v1300_v12 = vld [vmem:[%s4299_s7 + $0xe0] sm:$0xff] }
 0x51f   : > { %1168 = vrot.lane.b32.xlu0 %v834_v17, %s2969_s14  ;;  %v1344_v17 = vpack.c.bf16 %v1295_v16, %v1279_v13  ;;  %1538 = vmatprep.subr.bf16.mxu0 %v1342_v15  ;;  %v1352_v15 = vpack.c.bf16 %v1303_v8, %v1287_v6  ;;  %v1286_v16 = vld [vmem:[%s4299_s7 + $0x70] sm:$0xff] }
 0x520   : > { %v995_v21 = vpop.f32.mrb[6].mxu0 }
 0x521   : > { %v1000_v3 = vmul.f32 %v2939_v20, %v995_v21  ;;  %v2884_v22 = vpop.f32.mrb[7].mxu0 }
 0x522   : > { %v2634_v22 = vld [vmem:[%s4297_s5] ss:$0 sm:$0xff] }
 0x523   : > { %1172 = vrot.lane.b32.xlu1 %v1000_v3, %s2970_s15 }
 0x524   : > { %v1161_v24 = vpop.f32.mrb[8].mxu0 }
 0x525   : > { %v1166_v25 = vmul.f32 %v2941_v23, %v1161_v24  ;;  %v2894_v26 = vpop.f32.mrb[9].mxu0  ;;  %v2635_v24 = vld [vmem:[%s4298_s6] ss:$0 sm:$0xff] }
 0x526   : > { %v1292_v26 = vld [vmem:[%s4299_s7 + $0xa0] sm:$0xff] }
 0x527   : > { %1176 = vrot.lane.b32.xlu0 %v1166_v25, %s2971_s16  ;;  %v1276_v25 = vld [vmem:[%s4299_s7 + $0x20] sm:$0xff] }
 0x591   : > { %v1169_v29 = vpop.permute.xlu0 %1168 }
 0x592   : > { %v1179_v32 = vsel %vm505_vm2, %v668_v30, %v1169_v29  ;;  %v1294_v29 = vld [vmem:[%s4299_s7 + $0xb0] sm:$0xff]  ;;  %v1309_v30 = vld [vmem:[%s4299_s7 + $0x128] sm:$0xff] }
 0x595   : > { %v1173_v31 = vpop.permute.xlu1 %1172 }
 0x596   : > { %v1181_v33 = vsel %vm1180_vm4, %v1179_v32, %v1173_v31  ;;  %v1325_v31 = vld [vmem:[%s4299_s7 + $0x1a8] sm:$0xff]  ;;  %v1311_v32 = vld [vmem:[%s4299_s7 + $0x138] sm:$0xff] }
 0x599   : > { %v1177_v34 = vpop.permute.xlu0 %1176 }
 0x59a   : > { %v1183_v35 = vsel %vm1182_vm5, %v1181_v33, %v1177_v34  ;;  %v1327_v33 = vld [vmem:[%s4299_s7 + $0x1b8] sm:$0xff] }
 0x59b   : > { %v1188_v37 = vpack.c.bf16 %v1183_v35, %v1183_v35  ;;  %v1341_v35 = vpack.c.bf16 %v1292_v26, %v1276_v25  ;;  %v1332_v25 = vld [vmem:[%s4299_s7 + $0x1e0] sm:$0xff] }
 0x59d   : > { %2900 = vmatmul.mubr.msk.bf16.vlgmr.msra.gmra.mrb[12].mxu1 %vm452_vm1, %v1188_v37  ;;  %v1343_v37 = vpack.c.bf16 %v1294_v29, %v1278_v28  ;;  %v1318_v28 = vld [vmem:[%s4299_s7 + $0x170] sm:$0xff] }
 0x59e   : > { %1529 = vmatprep.mubr.bf16.mxu1 %v2972_v14  ;;  %v1334_v29 = vld [vmem:[%s4299_s7 + $0x1f0] sm:$0xff] }
 0x670   : > { %v1235_v39 = vpop.f32.mrb[12].mxu1 }
 0x671   : > { %v1236_v40 = vadd.f32 %v2632_v38, %v1235_v39  ;;  %v2901_v41 = vpop.f32.mrb[13].mxu1  ;;  %v1308_v38 = vld [vmem:[%s4299_s7 + $0x120] sm:$0xff] }
 0x672   : > { %v1238_v42 = vpop.f32.mrb[14].mxu1  ;;  %v1324_v39 = vld [vmem:[%s4299_s7 + $0x1a0] sm:$0xff]  ;;  %v1358_v41 = vpack.c.bf16 %v1325_v31, %v1309_v30  ;;  %v1817_v31 = vld [vmem:[%s4301_s9 + $0x88] sm:$0xff] }
 0x673   : > { %v2902_v36 = vpop.f32.mrb[15].mxu1  ;;  %v1241_v43 = vadd.f32 %v1236_v40, %v3078_v7  ;;  %v1275_v7 = vld [vmem:[%s4299_s7 + $0x18] sm:$0xff]  ;;  %v1360_v42 = vpack.c.bf16 %v1327_v33, %v1311_v32  ;;  %v1816_v30 = vld [vmem:[%s4301_s9 + $0x80] sm:$0xff]  ;;  %v1849_v33 = vld [vmem:[%s4301_s9 + $0x188] sm:$0xff] }
 0x674   : > { %v1340_v56 = vpack.c.bf16 %v1291_v53, %v1275_v7  ;;  %v1310_v36 = vld [vmem:[%s4299_s7 + $0x130] sm:$0xff]  ;;  %v1848_v32 = vld [vmem:[%s4301_s9 + $0x180] sm:$0xff] }
 0x675   : > { %v1244_v44 = vsel %vm452_vm1, %v1241_v43, 0.0  ;;  %v1282_v53 = vld [vmem:[%s4299_s7 + $0x50] sm:$0xff] }
 0x676   : > { %1245 = vadd.xlane.f32.xlu0 %v1244_v44  ;;  %1497 = vmatprep.subr.bf16.mxu1 %v1340_v56  ;;  %v1281_v44 = vld [vmem:[%s4299_s7 + $0x48] sm:$0xff] }
 0x677   : > { %1498 = vmatpush1.bf16.msra.mxu1 %v1339_v60  ;;  %v1329_v56 = vld [vmem:[%s4299_s7 + $0x1c8] sm:$0xff]  ;;  %v1347_v60 = vpack.c.bf16 %v1298_v54, %v1282_v53  ;;  %v1835_v53 = vld [vmem:[%s4301_s9 + $0x118] sm:$0xff]  ;;  %v1820_v54 = vld [vmem:[%s4301_s9 + $0xa0] sm:$0xff] }
 0x678   : > { %1499 = vmatprep.subr.bf16.mxu1 %v1356_v5  ;;  %v1362_v63 = vpack.c.bf16 %v1329_v56, %v1313_v55  ;;  %v1301_v5 = vld [vmem:[%s4299_s7 + $0xe8] sm:$0xff]  ;;  %v1852_v56 = vld [vmem:[%s4301_s9 + $0x1a0] sm:$0xff] }
 0x679   : > { %v1350_v13 = vpack.c.bf16 %v1301_v5, %v1285_v4  ;;  %v1821_v55 = vld [vmem:[%s4301_s9 + $0xa8] sm:$0xff]  ;;  %v1854_v4 = vld [vmem:[%s4301_s9 + $0x1b0] sm:$0xff]  ;;  %v1855_v5 = vld [vmem:[%s4301_s9 + $0x1b8] sm:$0xff] }
 0x67a   : > { %v2082_v62 = vpack.c.bf16 %v1821_v55, %v1820_v54  ;;  %v1830_v54 = vld [vmem:[%s4301_s9 + $0xf0] sm:$0xff]  ;;  %v1831_v55 = vld [vmem:[%s4301_s9 + $0xf8] sm:$0xff] }
 0x67b   : > { %1500 = vmatpush1.bf16.msra.mxu1 %v1355_v10  ;;  %v1363_v10 = vpack.c.bf16 %v1330_v2, %v1314_v1  ;;  %v1822_v1 = vld [vmem:[%s4301_s9 + $0xb0] sm:$0xff]  ;;  %v1823_v2 = vld [vmem:[%s4301_s9 + $0xb8] sm:$0xff] }
 0x67c   : > { %1579 = vmatprep.subr.bf16.mxu1 %v1344_v17  ;;  %v1302_v17 = vld [vmem:[%s4299_s7 + $0xf0] sm:$0xff] }
 0x703   : > { %v1246_v45 = vpop.xlane.xlu0 %1245 }
 0x704   : > { %v1248_v46 = vmul.f32 0.03125, %v1246_v45  ;;  %v1297_v45 = vld [vmem:[%s4299_s7 + $0xc8] sm:$0xff] }
 0x705   : > { %v1346_v7 = vpack.c.bf16 %v1297_v45, %v1281_v44  ;;  %v1818_v44 = vld [vmem:[%s4301_s9 + $0x90] sm:$0xff]  ;;  %v1819_v45 = vld [vmem:[%s4301_s9 + $0x98] sm:$0xff] }
 0x706   : > { %v1249_v47 = vsub.f32 %v1241_v43, %v1248_v46  ;;  %v1326_v43 = vld [vmem:[%s4299_s7 + $0x1b0] sm:$0xff]  ;;  %v1283_v46 = vld [vmem:[%s4299_s7 + $0x58] sm:$0xff]  ;;  %v2081_v51 = vpack.c.bf16 %v1819_v45, %v1818_v44  ;;  %v1828_v44 = vld [vmem:[%s4301_s9 + $0xe0] sm:$0xff] }
 0x707   : > { %v1829_v45 = vld [vmem:[%s4301_s9 + $0xe8] sm:$0xff] }
 0x708   : > { %v1250_v48 = vmul.f32 %v1249_v47, %v1249_v47 }
 0x70a   : > { %v1251_v49 = vsel %vm452_vm1, %v1250_v48, 0.0  ;;  %v1357_v48 = vpack.c.bf16 %v1324_v39, %v1308_v38  ;;  %v1800_v38 = vld [vmem:[%s4301_s9] sm:$0xff]  ;;  %v1801_v39 = vld [vmem:[%s4301_s9 + $0x8] sm:$0xff] }
 0x70b   : > { %1252 = vadd.xlane.f32.xlu1 %v1251_v49  ;;  %v1359_v49 = vpack.c.bf16 %v1326_v43, %v1310_v36  ;;  %v1832_v36 = vld [vmem:[%s4301_s9 + $0x100] sm:$0xff]  ;;  %v1833_v43 = vld [vmem:[%s4301_s9 + $0x108] sm:$0xff] }
 0x798   : > { %v1253_v18 = vpop.xlane.xlu1 %1252 }
 0x799   : > { %v1254_v20 = vmul.f32 0.03125, %v1253_v18  ;;  %v1317_v18 = vld [vmem:[%s4299_s7 + $0x168] sm:$0xff] }
 0x79b   : > { %v1255_v21 = vadd.f32 1e-05, %v1254_v20  ;;  %v1333_v20 = vld [vmem:[%s4299_s7 + $0x1e8] sm:$0xff] }
 0x79c   : > { %v1366_v26 = vpack.c.bf16 %v1333_v20, %v1317_v18  ;;  %v1856_v18 = vld [vmem:[%s4301_s9 + $0x1c0] sm:$0xff]  ;;  %v1857_v20 = vld [vmem:[%s4301_s9 + $0x1c8] sm:$0xff] }
 0x79d   : > { %2944 = vrsqrt.f32 %v1255_v21  ;;  %v1319_v21 = vld [vmem:[%s4299_s7 + $0x178] sm:$0xff] }
 0x7a7   : > { %v2945_v3 = vpop.eup %2944 }
 0x7a8   : > { %v1257_v23 = vmul.f32 %v2945_v3, %v1249_v47  ;;  %v1299_v47 = vld [vmem:[%s4299_s7 + $0xd8] sm:$0xff] }
 0x7a9   : > { %v1348_v52 = vpack.c.bf16 %v1299_v47, %v1283_v46  ;;  %v1335_v3 = vld [vmem:[%s4299_s7 + $0x1f8] sm:$0xff]  ;;  %v1850_v46 = vld [vmem:[%s4301_s9 + $0x190] sm:$0xff] }
 0x7aa   : > { %v1264_v27 = vmul.f32 %v2634_v22, %v1257_v23  ;;  %v1349_v22 = vpack.c.bf16 %v1300_v12, %v1284_v11  ;;  %v1351_v23 = vpack.c.bf16 %v1302_v17, %v1286_v16  ;;  %v1851_v47 = vld [vmem:[%s4301_s9 + $0x198] sm:$0xff]  ;;  %v2083_v11 = vpack.c.bf16 %v1823_v2, %v1822_v1  ;;  %v1824_v16 = vld [vmem:[%s4301_s9 + $0xc0] sm:$0xff]  ;;  %v1825_v17 = vld [vmem:[%s4301_s9 + $0xc8] sm:$0xff] }
 0x7ab   : > { %v2099_v12 = vpack.c.bf16 %v1855_v5, %v1854_v4  ;;  %v1880_v1 = vld [vmem:[%s4301_s9 + $0x280] sm:$0xff]  ;;  %v1881_v2 = vld [vmem:[%s4301_s9 + $0x288] sm:$0xff] }
 0x7ac   : > { %v3272_v34 = vadd.f32 %v2635_v24, %v1264_v27  ;;  %v1316_v24 = vld [vmem:[%s4299_s7 + $0x160] sm:$0xff]  ;;  %v1368_v27 = vpack.c.bf16 %v1335_v3, %v1319_v21  ;;  %v2112_v5 = vpack.c.bf16 %v1881_v2, %v1880_v1  ;;  %v1917_v2 = vld [vmem:[%s4301_s9 + $0x3a8] sm:$0xff] }
 0x7ad   : > { %v1912_v4 = vld [vmem:[%s4301_s9 + $0x380] sm:$0xff] }
 0x7ae   : > { %v3282_v40 = vpack.c.bf16 %v3272_v34, %v3272_v34  ;;  %v1916_v1 = vld [vmem:[%s4301_s9 + $0x3a0] sm:$0xff] }
 0x7b0   : > { %2636 = vmatmul.mubr.msk.bf16.vlgmr.msra.gmra.mrb[12].mxu0 %vm452_vm1, %v3282_v40  ;;  %2637 = vmatmul.mubr.msk.bf16.vlgmr.msra.gmra.mrb[16].mxu1 %vm452_vm1, %v3282_v40 }
 0x7b1   : > { %1539 = vmatpush1.bf16.msra.mxu0 %v1341_v35  ;;  %1580 = vmatpush1.bf16.msra.mxu1 %v1343_v37  ;;  %v1365_v35 = vpack.c.bf16 %v1332_v25, %v1316_v24  ;;  %v1367_v37 = vpack.c.bf16 %v1334_v29, %v1318_v28  ;;  %v2084_v24 = vpack.c.bf16 %v1825_v17, %v1824_v16  ;;  %v1826_v28 = vld [vmem:[%s4301_s9 + $0xd0] sm:$0xff]  ;;  %v1827_v29 = vld [vmem:[%s4301_s9 + $0xd8] sm:$0xff]  ;;  %v1379_v16 = vsub.s32 1, %v3103_v19 }
 0x7b2   : > { %1540 = vmatprep.subr.bf16.mxu0 %v1358_v41  ;;  %1581 = vmatprep.subr.bf16.mxu1 %v1360_v42  ;;  %v2080_v41 = vpack.c.bf16 %v1817_v31, %v1816_v30  ;;  %v2096_v42 = vpack.c.bf16 %v1849_v33, %v1848_v32  ;;  %v2100_v25 = vpack.c.bf16 %v1857_v20, %v1856_v18  ;;  %v1858_v30 = vld [vmem:[%s4301_s9 + $0x1d0] sm:$0xff]  ;;  %v1859_v31 = vld [vmem:[%s4301_s9 + $0x1d8] sm:$0xff]  ;;  %v1387_v17 = vsub.s32 3, %v3103_v19 }
 0x7b3   : > { %1570 = vmatprep.mubr.bf16.mxu0 %v2972_v14  ;;  %1611 = vmatprep.mubr.bf16.mxu1 %v2972_v14 }
 0x7b5   : > { %1541 = vmatpush1.bf16.msra.mxu0 %v1357_v48  ;;  %1582 = vmatpush1.bf16.msra.mxu1 %v1359_v49  ;;  %v2072_v48 = vpack.c.bf16 %v1801_v39, %v1800_v38  ;;  %v2088_v49 = vpack.c.bf16 %v1833_v43, %v1832_v36  ;;  %v2101_v38 = vpack.c.bf16 %v1859_v31, %v1858_v30  ;;  %v1811_v39 = vld [vmem:[%s4301_s9 + $0x58] sm:$0xff] }
 0x7b6   : > { %1620 = vmatprep.subr.bf16.mxu0 %v1346_v7  ;;  %1661 = vmatprep.subr.bf16.mxu1 %v1348_v52  ;;  %v2097_v7 = vpack.c.bf16 %v1851_v47, %v1850_v46  ;;  %v1834_v52 = vld [vmem:[%s4301_s9 + $0x110] sm:$0xff]  ;;  %v1860_v46 = vld [vmem:[%s4301_s9 + $0x1e0] sm:$0xff]  ;;  %v2086_v47 = vpack.c.bf16 %v1829_v45, %v1828_v44 }
 0x7b7   : > { %v1882_v44 = vld [vmem:[%s4301_s9 + $0x290] sm:$0xff] }
 0x7b8   : > { %2638 = vmatmul.mubr.msk.bf16.vlgmr.msra.gmra.mrb[16].mxu0 %vm452_vm1, %v3282_v40  ;;  %2639 = vmatmul.mubr.msk.bf16.vlgmr.msra.gmra.mrb[20].mxu1 %vm452_vm1, %v3282_v40 }
 0x7b9   : > { %1621 = vmatpush1.bf16.msra.mxu0 %v1345_v59  ;;  %1662 = vmatpush1.bf16.msra.mxu1 %v1347_v60  ;;  %v2089_v59 = vpack.c.bf16 %v1835_v53, %v1834_v52  ;;  %v1804_v60 = vld [vmem:[%s4301_s9 + $0x20] sm:$0xff]  ;;  %v1845_v52 = vld [vmem:[%s4301_s9 + $0x168] sm:$0xff] }
 0x7ba   : > { %1622 = vmatprep.subr.bf16.mxu0 %v1362_v63  ;;  %1663 = vmatprep.subr.bf16.mxu1 %v1364_v0  ;;  %v2098_v63 = vpack.c.bf16 %v1853_v57, %v1852_v56  ;;  %v1837_v0 = vld [vmem:[%s4301_s9 + $0x128] sm:$0xff]  ;;  %v2074_v6 = vpack.c.bf16 %v1805_v61, %v1804_v60  ;;  %v1862_v56 = vld [vmem:[%s4301_s9 + $0x1f0] sm:$0xff]  ;;  %v2087_v57 = vpack.c.bf16 %v1831_v55, %v1830_v54  ;;  %v1815_v60 = vld [vmem:[%s4301_s9 + $0x78] sm:$0xff] }
 0x7bb   : > { %1652 = vmatprep.mubr.bf16.mxu0 %v2972_v14  ;;  %1693 = vmatprep.mubr.bf16.mxu1 %v2972_v14  ;;  %v1866_v54 = vld [vmem:[%s4301_s9 + $0x210] sm:$0xff]  ;;  %v1867_v55 = vld [vmem:[%s4301_s9 + $0x218] sm:$0xff] }
 0x7bd   : > { %1623 = vmatpush1.bf16.msra.mxu0 %v1361_v9  ;;  %1664 = vmatpush1.bf16.msra.mxu1 %v1363_v10  ;;  %v1806_v9 = vld [vmem:[%s4301_s9 + $0x30] sm:$0xff]  ;;  %v1807_v10 = vld [vmem:[%s4301_s9 + $0x38] sm:$0xff] }
 0x7be   : > { %1702 = vmatprep.subr.bf16.mxu0 %v1350_v13  ;;  %1743 = vmatprep.subr.bf16.mxu1 %v1352_v15  ;;  %v1838_v13 = vld [vmem:[%s4301_s9 + $0x130] sm:$0xff]  ;;  %v1839_v15 = vld [vmem:[%s4301_s9 + $0x138] sm:$0xff]  ;;  %v2075_v21 = vpack.c.bf16 %v1807_v10, %v1806_v9  ;;  %v1399_v9 = vsub.s32 6, %v3103_v19  ;;  %v3616_v10 = vld [vmem:[%s4300_s8 + $0x8] sm:$0xff] }
 0x7bf   : > { %v2091_v3 = vpack.c.bf16 %v1839_v15, %v1838_v13  ;;  %v1383_v13 = vsub.s32 2, %v3103_v19  ;;  %v3628_v15 = vld [vmem:[%s4300_s8] sm:$0xff] }
 0x7c0   : > { %2640 = vmatmul.mubr.msk.bf16.vlgmr.msra.gmra.mrb[20].mxu0 %vm452_vm1, %v3282_v40  ;;  %2641 = vmatmul.mubr.msk.bf16.vlgmr.msra.gmra.mrb[24].mxu1 %vm452_vm1, %v3282_v40 }
 0x7c1   : > { %1703 = vmatpush1.bf16.msra.mxu0 %v1349_v22  ;;  %1744 = vmatpush1.bf16.msra.mxu1 %v1351_v23  ;;  %v1808_v22 = vld [vmem:[%s4301_s9 + $0x40] sm:$0xff]  ;;  %v1809_v23 = vld [vmem:[%s4301_s9 + $0x48] sm:$0xff]  ;;  %v1384_v20 = vrot.slane %v3628_v15, %v1383_v13 }
 0x7c2   : > { %1704 = vmatprep.subr.bf16.mxu0 %v1366_v26  ;;  %1745 = vmatprep.subr.bf16.mxu1 %v1368_v27  ;;  %v1840_v26 = vld [vmem:[%s4301_s9 + $0x140] sm:$0xff]  ;;  %v1841_v27 = vld [vmem:[%s4301_s9 + $0x148] sm:$0xff]  ;;  %v2076_v32 = vpack.c.bf16 %v1809_v23, %v1808_v22 }
 0x7c3   : > { %1734 = vmatprep.mubr.bf16.mxu0 %v2972_v14  ;;  %1775 = vmatprep.mubr.bf16.mxu1 %v2972_v14  ;;  %v1802_v14 = vld [vmem:[%s4301_s9 + $0x10] sm:$0xff]  ;;  %v2092_v33 = vpack.c.bf16 %v1841_v27, %v1840_v26 }
 0x7c4   : > { %v2073_v58 = vpack.c.bf16 %v1803_v50, %v1802_v14  ;;  %v1813_v14 = vld [vmem:[%s4301_s9 + $0x68] sm:$0xff] }
 0x7c5   : > { %1705 = vmatpush1.bf16.msra.mxu0 %v1365_v35  ;;  %1746 = vmatpush1.bf16.msra.mxu1 %v1367_v37  ;;  %v1810_v35 = vld [vmem:[%s4301_s9 + $0x50] sm:$0xff]  ;;  %v2085_v37 = vpack.c.bf16 %v1827_v29, %v1826_v28  ;;  %v1395_v28 = vsub.s32 5, %v3103_v19 }
 0x7c6   : > { %2671 = vmatprep.subr.bf16.mxu0 %v2080_v41  ;;  %2693 = vmatprep.subr.bf16.mxu1 %v2096_v42  ;;  %v1842_v41 = vld [vmem:[%s4301_s9 + $0x150] sm:$0xff]  ;;  %v1843_v42 = vld [vmem:[%s4301_s9 + $0x158] sm:$0xff]  ;;  %v2077_v36 = vpack.c.bf16 %v1811_v39, %v1810_v35  ;;  %v1864_v35 = vld [vmem:[%s4301_s9 + $0x200] sm:$0xff] }
 0x7c7   : > { %v2093_v43 = vpack.c.bf16 %v1843_v42, %v1842_v41 }
 0x7c8   : > { %2642 = vmatmul.mubr.msk.bf16.vlgmr.msra.gmra.mrb[24].mxu0 %vm452_vm1, %v3282_v40  ;;  %2643 = vmatmul.mubr.msk.bf16.vlgmr.msra.gmra.mrb[28].mxu1 %vm452_vm1, %v3282_v40  ;;  %v1836_v40 = vld [vmem:[%s4301_s9 + $0x120] sm:$0xff] }
 0x7c9   : > { %2672 = vmatpush3.bf16.msra.mxu0 %v2072_v48  ;;  %2694 = vmatpush3.bf16.msra.mxu1 %v2088_v49  ;;  %v2090_v8 = vpack.c.bf16 %v1837_v0, %v1836_v40  ;;  %v1861_v48 = vld [vmem:[%s4301_s9 + $0x1e8] sm:$0xff]  ;;  %v1812_v49 = vld [vmem:[%s4301_s9 + $0x60] sm:$0xff]  ;;  %v1847_v40 = vld [vmem:[%s4301_s9 + $0x178] sm:$0xff] }
 0x7ca   : > { %2673 = vmatprep.subr.bf16.mxu0 %v2081_v51  ;;  %2695 = vmatprep.subr.bf16.mxu1 %v2097_v7  ;;  %v2102_v50 = vpack.c.bf16 %v1861_v48, %v1860_v46  ;;  %v2078_v51 = vpack.c.bf16 %v1813_v14, %v1812_v49  ;;  %v1844_v7 = vld [vmem:[%s4301_s9 + $0x160] sm:$0xff]  ;;  %v1914_v48 = vld [vmem:[%s4301_s9 + $0x390] sm:$0xff]  ;;  %v1915_v49 = vld [vmem:[%s4301_s9 + $0x398] sm:$0xff]  ;;  %v1396_v14 = vrot.slane %v3628_v15, %v1395_v28 }
 0x7cb   : > { %v2094_v53 = vpack.c.bf16 %v1845_v52, %v1844_v7 }
 0x7cd   : > { %2674 = vmatpush3.bf16.msra.mxu0 %v2073_v58  ;;  %2696 = vmatpush3.bf16.msra.mxu1 %v2089_v59  ;;  %v1863_v58 = vld [vmem:[%s4301_s9 + $0x1f8] sm:$0xff]  ;;  %v1814_v59 = vld [vmem:[%s4301_s9 + $0x70] sm:$0xff] }
 0x7ce   : > { %2675 = vmatprep.subr.bf16.mxu0 %v2082_v62  ;;  %2697 = vmatprep.subr.bf16.mxu1 %v2098_v63  ;;  %v2103_v61 = vpack.c.bf16 %v1863_v58, %v1862_v56  ;;  %v2079_v62 = vpack.c.bf16 %v1815_v60, %v1814_v59  ;;  %v1846_v63 = vld [vmem:[%s4301_s9 + $0x170] sm:$0xff]  ;;  %v2129_v59 = vpack.c.bf16 %v1915_v49, %v1914_v48  ;;  %v1903_v49 = vld [vmem:[%s4301_s9 + $0x338] sm:$0xff] }
 0x7cf   : > { %v2095_v0 = vpack.c.bf16 %v1847_v40, %v1846_v63  ;;  %v1898_v60 = vld [vmem:[%s4301_s9 + $0x310] sm:$0xff] }
 0x7d1   : > { %2676 = vmatpush3.bf16.msra.mxu0 %v2074_v6  ;;  %2698 = vmatpush3.bf16.msra.mxu1 %v2090_v8  ;;  %v1913_v6 = vld [vmem:[%s4301_s9 + $0x388] sm:$0xff] }
 0x7d2   : > { %2677 = vmatprep.subr.bf16.mxu0 %v2083_v11  ;;  %2699 = vmatprep.subr.bf16.mxu1 %v2099_v12  ;;  %v2128_v8 = vpack.c.bf16 %v1913_v6, %v1912_v4  ;;  %v3621_v11 = vrot.slane %v3616_v10, %v1399_v9  ;;  %v1375_v12 = vsub.s32 0, %v3103_v19  ;;  %v2105_v6 = vpack.c.bf16 %v1867_v55, %v1866_v54 }
 0x7d4   : > { %v1376_v18 = vrot.slane %v3628_v15, %v1375_v12 }
 0x7d5   : > { %2678 = vmatpush3.bf16.msra.mxu0 %v2075_v21  ;;  %2700 = vmatpush3.bf16.msra.mxu1 %v2091_v3  ;;  %v1380_v21 = vrot.slane %v3628_v15, %v1379_v16  ;;  %v1388_v3 = vrot.slane %v3628_v15, %v1387_v17 }
 0x7d6   : > { %2679 = vmatprep.subr.bf16.mxu0 %v2084_v24  ;;  %2701 = vmatprep.subr.bf16.mxu1 %v2100_v25 }
 0x7d9   : > { %2680 = vmatpush3.bf16.msra.mxu0 %v2076_v32  ;;  %2702 = vmatpush3.bf16.msra.mxu1 %v2092_v33  ;;  %v1403_v33 = vsub.s32 7, %v3103_v19 }
 0x7da   : > { %2681 = vmatprep.subr.bf16.mxu0 %v2085_v37  ;;  %2703 = vmatprep.subr.bf16.mxu1 %v2101_v38  ;;  %v1865_v37 = vld [vmem:[%s4301_s9 + $0x208] sm:$0xff]  ;;  %v1896_v38 = vld [vmem:[%s4301_s9 + $0x300] sm:$0xff] }
 0x7db   : > { %v1404_v52 = vrot.slane %v3628_v15, %v1403_v33 }
 0x7dd   : > { %2682 = vmatpush3.bf16.msra.mxu0 %v2077_v36  ;;  %2704 = vmatpush3.bf16.msra.mxu1 %v2093_v43  ;;  %v1897_v43 = vld [vmem:[%s4301_s9 + $0x308] sm:$0xff] }
 0x7de   : > { %2683 = vmatprep.subr.bf16.mxu0 %v2086_v47  ;;  %2705 = vmatprep.subr.bf16.mxu1 %v2102_v50  ;;  %v1883_v47 = vld [vmem:[%s4301_s9 + $0x298] sm:$0xff]  ;;  %v2104_v50 = vpack.c.bf16 %v1865_v37, %v1864_v35 }
 0x7df   : > { %v2113_v58 = vpack.c.bf16 %v1883_v47, %v1882_v44  ;;  %v1887_v37 = vld [vmem:[%s4301_s9 + $0x2b8] sm:$0xff] }
 0x7e0   : > { %v1871_v47 = vld [vmem:[%s4301_s9 + $0x238] sm:$0xff] }
 0x7e1   : > { %2684 = vmatpush3.bf16.msra.mxu0 %v2078_v51  ;;  %2706 = vmatpush3.bf16.msra.mxu1 %v2094_v53  ;;  %v2120_v53 = vpack.c.bf16 %v1897_v43, %v1896_v38  ;;  %v1918_v38 = vld [vmem:[%s4301_s9 + $0x3b0] sm:$0xff] }
 0x7e2   : > { %2685 = vmatprep.subr.bf16.mxu0 %v2087_v57  ;;  %2707 = vmatprep.subr.bf16.mxu1 %v2103_v61  ;;  %v1899_v61 = vld [vmem:[%s4301_s9 + $0x318] sm:$0xff] }
 0x7e5   : > { %2686 = vmatpush3.bf16.msra.mxu0 %v2079_v62  ;;  %2708 = vmatpush3.bf16.msra.mxu1 %v2095_v0  ;;  %v1884_v62 = vld [vmem:[%s4301_s9 + $0x2a0] sm:$0xff]  ;;  %v1885_v0 = vld [vmem:[%s4301_s9 + $0x2a8] sm:$0xff] }
 0x7e6   : > { %2715 = vmatprep.subr.bf16.mxu0 %v2112_v5  ;;  %2737 = vmatprep.subr.bf16.mxu1 %v2128_v8 }
 0x883   : > { %v1490_v22 = vpop.f32.mrb[12].mxu0  ;;  %v1531_v23 = vpop.f32.mrb[16].mxu1 }
 0x884   : > { %v1491_v24 = vadd.f32 %v1490_v22, %v1376_v18  ;;  %v1532_v25 = vadd.f32 %v1531_v23, %v1384_v20  ;;  %v1492_v26 = vpop.f32.mrb[13].mxu0  ;;  %v1533_v27 = vpop.f32.mrb[17].mxu1  ;;  %v1868_v22 = vld [vmem:[%s4301_s9 + $0x220] sm:$0xff]  ;;  %v1869_v23 = vld [vmem:[%s4301_s9 + $0x228] sm:$0xff] }
 0x885   : > { %v1493_v29 = vadd.f32 %v1492_v26, %v1380_v21  ;;  %v1534_v30 = vadd.f32 %v1533_v27, %v1388_v3  ;;  %v1494_v31 = vpop.f32.mrb[14].mxu0  ;;  %v1535_v32 = vpop.f32.mrb[18].mxu1  ;;  %v2121_v3 = vpack.c.bf16 %v1899_v61, %v1898_v60  ;;  %v2114_v26 = vpack.c.bf16 %v1885_v0, %v1884_v62  ;;  %v1872_v62 = vld [vmem:[%s4301_s9 + $0x240] sm:$0xff]  ;;  %v1873_v0 = vld [vmem:[%s4301_s9 + $0x248] sm:$0xff] }
 0x886   : > { %v1784_v39 = vmax.f32 %v1491_v24, 0.0  ;;  %v1786_v41 = vmax.f32 %v1532_v25, 0.0  ;;  %v1495_v42 = vpop.f32.mrb[15].mxu0  ;;  %v1536_v36 = vpop.f32.mrb[19].mxu1  ;;  %v2130_v27 = vpack.c.bf16 %v1917_v2, %v1916_v1  ;;  %v1886_v31 = vld [vmem:[%s4301_s9 + $0x2b0] sm:$0xff]  ;;  %v1391_v1 = vsub.s32 4, %v3103_v19 }
 0x887   : > { %v1785_v45 = vmax.f32 %v1493_v29, 0.0  ;;  %v1787_v46 = vmax.f32 %v1534_v30, 0.0  ;;  %v1900_v29 = vld [vmem:[%s4301_s9 + $0x320] sm:$0xff]  ;;  %v1901_v30 = vld [vmem:[%s4301_s9 + $0x328] sm:$0xff]  ;;  %v1416_v42 = vrot.slane %v3616_v10, %v1383_v13  ;;  %v2106_v36 = vpack.c.bf16 %v1869_v23, %v1868_v22  ;;  %v1902_v13 = vld [vmem:[%s4301_s9 + $0x330] sm:$0xff] }
 0x888   : > { %v2056_v56 = vpack.c.bf16 %v1784_v39, %v1784_v39  ;;  %v2058_v57 = vpack.c.bf16 %v1786_v41, %v1786_v41  ;;  %v1919_v39 = vld [vmem:[%s4301_s9 + $0x3b8] sm:$0xff]  ;;  %v1408_v41 = vrot.slane %v3616_v10, %v1375_v12  ;;  %v2115_v12 = vpack.c.bf16 %v1887_v37, %v1886_v31  ;;  %v1906_v31 = vld [vmem:[%s4301_s9 + $0x350] sm:$0xff] }
 0x889   : > { %v2057_v51 = vpack.c.bf16 %v1785_v45, %v1785_v45  ;;  %v2059_v7 = vpack.c.bf16 %v1787_v46, %v1787_v46  ;;  %v2122_v45 = vpack.c.bf16 %v1901_v30, %v1900_v29  ;;  %v1870_v46 = vld [vmem:[%s4301_s9 + $0x230] sm:$0xff]  ;;  %v2131_v48 = vpack.c.bf16 %v1919_v39, %v1918_v38  ;;  %v1923_v22 = vld [vmem:[%s4301_s9 + $0x3d8] sm:$0xff]  ;;  %v1893_v39 = vld [vmem:[%s4301_s9 + $0x2e8] sm:$0xff] }
 0x88a   : > { %v2107_v60 = vpack.c.bf16 %v1871_v47, %v1870_v46  ;;  %v2123_v61 = vpack.c.bf16 %v1903_v49, %v1902_v13  ;;  %v1424_v23 = vrot.slane %v3616_v10, %v1391_v1  ;;  %v1392_v46 = vrot.slane %v3628_v15, %v1391_v1  ;;  %v1876_v49 = vld [vmem:[%s4301_s9 + $0x260] sm:$0xff]  ;;  %v1974_v19 = vld [vmem:[%s4301_s9 + $0x570] sm:$0xff] }
 0x88b   : > { %v3691_v63 = vpop.f32.mrb[16].mxu0  ;;  %v3693_v40 = vpop.f32.mrb[20].mxu1  ;;  %2239 = vmatprep.mubr.bf16.mxu0 %v2057_v51  ;;  %2279 = vmatprep.mubr.bf16.mxu1 %v2059_v7  ;;  %v1889_v7 = vld [vmem:[%s4301_s9 + $0x2c8] sm:$0xff] }
 0x88c   : > { %v1574_v4 = vpop.f32.mrb[17].mxu0  ;;  %v1615_v5 = vpop.f32.mrb[21].mxu1  ;;  %2240 = vmatmul.mubr.bf16.vlgmr.msra.gmra.mrb[28].mxu0 %v2056_v56  ;;  %2280 = vmatmul.mubr.bf16.vlgmr.msra.gmra.mrb[32].mxu1 %v2058_v57 }
 0x88d   : > { %v1575_v8 = vadd.f32 %v1574_v4, %v1396_v14  ;;  %v1616_v18 = vadd.f32 %v1615_v5, %v1404_v52  ;;  %2716 = vmatpush3.bf16.msra.mxu0 %v2104_v50  ;;  %2738 = vmatpush3.bf16.msra.mxu1 %v2120_v53  ;;  %v1576_v20 = vpop.f32.mrb[18].mxu0  ;;  %v1617_v21 = vpop.f32.mrb[22].mxu1  ;;  %v1888_v14 = vld [vmem:[%s4301_s9 + $0x2c0] sm:$0xff]  ;;  %v1921_v53 = vld [vmem:[%s4301_s9 + $0x3c8] sm:$0xff] }
 0x88e   : > { %v1577_v24 = vpop.f32.mrb[19].mxu0  ;;  %v1618_v25 = vpop.f32.mrb[23].mxu1  ;;  %2717 = vmatprep.subr.bf16.mxu0 %v2113_v58  ;;  %2739 = vmatprep.subr.bf16.mxu1 %v2129_v59  ;;  %v1920_v52 = vld [vmem:[%s4301_s9 + $0x3c0] sm:$0xff]  ;;  %v2116_v5 = vpack.c.bf16 %v1889_v7, %v1888_v14  ;;  %v1890_v20 = vld [vmem:[%s4301_s9 + $0x2d0] sm:$0xff]  ;;  %v1891_v21 = vld [vmem:[%s4301_s9 + $0x2d8] sm:$0xff] }
 0x88f   : > { %v1789_v32 = vmax.f32 %v1575_v8, 0.0  ;;  %v1791_v35 = vmax.f32 %v1616_v18, 0.0  ;;  %v1904_v8 = vld [vmem:[%s4301_s9 + $0x340] sm:$0xff]  ;;  %v1905_v18 = vld [vmem:[%s4301_s9 + $0x348] sm:$0xff]  ;;  %v2108_v24 = vpack.c.bf16 %v1873_v0, %v1872_v62  ;;  %v2117_v29 = vpack.c.bf16 %v1891_v21, %v1890_v20 }
 0x890   : > { %v2124_v25 = vpack.c.bf16 %v1905_v18, %v1904_v8  ;;  %v1908_v14 = vld [vmem:[%s4301_s9 + $0x360] sm:$0xff]  ;;  %v1420_v62 = vrot.slane %v3616_v10, %v1387_v17  ;;  %v1910_v8 = vld [vmem:[%s4301_s9 + $0x370] sm:$0xff]  ;;  %v1911_v18 = vld [vmem:[%s4301_s9 + $0x378] sm:$0xff] }
 0x891   : > { %v2061_v43 = vpack.c.bf16 %v1789_v32, %v1789_v32  ;;  %v2063_v44 = vpack.c.bf16 %v1791_v35, %v1791_v35  ;;  %2718 = vmatpush3.bf16.msra.mxu0 %v2105_v6  ;;  %2740 = vmatpush3.bf16.msra.mxu1 %v2121_v3  ;;  %v2132_v6 = vpack.c.bf16 %v1921_v53, %v1920_v52  ;;  %v1922_v3 = vld [vmem:[%s4301_s9 + $0x3d0] sm:$0xff]  ;;  %v1907_v32 = vld [vmem:[%s4301_s9 + $0x358] sm:$0xff]  ;;  %v1892_v35 = vld [vmem:[%s4301_s9 + $0x2e0] sm:$0xff] }
 0x892   : > { %2719 = vmatprep.subr.bf16.mxu0 %v2114_v26  ;;  %2741 = vmatprep.subr.bf16.mxu1 %v2130_v27  ;;  %v1874_v26 = vld [vmem:[%s4301_s9 + $0x250] sm:$0xff]  ;;  %v1875_v27 = vld [vmem:[%s4301_s9 + $0x258] sm:$0xff]  ;;  %v2133_v30 = vpack.c.bf16 %v1923_v22, %v1922_v3  ;;  %v2125_v13 = vpack.c.bf16 %v1907_v32, %v1906_v31  ;;  %v2118_v52 = vpack.c.bf16 %v1893_v39, %v1892_v35  ;;  %v1944_v20 = vld [vmem:[%s4301_s9 + $0x480] sm:$0xff] }
 0x893   : > { %v1654_v50 = vpop.f32.mrb[20].mxu0  ;;  %v1695_v51 = vpop.f32.mrb[24].mxu1  ;;  %2319 = vmatprep.mubr.bf16.mxu0 %v2061_v43  ;;  %2359 = vmatprep.mubr.bf16.mxu1 %v2063_v44  ;;  %v1977_v3 = vld [vmem:[%s4301_s9 + $0x588] sm:$0xff]  ;;  %v1946_v35 = vld [vmem:[%s4301_s9 + $0x490] sm:$0xff] }
 0x894   : > { %v3758_v54 = vadd.f32 %v1654_v50, %v1408_v41  ;;  %v3760_v55 = vadd.f32 %v1695_v51, %v1416_v42  ;;  %v3762_v56 = vpop.f32.mrb[21].mxu0  ;;  %v3764_v57 = vpop.f32.mrb[25].mxu1  ;;  %v1924_v41 = vld [vmem:[%s4301_s9 + $0x3e0] sm:$0xff]  ;;  %v1925_v42 = vld [vmem:[%s4301_s9 + $0x3e8] sm:$0xff]  ;;  %v1400_v50 = vrot.slane %v3628_v15, %v1399_v9  ;;  %v1412_v9 = vrot.slane %v3616_v10, %v1379_v16  ;;  %v1926_v15 = vld [vmem:[%s4301_s9 + $0x3f0] sm:$0xff] }
 0x895   : > { %2720 = vmatpush3.bf16.msra.mxu0 %v2106_v36  ;;  %2742 = vmatpush3.bf16.msra.mxu1 %v2122_v45  ;;  %v1658_v58 = vpop.f32.mrb[22].mxu0  ;;  %v1699_v59 = vpop.f32.mrb[26].mxu1  ;;  %v2134_v53 = vpack.c.bf16 %v1925_v42, %v1924_v41  ;;  %v1878_v16 = vld [vmem:[%s4301_s9 + $0x270] sm:$0xff]  ;;  %v1698_v22 = vadd.f32 %v3764_v57, %v1420_v62  ;;  %v1960_v57 = vld [vmem:[%s4301_s9 + $0x500] sm:$0xff]  ;;  %v1961_v32 = vld [vmem:[%s4301_s9 + $0x508] sm:$0xff] }
 0x896   : > { %v1659_v2 = vpop.f32.mrb[23].mxu0  ;;  %v1700_v4 = vpop.f32.mrb[27].mxu1  ;;  %2721 = vmatprep.subr.bf16.mxu0 %v2115_v12  ;;  %2743 = vmatprep.subr.bf16.mxu1 %v2131_v48  ;;  %v2109_v48 = vpack.c.bf16 %v1875_v27, %v1874_v26  ;;  %v1909_v58 = vld [vmem:[%s4301_s9 + $0x368] sm:$0xff]  ;;  %v1894_v59 = vld [vmem:[%s4301_s9 + $0x2f0] sm:$0xff]  ;;  %v1657_v21 = vadd.f32 %v3762_v56, %v1412_v9  ;;  %v1979_v41 = vld [vmem:[%s4301_s9 + $0x598] sm:$0xff] }
 0x897   : > { %v2126_v1 = vpack.c.bf16 %v1909_v58, %v1908_v14  ;;  %v1879_v4 = vld [vmem:[%s4301_s9 + $0x278] sm:$0xff]  ;;  %v1978_v39 = vld [vmem:[%s4301_s9 + $0x590] sm:$0xff]  ;;  %v1980_v58 = vld [vmem:[%s4301_s9 + $0x5a0] sm:$0xff] }
 0x898   : > { %v1793_v31 = vmax.f32 %v1657_v21, 0.0  ;;  %v1933_v62 = vld [vmem:[%s4301_s9 + $0x428] sm:$0xff]  ;;  %v1935_v21 = vld [vmem:[%s4301_s9 + $0x438] sm:$0xff] }
 0x899   : > { %2722 = vmatpush3.bf16.msra.mxu0 %v2107_v60  ;;  %2744 = vmatpush3.bf16.msra.mxu1 %v2123_v61  ;;  %v1895_v60 = vld [vmem:[%s4301_s9 + $0x2f8] sm:$0xff] }
 0x89a   : > { %2723 = vmatprep.subr.bf16.mxu0 %v2116_v5  ;;  %2745 = vmatprep.subr.bf16.mxu1 %v2132_v6  ;;  %v1927_v61 = vld [vmem:[%s4301_s9 + $0x3f8] sm:$0xff]  ;;  %v2119_v2 = vpack.c.bf16 %v1895_v60, %v1894_v59  ;;  %v1573_v5 = vadd.f32 %v3691_v63, %v1392_v46  ;;  %v1614_v6 = vadd.f32 %v3693_v40, %v1400_v50  ;;  %v1945_v63 = vld [vmem:[%s4301_s9 + $0x488] sm:$0xff]  ;;  %v1976_v40 = vld [vmem:[%s4301_s9 + $0x580] sm:$0xff] }
 0x89b   : > { %v1736_v37 = vpop.f32.mrb[24].mxu0  ;;  %v1777_v38 = vpop.f32.mrb[28].mxu1  ;;  %v2135_v17 = vpack.c.bf16 %v1927_v61, %v1926_v15  ;;  %v2144_v26 = vpack.c.bf16 %v1945_v63, %v1944_v20  ;;  %v2160_v27 = vpack.c.bf16 %v1977_v3, %v1976_v40  ;;  %v2161_v50 = vpack.c.bf16 %v1979_v41, %v1978_v39  ;;  %v1981_v59 = vld [vmem:[%s4301_s9 + $0x5a8] sm:$0xff]  ;;  %v1932_v61 = vld [vmem:[%s4301_s9 + $0x420] sm:$0xff]  ;;  %v1934_v20 = vld [vmem:[%s4301_s9 + $0x430] sm:$0xff] }
 0x89c   : > { %v3816_v36 = vadd.f32 %v1736_v37, %v1424_v23  ;;  %v3819_v43 = vadd.f32 %v1777_v38, %v3621_v11  ;;  %v3821_v44 = vpop.f32.mrb[25].mxu0  ;;  %v3823_v45 = vpop.f32.mrb[29].mxu1  ;;  %v1877_v11 = vld [vmem:[%s4301_s9 + $0x268] sm:$0xff]  ;;  %v2111_v23 = vpack.c.bf16 %v1879_v4, %v1878_v16  ;;  %v1790_v56 = vmax.f32 %v1614_v6, 0.0  ;;  %v1947_v38 = vld [vmem:[%s4301_s9 + $0x498] sm:$0xff]  ;;  %v1950_v16 = vld [vmem:[%s4301_s9 + $0x4b0] sm:$0xff] }
 0x89d   : > { %2724 = vmatpush3.bf16.msra.mxu0 %v2108_v24  ;;  %2746 = vmatpush3.bf16.msra.mxu1 %v2124_v25  ;;  %v1740_v47 = vpop.f32.mrb[26].mxu0  ;;  %v1781_v12 = vpop.f32.mrb[30].mxu1  ;;  %v2110_v0 = vpack.c.bf16 %v1877_v11, %v1876_v49  ;;  %v2127_v24 = vpack.c.bf16 %v1911_v18, %v1910_v8  ;;  %v1788_v25 = vmax.f32 %v1573_v5, 0.0  ;;  %v1795_v37 = vmax.f32 %v1698_v22, 0.0  ;;  %v1962_v49 = vld [vmem:[%s4301_s9 + $0x510] sm:$0xff]  ;;  %v1951_v4 = vld [vmem:[%s4301_s9 + $0x4b8] sm:$0xff] }
 0x89e   : > { %v1741_v51 = vpop.f32.mrb[27].mxu0  ;;  %v1782_v7 = vpop.f32.mrb[31].mxu1  ;;  %2725 = vmatprep.subr.bf16.mxu0 %v2117_v29  ;;  %2747 = vmatprep.subr.bf16.mxu1 %v2133_v30  ;;  %v1928_v29 = vld [vmem:[%s4301_s9 + $0x400] sm:$0xff]  ;;  %v1929_v30 = vld [vmem:[%s4301_s9 + $0x408] sm:$0xff]  ;;  %v2062_v47 = vpack.c.bf16 %v1790_v56, %v1790_v56  ;;  %v2152_v12 = vpack.c.bf16 %v1961_v32, %v1960_v57  ;;  %v2065_v11 = vpack.c.bf16 %v1793_v31, %v1793_v31  ;;  %v1982_v5 = vld [vmem:[%s4301_s9 + $0x5b0] sm:$0xff] }
 0x89f   : > { %v2136_v42 = vpack.c.bf16 %v1929_v30, %v1928_v29  ;;  %v2060_v46 = vpack.c.bf16 %v1788_v25, %v1788_v25  ;;  %v2145_v14 = vpack.c.bf16 %v1947_v38, %v1946_v35  ;;  %v1963_v51 = vld [vmem:[%s4301_s9 + $0x518] sm:$0xff]  ;;  %v1948_v7 = vld [vmem:[%s4301_s9 + $0x4a0] sm:$0xff]  ;;  %v2147_v18 = vpack.c.bf16 %v1951_v4, %v1950_v16  ;;  %v1966_v63 = vld [vmem:[%s4301_s9 + $0x530] sm:$0xff] }
 0x8a0   : > { %v2153_v9 = vpack.c.bf16 %v1963_v51, %v1962_v49  ;;  %v1983_v6 = vld [vmem:[%s4301_s9 + $0x5b8] sm:$0xff]  ;;  %v1952_v22 = vld [vmem:[%s4301_s9 + $0x4c0] sm:$0xff]  ;;  %v1985_v25 = vld [vmem:[%s4301_s9 + $0x5c8] sm:$0xff]  ;;  %v2139_v56 = vpack.c.bf16 %v1935_v21, %v1934_v20  ;;  %v1436_v16 = vrot.slane %v3616_v10, %v1403_v33 }
 0x8a1   : > { %2726 = vmatpush3.bf16.msra.mxu0 %v2109_v48  ;;  %2748 = vmatpush3.bf16.msra.mxu1 %v2125_v13  ;;  %v1930_v48 = vld [vmem:[%s4301_s9 + $0x410] sm:$0xff]  ;;  %v1931_v13 = vld [vmem:[%s4301_s9 + $0x418] sm:$0xff]  ;;  %v2163_v40 = vpack.c.bf16 %v1983_v6, %v1982_v5  ;;  %v1936_v29 = vld [vmem:[%s4301_s9 + $0x440] sm:$0xff] }
 0x8a2   : > { %2727 = vmatprep.subr.bf16.mxu0 %v2118_v52  ;;  %2749 = vmatprep.subr.bf16.mxu1 %v2134_v53  ;;  %v1949_v52 = vld [vmem:[%s4301_s9 + $0x4a8] sm:$0xff]  ;;  %v2067_v53 = vpack.c.bf16 %v1795_v37, %v1795_v37  ;;  %v2137_v60 = vpack.c.bf16 %v1931_v13, %v1930_v48  ;;  %v1967_v3 = vld [vmem:[%s4301_s9 + $0x538] sm:$0xff]  ;;  %v1968_v31 = vld [vmem:[%s4301_s9 + $0x540] sm:$0xff] }
 0x8a3   : > { %v2146_v15 = vpack.c.bf16 %v1949_v52, %v1948_v7  ;;  %v1937_v30 = vld [vmem:[%s4301_s9 + $0x448] sm:$0xff]  ;;  %v1954_v35 = vld [vmem:[%s4301_s9 + $0x4d0] sm:$0xff]  ;;  %v1955_v37 = vld [vmem:[%s4301_s9 + $0x4d8] sm:$0xff] }
 0x8a4   : > { %v1969_v32 = vld [vmem:[%s4301_s9 + $0x548] sm:$0xff]  ;;  %v1986_v38 = vld [vmem:[%s4301_s9 + $0x5d0] sm:$0xff]  ;;  %v1987_v39 = vld [vmem:[%s4301_s9 + $0x5d8] sm:$0xff]  ;;  %v2140_v41 = vpack.c.bf16 %v1937_v30, %v1936_v29 }
 0x8a5   : > { %2728 = vmatpush3.bf16.msra.mxu0 %v2110_v0  ;;  %2750 = vmatpush3.bf16.msra.mxu1 %v2126_v1  ;;  %v1964_v0 = vld [vmem:[%s4301_s9 + $0x520] sm:$0xff]  ;;  %v2162_v1 = vpack.c.bf16 %v1981_v59, %v1980_v58  ;;  %v1970_v48 = vld [vmem:[%s4301_s9 + $0x550] sm:$0xff]  ;;  %v2165_v13 = vpack.c.bf16 %v1987_v39, %v1986_v38  ;;  %v1971_v49 = vld [vmem:[%s4301_s9 + $0x558] sm:$0xff] }
 0x8a6   : > { %2729 = vmatprep.subr.bf16.mxu0 %v2119_v2  ;;  %2751 = vmatprep.subr.bf16.mxu1 %v2135_v17  ;;  %v1965_v2 = vld [vmem:[%s4301_s9 + $0x528] sm:$0xff]  ;;  %v2138_v17 = vpack.c.bf16 %v1933_v62, %v1932_v61  ;;  %v2157_v52 = vpack.c.bf16 %v1971_v49, %v1970_v48  ;;  %v1940_v58 = vld [vmem:[%s4301_s9 + $0x460] sm:$0xff]  ;;  %v1958_v61 = vld [vmem:[%s4301_s9 + $0x4f0] sm:$0xff] }
 0x8a7   : > { %v2154_v8 = vpack.c.bf16 %v1965_v2, %v1964_v0  ;;  %v1989_v51 = vld [vmem:[%s4301_s9 + $0x5e8] sm:$0xff]  ;;  %v1959_v62 = vld [vmem:[%s4301_s9 + $0x4f8] sm:$0xff]  ;;  %v1428_v0 = vrot.slane %v3616_v10, %v1395_v28  ;;  %v1942_v28 = vld [vmem:[%s4301_s9 + $0x470] sm:$0xff] }
 0x8a8   : > { %v1941_v59 = vld [vmem:[%s4301_s9 + $0x468] sm:$0xff]  ;;  %v1991_v2 = vld [vmem:[%s4301_s9 + $0x5f8] sm:$0xff]  ;;  %v2151_v6 = vpack.c.bf16 %v1959_v62, %v1958_v61  ;;  %v2040_v21 = vld [vmem:[%s4301_s9 + $0x780] sm:$0xff] }
 0x8a9   : > { %2730 = vmatpush3.bf16.msra.mxu0 %v2111_v23  ;;  %2752 = vmatpush3.bf16.msra.mxu1 %v2127_v24  ;;  %v1953_v23 = vld [vmem:[%s4301_s9 + $0x4c8] sm:$0xff]  ;;  %v1984_v24 = vld [vmem:[%s4301_s9 + $0x5c0] sm:$0xff]  ;;  %v2142_v4 = vpack.c.bf16 %v1941_v59, %v1940_v58  ;;  %v1975_v33 = vld [vmem:[%s4301_s9 + $0x578] sm:$0xff]  ;;  %v1739_v20 = vadd.f32 %v3821_v44, %v1428_v0 }
 0x8aa   : > { %2759 = vmatprep.subr.bf16.mxu0 %v2144_v26  ;;  %2781 = vmatprep.subr.bf16.mxu1 %v2160_v27  ;;  %v2155_v26 = vpack.c.bf16 %v1967_v3, %v1966_v63  ;;  %v2148_v27 = vpack.c.bf16 %v1953_v23, %v1952_v22  ;;  %v2164_v57 = vpack.c.bf16 %v1985_v25, %v1984_v24  ;;  %v2041_v63 = vld [vmem:[%s4301_s9 + $0x788] sm:$0xff]  ;;  %v1792_v22 = vmax.f32 %v3758_v54, 0.0  ;;  %v1992_v44 = vld [vmem:[%s4301_s9 + $0x600] sm:$0xff]  ;;  %v2010_v29 = vld [vmem:[%s4301_s9 + $0x690] sm:$0xff] }
 0x8ab   : > { %v2159_v23 = vpack.c.bf16 %v1975_v33, %v1974_v19  ;;  %v1993_v25 = vld [vmem:[%s4301_s9 + $0x608] sm:$0xff]  ;;  %v2024_v54 = vld [vmem:[%s4301_s9 + $0x700] sm:$0xff]  ;;  %v2011_v30 = vld [vmem:[%s4301_s9 + $0x698] sm:$0xff] }
 0x8ac   : > { %2320 = vmatmul.mubr.bf16.vlgmr.msra.gmra.mrb[32].mxu0 %v2060_v46  ;;  %2360 = vmatmul.mubr.bf16.vlgmr.msra.gmra.mrb[36].mxu1 %v2062_v47  ;;  %v2149_v46 = vpack.c.bf16 %v1955_v37, %v1954_v35  ;;  %v1938_v47 = vld [vmem:[%s4301_s9 + $0x450] sm:$0xff]  ;;  %v2064_v35 = vpack.c.bf16 %v1792_v22, %v1792_v22  ;;  %v1995_v39 = vld [vmem:[%s4301_s9 + $0x618] sm:$0xff]  ;;  %v2013_v48 = vld [vmem:[%s4301_s9 + $0x6a8] sm:$0xff] }
 0x8ad   : > { %2760 = vmatpush3.bf16.msra.mxu0 %v2136_v42  ;;  %2399 = vmatprep.mubr.bf16.mxu0 %v2065_v11  ;;  %v2156_v42 = vpack.c.bf16 %v1969_v32, %v1968_v31  ;;  %v1956_v11 = vld [vmem:[%s4301_s9 + $0x4e0] sm:$0xff]  ;;  %v2168_v31 = vpack.c.bf16 %v1993_v25, %v1992_v44  ;;  %v2043_v32 = vld [vmem:[%s4301_s9 + $0x798] sm:$0xff]  ;;  %v1994_v38 = vld [vmem:[%s4301_s9 + $0x610] sm:$0xff] }
 0x8ae   : > { %2782 = vmatpush3.bf16.msra.mxu1 %v2152_v12  ;;  %2439 = vmatprep.mubr.bf16.mxu1 %v2067_v53  ;;  %v1939_v12 = vld [vmem:[%s4301_s9 + $0x458] sm:$0xff]  ;;  %v1997_v58 = vld [vmem:[%s4301_s9 + $0x628] sm:$0xff]  ;;  %v2028_v59 = vld [vmem:[%s4301_s9 + $0x720] sm:$0xff] }
 0x8af   : > { %2761 = vmatprep.subr.bf16.mxu0 %v2145_v14  ;;  %2783 = vmatprep.subr.bf16.mxu1 %v2161_v50  ;;  %v1957_v14 = vld [vmem:[%s4301_s9 + $0x4e8] sm:$0xff]  ;;  %v1988_v50 = vld [vmem:[%s4301_s9 + $0x5e0] sm:$0xff]  ;;  %v2141_v7 = vpack.c.bf16 %v1939_v12, %v1938_v47  ;;  %v2027_v47 = vld [vmem:[%s4301_s9 + $0x718] sm:$0xff] }
 0x8b0   : > { %v2150_v53 = vpack.c.bf16 %v1957_v14, %v1956_v11  ;;  %v2012_v12 = vld [vmem:[%s4301_s9 + $0x6a0] sm:$0xff]  ;;  %v2045_v14 = vld [vmem:[%s4301_s9 + $0x7a8] sm:$0xff]  ;;  %v2015_v61 = vld [vmem:[%s4301_s9 + $0x6b8] sm:$0xff] }
 0x8b1   : > { %2762 = vmatpush3.bf16.msra.mxu0 %v2137_v60  ;;  %v1972_v60 = vld [vmem:[%s4301_s9 + $0x560] sm:$0xff]  ;;  %v2046_v62 = vld [vmem:[%s4301_s9 + $0x7b0] sm:$0xff]  ;;  %v2047_v0 = vld [vmem:[%s4301_s9 + $0x7b8] sm:$0xff] }
 0x8b2   : > { %2784 = vmatpush3.bf16.msra.mxu1 %v2153_v9  ;;  %2763 = vmatprep.subr.bf16.mxu0 %v2146_v15  ;;  %v2166_v9 = vpack.c.bf16 %v1989_v51, %v1988_v50  ;;  %v1973_v15 = vld [vmem:[%s4301_s9 + $0x568] sm:$0xff]  ;;  %v2044_v11 = vld [vmem:[%s4301_s9 + $0x7a0] sm:$0xff]  ;;  %v2169_v51 = vpack.c.bf16 %v1995_v39, %v1994_v38  ;;  %v2019_v44 = vld [vmem:[%s4301_s9 + $0x6d8] sm:$0xff] }
 0x8b3   : > { %2785 = vmatprep.subr.bf16.mxu1 %v2162_v1  ;;  %v1990_v1 = vld [vmem:[%s4301_s9 + $0x5f0] sm:$0xff]  ;;  %v2158_v5 = vpack.c.bf16 %v1973_v15, %v1972_v60  ;;  %v2194_v60 = vpack.c.bf16 %v2045_v14, %v2044_v11  ;;  %v2016_v19 = vld [vmem:[%s4301_s9 + $0x6c0] sm:$0xff]  ;;  %v2055_v14 = vld [vmem:[%s4301_s9 + $0x7f8] sm:$0xff] }
 0x8b4   : > { %v2167_v10 = vpack.c.bf16 %v1991_v2, %v1990_v1  ;;  %v2014_v15 = vld [vmem:[%s4301_s9 + $0x6b0] sm:$0xff]  ;;  %v2048_v33 = vld [vmem:[%s4301_s9 + $0x7c0] sm:$0xff] }
 0x8b5   : > { %2764 = vmatpush3.bf16.msra.mxu0 %v2138_v17  ;;  %v1943_v17 = vld [vmem:[%s4301_s9 + $0x478] sm:$0xff]  ;;  %v2050_v25 = vld [vmem:[%s4301_s9 + $0x7d0] sm:$0xff] }
 0x8b6   : > { %2786 = vmatpush3.bf16.msra.mxu1 %v2154_v8  ;;  %2765 = vmatprep.subr.bf16.mxu0 %v2147_v18  ;;  %v2008_v8 = vld [vmem:[%s4301_s9 + $0x680] sm:$0xff]  ;;  %v2009_v18 = vld [vmem:[%s4301_s9 + $0x688] sm:$0xff]  ;;  %v2143_v3 = vpack.c.bf16 %v1943_v17, %v1942_v28  ;;  %v2195_v28 = vpack.c.bf16 %v2047_v0, %v2046_v62  ;;  %v2031_v17 = vld [vmem:[%s4301_s9 + $0x738] sm:$0xff]  ;;  %v1798_v62 = vmax.f32 %v3819_v43, 0.0 }
 0x8b7   : > { %2787 = vmatprep.subr.bf16.mxu1 %v2163_v40  ;;  %v1780_v40 = vadd.f32 %v3823_v45, %v1436_v16  ;;  %v2176_v24 = vpack.c.bf16 %v2009_v18, %v2008_v8  ;;  %v2192_v45 = vpack.c.bf16 %v2041_v63, %v2040_v21  ;;  %v2179_v16 = vpack.c.bf16 %v2015_v61, %v2014_v15  ;;  %v2049_v8 = vld [vmem:[%s4301_s9 + $0x7c8] sm:$0xff]  ;;  %v2000_v63 = vld [vmem:[%s4301_s9 + $0x640] sm:$0xff]  ;;  %v2054_v11 = vld [vmem:[%s4301_s9 + $0x7f0] sm:$0xff] }
 0x8b8   : > { %v2196_v22 = vpack.c.bf16 %v2049_v8, %v2048_v33  ;;  %v1796_v15 = vmax.f32 %v3816_v36, 0.0 }
 0x8b9   : > { %2766 = vmatpush3.bf16.msra.mxu0 %v2139_v56  ;;  %v1794_v56 = vmax.f32 %v3760_v55, 0.0  ;;  %v1799_v55 = vmax.f32 %v1780_v40, 0.0  ;;  %v2001_v40 = vld [vmem:[%s4301_s9 + $0x648] sm:$0xff] }
 0x8ba   : > { %2788 = vmatpush3.bf16.msra.mxu1 %v2155_v26  ;;  %2767 = vmatprep.subr.bf16.mxu0 %v2148_v27  ;;  %v2025_v26 = vld [vmem:[%s4301_s9 + $0x708] sm:$0xff]  ;;  %v1797_v27 = vmax.f32 %v1739_v20, 0.0  ;;  %v2068_v0 = vpack.c.bf16 %v1796_v15, %v1796_v15 }
 0x8bb   : > { %2789 = vmatprep.subr.bf16.mxu1 %v2164_v57  ;;  %v2042_v57 = vld [vmem:[%s4301_s9 + $0x790] sm:$0xff]  ;;  %v2184_v37 = vpack.c.bf16 %v2025_v26, %v2024_v54  ;;  %v2071_v50 = vpack.c.bf16 %v1799_v55, %v1799_v55 }
 0x8bc   : > { %v2193_v49 = vpack.c.bf16 %v2043_v32, %v2042_v57  ;;  %v2020_v57 = vld [vmem:[%s4301_s9 + $0x6e0] sm:$0xff]  ;;  %v2021_v32 = vld [vmem:[%s4301_s9 + $0x6e8] sm:$0xff] }
 0x8bd   : > { %2768 = vmatpush3.bf16.msra.mxu0 %v2140_v41  ;;  %v2026_v41 = vld [vmem:[%s4301_s9 + $0x710] sm:$0xff] }
 0x8be   : > { %2790 = vmatpush3.bf16.msra.mxu1 %v2156_v42  ;;  %2769 = vmatprep.subr.bf16.mxu0 %v2149_v46  ;;  %v2066_v42 = vpack.c.bf16 %v1794_v56, %v1794_v56  ;;  %v2177_v46 = vpack.c.bf16 %v2011_v30, %v2010_v29  ;;  %v2051_v56 = vld [vmem:[%s4301_s9 + $0x7d8] sm:$0xff]  ;;  %v2034_v30 = vld [vmem:[%s4301_s9 + $0x750] sm:$0xff] }
 0x8bf   : > { %2791 = vmatprep.subr.bf16.mxu1 %v2165_v13  ;;  %v2069_v13 = vpack.c.bf16 %v1797_v27, %v1797_v27  ;;  %v2002_v27 = vld [vmem:[%s4301_s9 + $0x650] sm:$0xff]  ;;  %v2003_v29 = vld [vmem:[%s4301_s9 + $0x658] sm:$0xff]  ;;  %v2197_v55 = vpack.c.bf16 %v2051_v56, %v2050_v25 }
 0x8c0   : > { %v2173_v38 = vpack.c.bf16 %v2003_v29, %v2002_v27 }
 0x8c1   : > { %2770 = vmatpush3.bf16.msra.mxu0 %v2141_v7  ;;  %v2185_v7 = vpack.c.bf16 %v2027_v47, %v2026_v41  ;;  %v2182_v41 = vpack.c.bf16 %v2021_v32, %v2020_v57  ;;  %v2036_v47 = vld [vmem:[%s4301_s9 + $0x760] sm:$0xff] }
 0x8c2   : > { %2792 = vmatpush3.bf16.msra.mxu1 %v2157_v52  ;;  %2771 = vmatprep.subr.bf16.mxu0 %v2150_v53  ;;  %v2178_v52 = vpack.c.bf16 %v2013_v48, %v2012_v12  ;;  %v1996_v53 = vld [vmem:[%s4301_s9 + $0x620] sm:$0xff]  ;;  %v2037_v48 = vld [vmem:[%s4301_s9 + $0x768] sm:$0xff] }
 0x8c3   : > { %2793 = vmatprep.subr.bf16.mxu1 %v2166_v9  ;;  %v2029_v9 = vld [vmem:[%s4301_s9 + $0x728] sm:$0xff]  ;;  %v2170_v1 = vpack.c.bf16 %v1997_v58, %v1996_v53  ;;  %v2007_v53 = vld [vmem:[%s4301_s9 + $0x678] sm:$0xff]  ;;  %v2199_v58 = vpack.c.bf16 %v2055_v14, %v2054_v11 }
 0x8c4   : > { %v2186_v2 = vpack.c.bf16 %v2029_v9, %v2028_v59  ;;  %v2038_v59 = vld [vmem:[%s4301_s9 + $0x770] sm:$0xff] }
 0x8c5   : > { %2772 = vmatpush3.bf16.msra.mxu0 %v2142_v4  ;;  %v1998_v4 = vld [vmem:[%s4301_s9 + $0x630] sm:$0xff] }
 0x8c6   : > { %2794 = vmatpush3.bf16.msra.mxu1 %v2158_v5  ;;  %2773 = vmatprep.subr.bf16.mxu0 %v2151_v6  ;;  %v1999_v5 = vld [vmem:[%s4301_s9 + $0x638] sm:$0xff]  ;;  %v2030_v6 = vld [vmem:[%s4301_s9 + $0x730] sm:$0xff] }
 0x8c7   : > { %2795 = vmatprep.subr.bf16.mxu1 %v2167_v10  ;;  %v2017_v10 = vld [vmem:[%s4301_s9 + $0x6c8] sm:$0xff]  ;;  %v2171_v18 = vpack.c.bf16 %v1999_v5, %v1998_v4  ;;  %v2187_v20 = vpack.c.bf16 %v2031_v17, %v2030_v6  ;;  %v2644_v4 = vld [vmem:[%s4302_s10] ss:$0 sm:$0xff] }
 0x8c8   : > { %v2180_v21 = vpack.c.bf16 %v2017_v10, %v2016_v19 }
 0x8c9   : > { %2774 = vmatpush3.bf16.msra.mxu0 %v2143_v3  ;;  %v2032_v3 = vld [vmem:[%s4301_s9 + $0x740] sm:$0xff] }
 0x8ca   : > { %2796 = vmatpush3.bf16.msra.mxu1 %v2159_v23  ;;  %2803 = vmatprep.subr.bf16.mxu0 %v2176_v24  ;;  %v2033_v23 = vld [vmem:[%s4301_s9 + $0x748] sm:$0xff]  ;;  %v2018_v24 = vld [vmem:[%s4301_s9 + $0x6d0] sm:$0xff] }
 0x8cb   : > { %2825 = vmatprep.subr.bf16.mxu1 %v2192_v45  ;;  %v2172_v45 = vpack.c.bf16 %v2001_v40, %v2000_v63  ;;  %v2188_v54 = vpack.c.bf16 %v2033_v23, %v2032_v3  ;;  %v2181_v26 = vpack.c.bf16 %v2019_v44, %v2018_v24 }
 0x8cc   : > { %2400 = vmatmul.mubr.bf16.vlgmr.msra.gmra.mrb[36].mxu0 %v2064_v35  ;;  %v2052_v35 = vld [vmem:[%s4301_s9 + $0x7e0] sm:$0xff] }
 0x8cd   : > { %2440 = vmatmul.mubr.bf16.vlgmr.msra.gmra.mrb[40].mxu1 %v2066_v42  ;;  %2804 = vmatpush3.bf16.msra.mxu0 %v2168_v31  ;;  %v2035_v31 = vld [vmem:[%s4301_s9 + $0x758] sm:$0xff]  ;;  %v2004_v42 = vld [vmem:[%s4301_s9 + $0x660] sm:$0xff] }
 0x8ce   : > { %2479 = vmatprep.mubr.bf16.mxu0 %v2069_v13  ;;  %2826 = vmatpush3.bf16.msra.mxu1 %v2184_v37  ;;  %v2053_v37 = vld [vmem:[%s4301_s9 + $0x7e8] sm:$0xff]  ;;  %v2189_v39 = vpack.c.bf16 %v2035_v31, %v2034_v30  ;;  %v2022_v13 = vld [vmem:[%s4301_s9 + $0x6f0] sm:$0xff] }
 0x8cf   : > { %2519 = vmatprep.mubr.bf16.mxu1 %v2071_v50  ;;  %2805 = vmatprep.subr.bf16.mxu0 %v2177_v46  ;;  %v2005_v46 = vld [vmem:[%s4301_s9 + $0x668] sm:$0xff]  ;;  %v2198_v12 = vpack.c.bf16 %v2053_v37, %v2052_v35 }
 0x8d0   : > { %2827 = vmatprep.subr.bf16.mxu1 %v2193_v49  ;;  %v2023_v49 = vld [vmem:[%s4301_s9 + $0x6f8] sm:$0xff]  ;;  %v2174_v50 = vpack.c.bf16 %v2005_v46, %v2004_v42 }
 0x8d1   : > { %2806 = vmatpush3.bf16.msra.mxu0 %v2169_v51  ;;  %v2190_v51 = vpack.c.bf16 %v2037_v48, %v2036_v47 }
 0x8d2   : > { %2828 = vmatpush3.bf16.msra.mxu1 %v2185_v7  ;;  %2807 = vmatprep.subr.bf16.mxu0 %v2178_v52  ;;  %v2183_v7 = vpack.c.bf16 %v2023_v49, %v2022_v13  ;;  %v2006_v52 = vld [vmem:[%s4301_s9 + $0x670] sm:$0xff] }
 0x8d3   : > { %2829 = vmatprep.subr.bf16.mxu1 %v2194_v60  ;;  %v2039_v60 = vld [vmem:[%s4301_s9 + $0x778] sm:$0xff]  ;;  %v2175_v9 = vpack.c.bf16 %v2007_v53, %v2006_v52 }
 0x8d4   : > { %v2191_v61 = vpack.c.bf16 %v2039_v60, %v2038_v59 }
 0x8d5   : > { %2808 = vmatpush3.bf16.msra.mxu0 %v2170_v1  ;;  %v2070_v1 = vpack.c.bf16 %v1798_v62, %v1798_v62 }
 0x8d6   : > { %2830 = vmatpush3.bf16.msra.mxu1 %v2186_v2  ;;  %2809 = vmatprep.subr.bf16.mxu0 %v2179_v16 }
 0x8d7   : > { %2831 = vmatprep.subr.bf16.mxu1 %v2195_v28 }
 0x8d9   : > { %2810 = vmatpush3.bf16.msra.mxu0 %v2171_v18 }
 0x8da   : > { %2832 = vmatpush3.bf16.msra.mxu1 %v2187_v20  ;;  %2811 = vmatprep.subr.bf16.mxu0 %v2180_v21 }
 0x8db   : > { %2833 = vmatprep.subr.bf16.mxu1 %v2196_v22 }
 0x8dd   : > { %2812 = vmatpush3.bf16.msra.mxu0 %v2172_v45 }
 0x8de   : > { %2834 = vmatpush3.bf16.msra.mxu1 %v2188_v54  ;;  %2813 = vmatprep.subr.bf16.mxu0 %v2181_v26 }
 0x8df   : > { %2835 = vmatprep.subr.bf16.mxu1 %v2197_v55 }
 0x8e1   : > { %2814 = vmatpush3.bf16.msra.mxu0 %v2173_v38 }
 0x8e2   : > { %2836 = vmatpush3.bf16.msra.mxu1 %v2189_v39  ;;  %2815 = vmatprep.subr.bf16.mxu0 %v2182_v41 }
 0x8e3   : > { %2837 = vmatprep.subr.bf16.mxu1 %v2198_v12 }
 0x8e5   : > { %2816 = vmatpush3.bf16.msra.mxu0 %v2174_v50 }
 0x8e6   : > { %2838 = vmatpush3.bf16.msra.mxu1 %v2190_v51  ;;  %2817 = vmatprep.subr.bf16.mxu0 %v2183_v7 }
 0x8e7   : > { %2839 = vmatprep.subr.bf16.mxu1 %v2199_v58 }
 0x8e9   : > { %2818 = vmatpush3.bf16.msra.mxu0 %v2175_v9 }
 0x8ea   : > { %2840 = vmatpush3.bf16.msra.mxu1 %v2191_v61 }
 0x8ec   : > { %2480 = vmatmul.mubr.bf16.vlgmr.msra.gmra.mrb[40].mxu0 %v2068_v0  ;;  %v2646_v0 = vld [vmem:[%s4304_s12] ss:$0 sm:$0xff] }
 0x8ed   : > { %2520 = vmatmul.mubr.bf16.vlgmr.msra.gmra.mrb[44].mxu1 %v2070_v1 }
 0x95f   : > { %v2687_v2 = vpop.f32.mrb[28].mxu0  ;;  %v2709_v16 = vpop.f32.mrb[32].mxu1 }
 0x960   : > { %v2688_v5 = vpop.f32.mrb[29].mxu0  ;;  %v2710_v36 = vpop.f32.mrb[33].mxu1 }
 0x961   : > { %v2689_v6 = vadd.f32 %v2688_v5, %v2687_v2  ;;  %v2711_v28 = vadd.f32 %v2710_v36, %v2709_v16  ;;  %v2690_v17 = vpop.f32.mrb[30].mxu0  ;;  %v2712_v19 = vpop.f32.mrb[34].mxu1 }
 0x962   : > { %v2691_v43 = vpop.f32.mrb[31].mxu0  ;;  %v2713_v10 = vpop.f32.mrb[35].mxu1 }
 0x963   : > { %v2242_v33 = vadd.f32 %v2689_v6, %v2644_v4 }
 0x965   : > { %v2282_v8 = vadd.f32 %v2711_v28, %v2242_v33 }
 0x97f   : > { %v2731_v18 = vpop.f32.mrb[32].mxu0  ;;  %v2753_v20 = vpop.f32.mrb[36].mxu1 }
 0x980   : > { %v2732_v21 = vpop.f32.mrb[33].mxu0  ;;  %v2754_v63 = vpop.f32.mrb[37].mxu1 }
 0x981   : > { %v2733_v40 = vadd.f32 %v2732_v21, %v2731_v18  ;;  %v2755_v3 = vadd.f32 %v2754_v63, %v2753_v20  ;;  %v2734_v22 = vpop.f32.mrb[34].mxu0  ;;  %v2756_v23 = vpop.f32.mrb[38].mxu1 }
 0x982   : > { %v2735_v24 = vpop.f32.mrb[35].mxu0  ;;  %v2757_v44 = vpop.f32.mrb[39].mxu1 }
 0x983   : > { %v2322_v25 = vadd.f32 %v2733_v40, %v2282_v8 }
 0x985   : > { %v2362_v56 = vadd.f32 %v2755_v3, %v2322_v25 }
 0x99f   : > { %v2775_v45 = vpop.f32.mrb[36].mxu0 }
 0x9a0   : > { %v2797_v54 = vpop.f32.mrb[40].mxu1  ;;  %v2776_v26 = vpop.f32.mrb[37].mxu0 }
 0x9a1   : > { %v2777_v27 = vadd.f32 %v2776_v26, %v2775_v45  ;;  %v2798_v29 = vpop.f32.mrb[41].mxu1  ;;  %v2778_v30 = vpop.f32.mrb[38].mxu0 }
 0x9a2   : > { %v2799_v55 = vadd.f32 %v2798_v29, %v2797_v54  ;;  %v2800_v31 = vpop.f32.mrb[42].mxu1  ;;  %v2779_v57 = vpop.f32.mrb[39].mxu0 }
 0x9a3   : > { %v2402_v32 = vadd.f32 %v2777_v27, %v2362_v56  ;;  %v2801_v35 = vpop.f32.mrb[43].mxu1 }
 0x9a5   : > { %v2442_v37 = vadd.f32 %v2799_v55, %v2402_v32 }
 0x9bf   : > { %v2819_v38 = vpop.f32.mrb[40].mxu0 }
 0x9c0   : > { %v2841_v39 = vpop.f32.mrb[44].mxu1  ;;  %v2820_v41 = vpop.f32.mrb[41].mxu0 }
 0x9c1   : > { %v2821_v42 = vadd.f32 %v2820_v41, %v2819_v38  ;;  %v2842_v46 = vpop.f32.mrb[45].mxu1  ;;  %v2822_v47 = vpop.f32.mrb[42].mxu0 }
 0x9c2   : > { %v2843_v12 = vadd.f32 %v2842_v46, %v2841_v39  ;;  %v2844_v48 = vpop.f32.mrb[46].mxu1  ;;  %v2823_v13 = vpop.f32.mrb[43].mxu0 }
 0x9c3   : > { %v2482_v49 = vadd.f32 %v2821_v42, %v2442_v37  ;;  %v2845_v11 = vpop.f32.mrb[47].mxu1 }
 0x9c5   : > { %v2522_v14 = vadd.f32 %v2843_v12, %v2482_v49 }
 0x9c7   : > { %v2527_v50 = vadd.f32 %v2522_v14, %v3272_v34  ;;  %v2645_v34 = vld [vmem:[%s4303_s11] ss:$0 sm:$0xff] }
 0x9c9   : > { %v2530_v51 = vsel %vm452_vm1, %v2527_v50, 0.0 }
 0x9ca   : > { %2531 = vadd.xlane.f32.xlu0 %v2530_v51 }
 0xa57   : > { %v2532_v7 = vpop.xlane.xlu0 %2531 }
 0xa58   : > { %v2533_v52 = vmul.f32 0.03125, %v2532_v7 }
 0xa5a   : > { %v2534_v53 = vsub.f32 %v2527_v50, %v2533_v52 }
 0xa5c   : > { %v2535_v58 = vmul.f32 %v2534_v53, %v2534_v53 }
 0xa5e   : > { %v2536_v59 = vsel %vm452_vm1, %v2535_v58, 0.0 }
 0xa5f   : > { %2537 = vadd.xlane.f32.xlu0 %v2536_v59 }
 0xaec   : > { %v2538_v60 = vpop.xlane.xlu0 %2537 }
 0xaed   : > { %v2539_v9 = vmul.f32 0.03125, %v2538_v60 }
 0xaef   : > { %v2540_v15 = vadd.f32 1e-05, %v2539_v9 }
 0xaf1   : > { %2946 = vrsqrt.f32 %v2540_v15 }
 0xafb   : > { %v2947_v61 = vpop.eup %2946 }
 0xafc   : > { %v2542_v62 = vmul.f32 %v2947_v61, %v2534_v53 }
 0xafe   : > { %v2549_v1 = vmul.f32 %v2645_v34, %v2542_v62 }
 0xb00   : > { %v2556_v2 = vadd.f32 %v2646_v0, %v2549_v1 }
 0xb02   : > { %2557 = vst.msk [vmem:[%s435_s17] sm:$0xff] %vm452_vm1, %v2556_v2 }
 0xb03 PF: > { %s23_s25 = sadd.s32 1, %s2954_s25  }
 0xb04   : > { %p20_p4 = scmp.ge.s32.totalorder %s23_s25, 4  }
 0xb06   :  { %22 = sbr.rel (!%p20_p4) target bundleno = 1 (0x1), region = 102 }

// kernel: saint_forward.6
= control target key start
LH: loop header
LB: loop body
LE: loop exit
PB: predicated region body
PF: predicated region fallthrough
CT: control target
= control target key end

     0   :  { %s5785_s0 = inlined_call_operand.vmem [shape: f32[2,8,32], index: 0, kind: input, shape index: {}]   ;;  %s5786_s1 = inlined_call_operand.vmem [shape: f32[2,8,32], index: 1, kind: input, shape index: {}]   ;;  %s5787_s2 = inlined_call_operand.vmem [shape: f32[32,96], index: 2, kind: input, shape index: {}]   ;;  %s5788_s3 = inlined_call_operand.vmem [shape: f32[1,96], index: 3, kind: input, shape index: {}]   ;;  %s5789_s4 = inlined_call_operand.vmem [shape: f32[32,32], index: 4, kind: input, shape index: {}]   ;;  %s5790_s5 = inlined_call_operand.vmem [shape: f32[1,32], index: 5, kind: input, shape index: {}]   ;;  %s5791_s6 = inlined_call_operand.vmem [shape: f32[1,32], index: 6, kind: input, shape index: {}]   ;;  %s5792_s7 = inlined_call_operand.vmem [shape: f32[1,32], index: 7, kind: input, shape index: {}]   ;;  %s5793_s8 = inlined_call_operand.vmem [shape: f32[32,32], index: 8, kind: input, shape index: {}]   ;;  %s5794_s9 = inlined_call_operand.vmem [shape: f32[1,32], index: 9, kind: input, shape index: {}]   ;;  %s5795_s10 = inlined_call_operand.vmem [shape: f32[32,64], index: 10, kind: input, shape index: {}]   ;;  %s5796_s11 = inlined_call_operand.vmem [shape: f32[1,64], index: 11, kind: input, shape index: {}]   ;;  %s5797_s12 = inlined_call_operand.vmem [shape: f32[32,32], index: 12, kind: input, shape index: {}]   ;;  %s5798_s13 = inlined_call_operand.vmem [shape: f32[1,32], index: 13, kind: input, shape index: {}]   ;;  %s5799_s14 = inlined_call_operand.vmem [shape: f32[1,32], index: 14, kind: input, shape index: {}]   ;;  %s5800_s15 = inlined_call_operand.vmem [shape: f32[1,32], index: 15, kind: input, shape index: {}]   ;;  %s5801_s16 = inlined_call_operand.vmem [shape: f32[32,2048], index: 16, kind: input, shape index: {}]   ;;  %s5802_s17 = inlined_call_operand.vmem [shape: f32[1,2048], index: 17, kind: input, shape index: {}]   ;;  %s5803_s18 = inlined_call_operand.vmem [shape: f32[2048,32], index: 18, kind: input, shape index: {}]   ;;  %s5804_s19 = inlined_call_operand.vmem [shape: f32[1,32], index: 19, kind: input, shape index: {}]   ;;  %s5805_s20 = inlined_call_operand.vmem [shape: f32[1,32], index: 20, kind: input, shape index: {}]   ;;  %s5806_s21 = inlined_call_operand.vmem [shape: f32[1,32], index: 21, kind: input, shape index: {}]   ;;  %s5807_s22 = inlined_call_operand.vmem [shape: f32[2,8,32], index: 22, kind: output, shape index: {}]  }
   0x1   :  { %5822 = sst [smem:[#allocation2_spill]] %s5785_s0 }
   0x2   :  { %5823 = sst [smem:[#allocation3_spill]] %s5786_s1 }
   0x3   :  { %5824 = sst [smem:[#allocation4_spill]] %s5787_s2 }
   0x4   :  { %5825 = sst [smem:[#allocation5_spill]] %s5788_s3  ;;  %s4368_s3 = smov 0  }
   0x5   :  { %5826 = sst [smem:[#allocation6_spill]] %s5789_s4 }
   0x6   :  { %5827 = sst [smem:[#allocation7_spill]] %s5790_s5 }
   0x7   :  { %5828 = sst [smem:[#allocation8_spill]] %s5791_s6 }
   0x8 LB: > { %s3763_s28 = sadd.s32 4294967295, %s4234_s3   ;;  %p3767_p0 = scmp.ge.s32.totalorder %s4234_s3, 1  ;;  %s4234_s3 = sphi %s4368_s3, %s32_s3  }
   0x9   : > { %p620_p1 = scmp.lt.s32.totalorder %s4234_s3, 3 }
   0xb   : > { %p621_p2 = pnand %p3767_p0, %p620_p1 }
   0xc   : > { %s5829_s4 = sld [smem:[#allocation4_spill]] (!%p621_p2)  ;;  %p684_p3 = scmp.lt.s32.totalorder (!%p621_p2), %s3763_s28, 1  ;;  %v4236_v3 = vmov (!%p621_p2), 0.0   ;;  %vm4237_vm0 = vmmov (!%p621_p2), 0   ;;  %vm713_vm1 = vcmask (!%p621_p2), 261120   ;;  %vm766_vm2 = vcmask (!%p621_p2), 64512  }
   0xd   : > { %624 = sbr.rel (%p621_p2) target bundleno = 4401 (0x1131), region = 108  ;;  %4045 = vmatprep.subr.bf16.mxu0 (!%p621_p2), %v4236_v3  ;;  %4049 = vmatprep.mubr.msk.bf16.mxu0 (!%p621_p2), %vm4237_vm0, %v4236_v3  ;;  %s5830_s27 = sld [smem:[#allocation2_spill]] (!%p621_p2)  ;;  %v757_v18 = vlaneseq (!%p621_p2)  ;;  %vm1441_vm4 = vcmask (!%p621_p2), 130048   ;;  %vm1443_vm5 = vcmask (!%p621_p2), 195584  }
   0xe   : > { %4053 = vmatprep.subr.mxu1 (!%p621_p2), %v4236_v3  ;;  %4055 = vmatprep.mubr.msk.f32.mxu1 (!%p621_p2), %vm4237_vm0, %v4236_v3  ;;  %s5831_s0 = sld [smem:[#allocation5_spill]] (!%p621_p2)  ;;  %s4238_s23 = smov (!%p621_p2), 64  }
   0xf   : > { %s5813_s1 = smov (!%p621_p2), 96   ;;  %s5810_s5 = smov (!%p621_p2), 88   ;;  %v4433_v19 = vshrl.u32 (!%p621_p2), %v757_v18, 7  ;;  %v760_v20 = vand.u32 (!%p621_p2), 127, %v757_v18 }
  0x10   : > { %s4241_s24 = smov (!%p621_p2), 120   ;;  %s5812_s6 = smov (!%p621_p2), 80  }
  0x11   : > { %s5819_s26 = smov (!%p621_p2), 112   ;;  %s5811_s2 = smov (!%p621_p2), 72   ;;  %vm4436_vm3 = vcmp.le.s32.totalorder (!%p621_p2), %v760_v20, %v4433_v19 }
  0x12   : > { %v699_v0 = vld [vmem:[%s5829_s4] sm:$0xff] (!%p621_p2)  ;;  %v700_v1 = vld [vmem:[%s5829_s4 + $0x8] sm:$0xff] (!%p621_p2)  ;;  %v701_v2 = vld [vmem:[%s5829_s4 + $0x10] sm:$0xff] (!%p621_p2)  ;;  %s4248_s30 = smov (!%p621_p2), 40  }
  0x13   : > { %v704_v4 = vpack.c.bf16 (!%p621_p2), %v700_v1, %v699_v0  ;;  %v702_v5 = vld [vmem:[%s5829_s4 + $0x18] sm:$0xff] (!%p621_p2) }
  0x14   : > { %s5848_s28 = smov (!%p684_p3, %s3763_s28), 1  ;;  %v705_v6 = vpack.c.bf16 %v702_v5, %v701_v2  ;;  %v3771_v9 = vld [vmem:[%s5831_s0] ss:$0 sm:$0xff]  ;;  %s5816_s0 = smov 8  }
  0x15   : > { %4046 = vmatpush3.bf16.msra.mxu0 %v704_v4  ;;  %s4395_s25 = sshll.u32 %s5848_s28, 3  ;;  %s4247_s28 = smov 48  }
  0x16   : > { %4047 = vmatprep.subr.bf16.mxu0 %v4236_v3  ;;  %s687_s29 = scalar_lea.vmem %s5830_s27, %s4395_s25  ;;  %s5817_s27 = smov 104  }
  0x17   : > { %v4401_v7 = vld [vmem:[%s687_s29] sm:$0xff]  ;;  %s4246_s29 = smov 56  }
  0x18   : > { %v703_v8 = vpack.c.bf16 %v4401_v7, %v4401_v7 }
  0x19   : > { %4048 = vmatpush3.bf16.msra.mxu0 %v705_v6 }
  0x1a   : > { %4068 = vmatprep.subr.mxu0 %v4236_v3 }
  0x1c   : > { %4050 = vmatmul.mubr.msk.bf16.vlgmr.msra.gmra.mrb[0].mxu0 %vm713_vm1, %v703_v8 }
  0x1d   : > { %4070 = vmatprep.mubr.msk.f32.mxu0 %vm4237_vm0, %v4236_v3 }
  0xef   : > { %v751_v10 = vpop.f32.mrb[0].mxu0 }
  0xf0   : > { %v4412_v11 = vadd.f32 %v3771_v9, %v751_v10  ;;  %v4051_v12 = vpop.f32.mrb[1].mxu0 }
  0xf1   : > { %v754_v13 = vpop.f32.mrb[2].mxu0 }
  0xf2   : > { %852 = vrot.lane.b32.xlu1 %v4412_v11, %s4238_s23  ;;  %764 = vrot.lane.b32.xlu0 %v4412_v11, %s5813_s1  ;;  %v4052_v14 = vpop.f32.mrb[3].mxu0  ;;  %v762_v15 = vmul.f32 0.35355338, %v4412_v11  ;;  %s5814_s1 = smov 24   ;;  %s5835_s23 = sld [smem:[#allocation7_spill]] }
  0xf6   : > { %932 = vrot.lane.b32.xlu1 %v4412_v11, %s5810_s5  ;;  %s5815_s5 = smov 16  }
  0xfa   : > { %930 = vrot.lane.b32.xlu1 %v762_v15, %s4241_s24 }
  0xfe   : > { %1098 = vrot.lane.b32.xlu1 %v4412_v11, %s5812_s6  ;;  %s5837_s6 = sld [smem:[#allocation8_spill]] }
 0x102   : > { %1096 = vrot.lane.b32.xlu1 %v762_v15, %s5819_s26 }
 0x106   : > { %1264 = vrot.lane.b32.xlu1 %v4412_v11, %s5811_s2  ;;  %s5843_s2 = smov 88  }
 0x10a   : > { %1262 = vrot.lane.b32.xlu1 %v762_v15, %s5817_s27  ;;  %s695_s27 = scalar_lea.vmem %s5807_s22, %s4395_s25 }
 0x164   : > { %v765_v16 = vpop.permute.xlu0 %764  ;;  %v853_v17 = vpop.permute.xlu1 %852 }
 0x165   : > { %4054 = vmatpush3.xpose.msk.msra.mxu1 %vm766_vm2, %v765_v16 }
 0x166   : > { %4058 = vmatprep.subr.mxu1 %v4236_v3 }
 0x168   : > { %4056 = vmatmul.mubr.msk.f32.vlgmr.msra.gmra.mrb[0].mxu1 %vm766_vm2, %v762_v15  ;;  %v933_v26 = vpop.permute.xlu1 %932 }
 0x169   : > { %4059 = vmatpush3.msra.mxu1 %v853_v17  ;;  %4060 = vmatprep.mubr.msk.f32.mxu1 %vm4237_vm0, %v4236_v3 }
 0x16a   : > { %4063 = vmatprep.subr.mxu1 %v4236_v3 }
 0x16c   : > { %v931_v29 = vpop.permute.xlu1 %930 }
 0x170   : > { %v1099_v32 = vpop.permute.xlu1 %1098 }
 0x174   : > { %v1097_v34 = vpop.permute.xlu1 %1096 }
 0x178   : > { %v1265_v35 = vpop.permute.xlu1 %1264 }
 0x17c   : > { %v1263_v36 = vpop.permute.xlu1 %1262 }
 0x23b   : > { %v838_v22 = vpop.f32.mrb[0].mxu1 }
 0x23c   : > { %v842_v23 = vsel %vm4436_vm3, %v838_v22, -inf  ;;  %v4057_v24 = vpop.f32.mrb[1].mxu1 }
 0x23d   : > { %v843_v25 = vsel %vm766_vm2, %v842_v23, -inf }
 0x23e   : > { %844 = vmax.xlane.f32.xlu0 %v843_v25 }
 0x254   : > { %1018 = vrot.lane.b32.xlu0 %v4412_v11, %s4246_s29  ;;  %s5834_s29 = sld [smem:[#allocation6_spill]] }
 0x25a   : > { %v1445_v9 = vld [vmem:[%s5834_s29] sm:$0xff]  ;;  %v1446_v10 = vld [vmem:[%s5834_s29 + $0x8] sm:$0xff]  ;;  %v1447_v13 = vld [vmem:[%s5834_s29 + $0x10] sm:$0xff] }
 0x25b   : > { %v1448_v14 = vld [vmem:[%s5834_s29 + $0x18] sm:$0xff] }
 0x25c   : > { %v1451_v15 = vpack.c.bf16 %v1448_v14, %v1447_v13  ;;  %v3791_v14 = vld [vmem:[%s5796_s11] ss:$0 sm:$0xff] }
 0x2cb   : > { %v845_v27 = vpop.xlane.xlu0 %844 }
 0x2cc   : > { %v846_v28 = vsub.f32 %v842_v23, %v845_v27 }
 0x2ce   : > { %v847_v30 = vmul.f32 1.442695, %v846_v28 }
 0x2cf   : > { %v1019_v31 = vpop.permute.xlu0 %1018 }
 0x2d0   : > { %4190 = vpow2.f32 %v847_v30  ;;  %4069 = vmatpush3.msra.mxu0 %v1019_v31 }
 0x2d1   : > { %4078 = vmatprep.subr.mxu0 %v4236_v3 }
 0x2da   : > { %v4445_v33 = vpop.eup %4190 }
 0x2db   : > { %4061 = vmatmul.mubr.msk.f32.vlgmr.msra.gmra.mrb[2].mxu1 %vm766_vm2, %v4445_v33  ;;  %v849_v5 = vsel %vm766_vm2, %v4445_v33, 0.0 }
 0x2dc   : > { %4064 = vmatpush3.xpose.msk.msra.mxu1 %vm766_vm2, %v933_v26  ;;  %4065 = vmatprep.mubr.msk.f32.mxu1 %vm4237_vm0, %v4236_v3 }
 0x2dd   : > { %4073 = vmatprep.subr.mxu1 %v4236_v3 }
 0x2df   : > { %4066 = vmatmul.mubr.msk.f32.vlgmr.msra.gmra.mrb[4].mxu1 %vm766_vm2, %v931_v29 }
 0x2e0   : > { %4074 = vmatpush3.xpose.msk.msra.mxu1 %vm766_vm2, %v1099_v32  ;;  %4075 = vmatprep.mubr.msk.f32.mxu1 %vm4237_vm0, %v4236_v3 }
 0x2e1   : > { %4083 = vmatprep.subr.mxu1 %v4236_v3 }
 0x2e3   : > { %4076 = vmatmul.mubr.msk.f32.vlgmr.msra.gmra.mrb[6].mxu1 %vm766_vm2, %v1097_v34 }
 0x2e4   : > { %4084 = vmatpush3.xpose.msk.msra.mxu1 %vm766_vm2, %v1265_v35  ;;  %4085 = vmatprep.mubr.msk.f32.mxu1 %vm4237_vm0, %v4236_v3 }
 0x2e5   : > { %4093 = vmatprep.subr.bf16.mxu1 %v4236_v3 }
 0x2e7   : > { %4086 = vmatmul.mubr.msk.f32.vlgmr.msra.gmra.mrb[8].mxu1 %vm766_vm2, %v1263_v36 }
 0x2e8   : > { %4097 = vmatprep.mubr.msk.bf16.mxu1 %vm4237_vm0, %v4236_v3 }
 0x3ae   : > { %v4466_v37 = vpop.f32.mrb[2].mxu1 }
 0x3af   : > { %v4062_v38 = vpop.f32.mrb[3].mxu1 }
 0x3b2   : > { %v1004_v39 = vpop.f32.mrb[4].mxu1 }
 0x3b3   : > { %v1008_v40 = vsel %vm4436_vm3, %v1004_v39, -inf  ;;  %v4067_v41 = vpop.f32.mrb[5].mxu1 }
 0x3b4   : > { %v1009_v42 = vsel %vm766_vm2, %v1008_v40, -inf }
 0x3b5   : > { %1010 = vmax.xlane.f32.xlu1 %v1009_v42 }
 0x3b6   : > { %v1170_v43 = vpop.f32.mrb[6].mxu1 }
 0x3b7   : > { %v1174_v44 = vsel %vm4436_vm3, %v1170_v43, -inf  ;;  %v4077_v45 = vpop.f32.mrb[7].mxu1 }
 0x3b8   : > { %v1175_v46 = vsel %vm766_vm2, %v1174_v44, -inf }
 0x3b9   : > { %1176 = vmax.xlane.f32.xlu0 %v1175_v46 }
 0x3ba   : > { %v1336_v47 = vpop.f32.mrb[8].mxu1 }
 0x3bb   : > { %v1340_v48 = vsel %vm4436_vm3, %v1336_v47, -inf  ;;  %v4087_v49 = vpop.f32.mrb[9].mxu1 }
 0x3bc   : > { %v1341_v50 = vsel %vm766_vm2, %v1340_v48, -inf }
 0x3bd   : > { %1342 = vmax.xlane.f32.xlu0 %v1341_v50 }
 0x3c6   : > { %1184 = vrot.lane.b32.xlu1 %v4412_v11, %s4247_s28 }
 0x3d3   : > { %1350 = vrot.lane.b32.xlu0 %v4412_v11, %s4248_s30  ;;  %v1450_v11 = vpack.c.bf16 %v1446_v10, %v1445_v9  ;;  %s5836_s30 = sld [smem:[#allocation3_spill]]  ;;  %v3788_v10 = vld [vmem:[%s5792_s7] ss:$0 sm:$0xff] }
 0x3d5   : > { %4094 = vmatpush3.bf16.msra.mxu1 %v1450_v11 }
 0x3d6   : > { %4095 = vmatprep.subr.bf16.mxu1 %v4236_v3 }
 0x3d9   : > { %4096 = vmatpush3.bf16.msra.mxu1 %v1451_v15  ;;  %s691_s26 = scalar_lea.vmem %s5836_s30, %s4395_s25  ;;  %s5840_s30 = smov 96  }
 0x3da   : > { %4109 = vmatprep.subr.bf16.mxu1 %v4236_v3 }
 0x442   : > { %v1011_v51 = vpop.xlane.xlu1 %1010 }
 0x443   : > { %v1012_v52 = vsub.f32 %v1008_v40, %v1011_v51 }
 0x445   : > { %v1013_v53 = vmul.f32 1.442695, %v1012_v52 }
 0x446   : > { %v1177_v54 = vpop.xlane.xlu0 %1176  ;;  %v1185_v61 = vpop.permute.xlu1 %1184 }
 0x447   : > { %4192 = vpow2.f32 %v1013_v53  ;;  %v1178_v55 = vsub.f32 %v1174_v44, %v1177_v54  ;;  %v1590_v53 = vld [vmem:[%s5795_s10] sm:$0xff]  ;;  %v1591_v54 = vld [vmem:[%s5795_s10 + $0x8] sm:$0xff] }
 0x449   : > { %v1179_v56 = vmul.f32 1.442695, %v1178_v55  ;;  %v1592_v55 = vld [vmem:[%s5795_s10 + $0x10] sm:$0xff] }
 0x44a   : > { %v1343_v57 = vpop.xlane.xlu0 %1342 }
 0x44b   : > { %4194 = vpow2.f32 %v1179_v56  ;;  %v1344_v58 = vsub.f32 %v1340_v48, %v1343_v57  ;;  %v1593_v56 = vld [vmem:[%s5795_s10 + $0x18] sm:$0xff] }
 0x44c   : > { %v1596_v57 = vpack.c.bf16 %v1593_v56, %v1592_v55 }
 0x44d   : > { %v1345_v59 = vmul.f32 1.442695, %v1344_v58  ;;  %v698_v58 = vld [vmem:[%s691_s26] sm:$0xff]  ;;  %s5838_s26 = smov 112  }
 0x44e   : > { %v1351_v0 = vpop.permute.xlu0 %1350 }
 0x44f   : > { %4196 = vpow2.f32 %v1345_v59  ;;  %v1594_v59 = vpack.c.bf16 %v698_v58, %v698_v58 }
 0x451   : > { %v4193_v60 = vpop.eup %4192 }
 0x452   : > { %4071 = vmatmul.mubr.msk.f32.vlgmr.msra.gmra.mrb[4].mxu0 %vm766_vm2, %v4193_v60  ;;  %v1015_v62 = vsel %vm766_vm2, %v4193_v60, 0.0  ;;  %v1533_v60 = vld [vmem:[%s5793_s8] sm:$0xff] }
 0x453   : > { %4079 = vmatpush3.msra.mxu0 %v1185_v61  ;;  %1016 = vadd.xlane.f32.xlu0 %v1015_v62  ;;  %v1534_v61 = vld [vmem:[%s5793_s8 + $0x8] sm:$0xff] }
 0x454   : > { %4080 = vmatprep.mubr.msk.f32.mxu0 %vm4237_vm0, %v4236_v3  ;;  %4088 = vmatprep.subr.mxu0 %v4236_v3  ;;  %v1538_v62 = vpack.c.bf16 %v1534_v61, %v1533_v60 }
 0x455   : > { %v4195_v63 = vpop.eup %4194 }
 0x456   : > { %4081 = vmatmul.mubr.msk.f32.vlgmr.msra.gmra.mrb[6].mxu0 %vm766_vm2, %v4195_v63  ;;  %v1181_v1 = vsel %vm766_vm2, %v4195_v63, 0.0  ;;  %v1535_v63 = vld [vmem:[%s5793_s8 + $0x10] sm:$0xff] }
 0x457   : > { %4089 = vmatpush3.msra.mxu0 %v1351_v0  ;;  %1182 = vadd.xlane.f32.xlu1 %v1181_v1  ;;  %v1536_v0 = vld [vmem:[%s5793_s8 + $0x18] sm:$0xff] }
 0x458   : > { %4090 = vmatprep.mubr.msk.f32.mxu0 %vm4237_vm0, %v4236_v3  ;;  %4101 = vmatprep.subr.bf16.mxu0 %v4236_v3  ;;  %v1539_v1 = vpack.c.bf16 %v1536_v0, %v1535_v63 }
 0x459   : > { %v4197_v2 = vpop.eup %4196 }
 0x45a   : > { %4091 = vmatmul.mubr.msk.f32.vlgmr.msra.gmra.mrb[8].mxu0 %vm766_vm2, %v4197_v2  ;;  %v1347_v4 = vsel %vm766_vm2, %v4197_v2, 0.0 }
 0x45b   : > { %1348 = vadd.xlane.f32.xlu0 %v1347_v4  ;;  %4105 = vmatprep.mubr.msk.bf16.mxu0 %vm4237_vm0, %v4236_v3 }
 0x45c   : > { %4102 = vmatpush3.bf16.msra.mxu0 %v1538_v62 }
 0x45d   : > { %4103 = vmatprep.subr.bf16.mxu0 %v4236_v3 }
 0x45f   : > { %850 = vadd.xlane.f32.xlu0 %v849_v5 }
 0x460   : > { %4104 = vmatpush3.bf16.msra.mxu0 %v1539_v1 }
 0x461   : > { %4117 = vmatprep.subr.mxu0 %v4236_v3 }
 0x4e0   : > { %v1017_v6 = vpop.xlane.xlu0 %1016 }
 0x4e1   : > { %4198 = vrcp.f32 %v1017_v6 }
 0x4e4   : > { %v1183_v8 = vpop.xlane.xlu1 %1182 }
 0x4e5   : > { %4200 = vrcp.f32 %v1183_v8  ;;  %v3787_v8 = vld [vmem:[%s5837_s6] ss:$0 sm:$0xff]  ;;  %s5842_s6 = smov 72  }
 0x4e8   : > { %v1349_v12 = vpop.xlane.xlu0 %1348 }
 0x4e9   : > { %4202 = vrcp.f32 %v1349_v12 }
 0x4eb   : > { %v4199_v16 = vpop.eup %4198 }
 0x4ec   : > { %v851_v30 = vpop.xlane.xlu0 %850 }
 0x4ed   : > { %4204 = vrcp.f32 %v851_v30 }
 0x4ef   : > { %v4201_v22 = vpop.eup %4200 }
 0x4f3   : > { %v4203_v26 = vpop.eup %4202 }
 0x4f7   : > { %v4205_v31 = vpop.eup %4204 }
 0x4f8   : > { %v929_v33 = vmul.f32 %v4205_v31, %v4466_v37  ;;  %v3785_v37 = vld [vmem:[%s5835_s23] ss:$0 sm:$0xff] }
 0x525   : > { %v1090_v17 = vpop.f32.mrb[4].mxu0 }
 0x526   : > { %v1095_v18 = vmul.f32 %v4199_v16, %v1090_v17  ;;  %v4072_v20 = vpop.f32.mrb[5].mxu0 }
 0x528   : > { %1429 = vrot.lane.b32.xlu0 %v1095_v18, %s5816_s0  ;;  %s5839_s0 = smov 104  }
 0x529   : > { %v1256_v23 = vpop.f32.mrb[6].mxu0 }
 0x52a   : > { %v1261_v24 = vmul.f32 %v4201_v22, %v1256_v23  ;;  %v4082_v25 = vpop.f32.mrb[7].mxu0  ;;  %v3789_v23 = vld [vmem:[%s5794_s9] ss:$0 sm:$0xff] }
 0x52c   : > { %1433 = vrot.lane.b32.xlu1 %v1261_v24, %s5815_s5 }
 0x52d   : > { %v1422_v27 = vpop.f32.mrb[8].mxu0 }
 0x52e   : > { %v1427_v28 = vmul.f32 %v4203_v26, %v1422_v27  ;;  %v4092_v29 = vpop.f32.mrb[9].mxu0 }
 0x530   : > { %1437 = vrot.lane.b32.xlu0 %v1427_v28, %s5814_s1 }
 0x59a   : > { %v1430_v32 = vpop.permute.xlu0 %1429 }
 0x59b   : > { %v1440_v35 = vsel %vm766_vm2, %v929_v33, %v1430_v32 }
 0x59e   : > { %v1434_v34 = vpop.permute.xlu1 %1433 }
 0x59f   : > { %v1442_v36 = vsel %vm1441_vm4, %v1440_v35, %v1434_v34 }
 0x5a2   : > { %v1438_v38 = vpop.permute.xlu0 %1437 }
 0x5a3   : > { %v1444_v39 = vsel %vm1443_vm5, %v1442_v36, %v1438_v38 }
 0x5a4   : > { %v1449_v40 = vpack.c.bf16 %v1444_v39, %v1444_v39 }
 0x5a6   : > { %4098 = vmatmul.mubr.msk.bf16.vlgmr.msra.gmra.mrb[12].mxu1 %vm713_vm1, %v1449_v40 }
 0x5a7   : > { %4113 = vmatprep.mubr.msk.bf16.mxu1 %vm4237_vm0, %v4236_v3 }
 0x679   : > { %v1496_v41 = vpop.f32.mrb[12].mxu1 }
 0x67a   : > { %v1497_v42 = vadd.f32 %v3785_v37, %v1496_v41  ;;  %v4099_v43 = vpop.f32.mrb[13].mxu1 }
 0x67b   : > { %v1499_v44 = vpop.f32.mrb[14].mxu1 }
 0x67c   : > { %v4100_v45 = vpop.f32.mrb[15].mxu1  ;;  %v1502_v46 = vadd.f32 %v1497_v42, %v4401_v7  ;;  %v1595_v7 = vpack.c.bf16 %v1591_v54, %v1590_v53 }
 0x67e   : > { %v1505_v47 = vsel %vm713_vm1, %v1502_v46, 0.0  ;;  %4110 = vmatpush3.bf16.msra.mxu1 %v1595_v7 }
 0x67f   : > { %1506 = vadd.xlane.f32.xlu0 %v1505_v47  ;;  %4111 = vmatprep.subr.bf16.mxu1 %v4236_v3 }
 0x682   : > { %4112 = vmatpush3.bf16.msra.mxu1 %v1596_v57 }
 0x683   : > { %4127 = vmatprep.subr.mxu1 %v4236_v3 }
 0x685   : > { %4114 = vmatmul.mubr.msk.bf16.vlgmr.msra.gmra.mrb[16].mxu1 %vm713_vm1, %v1594_v59 }
 0x686   : > { %4129 = vmatprep.mubr.msk.f32.mxu1 %vm4237_vm0, %v4236_v3 }
 0x70c   : > { %v1507_v48 = vpop.xlane.xlu0 %1506 }
 0x70d   : > { %v1509_v49 = vmul.f32 0.03125, %v1507_v48 }
 0x70f   : > { %v1510_v50 = vsub.f32 %v1502_v46, %v1509_v49 }
 0x711   : > { %v1511_v51 = vmul.f32 %v1510_v50, %v1510_v50 }
 0x713   : > { %v1512_v52 = vsel %vm713_vm1, %v1511_v51, 0.0 }
 0x714   : > { %1513 = vadd.xlane.f32.xlu1 %v1512_v52 }
 0x758   : > { %v1641_v15 = vpop.f32.mrb[16].mxu1 }
 0x759   : > { %v4576_v16 = vadd.f32 %v3791_v14, %v1641_v15  ;;  %v4115_v17 = vpop.f32.mrb[17].mxu1 }
 0x75a   : > { %v1644_v18 = vpop.f32.mrb[18].mxu1  ;;  %v2326_v17 = vld [vmem:[%s5797_s12 + $0x8] sm:$0xff] }
 0x75b   : > { %1814 = vrot.lane.b32.xlu0 %v4576_v16, %s4241_s24  ;;  %v4116_v20 = vpop.f32.mrb[19].mxu1 }
 0x75f   : > { %1980 = vrot.lane.b32.xlu0 %v4576_v16, %s5838_s26 }
 0x763   : > { %2146 = vrot.lane.b32.xlu0 %v4576_v16, %s5839_s0 }
 0x7a1   : > { %v1514_v2 = vpop.xlane.xlu1 %1513 }
 0x7a2   : > { %v1515_v4 = vmul.f32 0.03125, %v1514_v2 }
 0x7a4   : > { %v1516_v5 = vadd.f32 1e-05, %v1515_v4 }
 0x7a6   : > { %4206 = vrsqrt.f32 %v1516_v5 }
 0x7b0   : > { %v4207_v6 = vpop.eup %4206 }
 0x7b1   : > { %v1518_v9 = vmul.f32 %v4207_v6, %v1510_v50 }
 0x7b3   : > { %v1525_v11 = vmul.f32 %v3787_v8, %v1518_v9 }
 0x7b5   : > { %v4566_v12 = vadd.f32 %v3788_v10, %v1525_v11 }
 0x7b7   : > { %v1537_v13 = vpack.c.bf16 %v4566_v12, %v4566_v12 }
 0x7b9   : > { %4106 = vmatmul.mubr.msk.bf16.vlgmr.msra.gmra.mrb[12].mxu0 %vm713_vm1, %v1537_v13 }
 0x7ba   : > { %4119 = vmatprep.mubr.msk.f32.mxu0 %vm4237_vm0, %v4236_v3  ;;  %4118 = vmatpush3.xpose.msk.msra.mxu0 %vm766_vm2, %v4576_v16 }
 0x7bb   : > { %4122 = vmatprep.subr.mxu0 %v4236_v3 }
 0x7cd   : > { %v1815_v22 = vpop.permute.xlu0 %1814 }
 0x7ce   : > { %4128 = vmatpush3.xpose.msk.msra.mxu1 %vm766_vm2, %v1815_v22  ;;  %v2327_v22 = vld [vmem:[%s5797_s12 + $0x10] sm:$0xff] }
 0x7cf   : > { %4137 = vmatprep.subr.mxu1 %v4236_v3 }
 0x7d1   : > { %v1981_v30 = vpop.permute.xlu0 %1980 }
 0x7d5   : > { %v2147_v33 = vpop.permute.xlu0 %2146 }
 0x88c   : > { %v1584_v24 = vpop.f32.mrb[12].mxu0 }
 0x88d   : > { %v1585_v25 = vadd.f32 %v3789_v23, %v1584_v24  ;;  %v4107_v26 = vpop.f32.mrb[13].mxu0  ;;  %v2328_v23 = vld [vmem:[%s5797_s12 + $0x18] sm:$0xff] }
 0x88e   : > { %v1587_v27 = vpop.f32.mrb[14].mxu0  ;;  %v2331_v24 = vpack.c.bf16 %v2328_v23, %v2327_v22  ;;  %v2433_v22 = vld [vmem:[%s5801_s16 + $0xa8] sm:$0xff]  ;;  %v2419_v23 = vld [vmem:[%s5801_s16 + $0x38] sm:$0xff] }
 0x88f   : > { %v1647_v28 = vmul.f32 0.35355338, %v1585_v25  ;;  %v4108_v29 = vpop.f32.mrb[15].mxu0 }
 0x891   : > { %1812 = vrot.lane.b32.xlu1 %v1647_v28, %s4241_s24  ;;  %4120 = vmatmul.mubr.msk.f32.vlgmr.msra.gmra.mrb[10].mxu0 %vm766_vm2, %v1647_v28  ;;  %s5841_s24 = smov 80  }
 0x892   : > { %4124 = vmatprep.mubr.msk.f32.mxu0 %vm4237_vm0, %v4236_v3 }
 0x895   : > { %1978 = vrot.lane.b32.xlu1 %v1647_v28, %s5838_s26 }
 0x899   : > { %2144 = vrot.lane.b32.xlu1 %v1647_v28, %s5839_s0 }
 0x89d   : > { %1734 = vrot.lane.b32.xlu1 %v4576_v16, %s5840_s30 }
 0x903   : > { %v1813_v31 = vpop.permute.xlu1 %1812 }
 0x904   : > { %4130 = vmatmul.mubr.msk.f32.vlgmr.msra.gmra.mrb[10].mxu1 %vm766_vm2, %v1813_v31 }
 0x905   : > { %4138 = vmatpush3.xpose.msk.msra.mxu1 %vm766_vm2, %v1981_v30  ;;  %4139 = vmatprep.mubr.msk.f32.mxu1 %vm4237_vm0, %v4236_v3 }
 0x906   : > { %4147 = vmatprep.subr.mxu1 %v4236_v3 }
 0x907   : > { %v1979_v32 = vpop.permute.xlu1 %1978 }
 0x908   : > { %4140 = vmatmul.mubr.msk.f32.vlgmr.msra.gmra.mrb[20].mxu1 %vm766_vm2, %v1979_v32 }
 0x909   : > { %4148 = vmatpush3.xpose.msk.msra.mxu1 %vm766_vm2, %v2147_v33  ;;  %4149 = vmatprep.mubr.msk.f32.mxu1 %vm4237_vm0, %v4236_v3 }
 0x90a   : > { %4157 = vmatprep.subr.bf16.mxu1 %v4236_v3 }
 0x90b   : > { %v2145_v34 = vpop.permute.xlu1 %2144 }
 0x90c   : > { %4150 = vmatmul.mubr.msk.f32.vlgmr.msra.gmra.mrb[22].mxu1 %vm766_vm2, %v2145_v34 }
 0x90d   : > { %4161 = vmatprep.mubr.msk.bf16.mxu1 %vm4237_vm0, %v4236_v3 }
 0x90f   : > { %v1735_v35 = vpop.permute.xlu1 %1734 }
 0x910   : > { %4123 = vmatpush3.msra.mxu0 %v1735_v35 }
 0x911   : > { %4132 = vmatprep.subr.mxu0 %v4236_v3 }
 0x964   : > { %v1720_v36 = vpop.f32.mrb[10].mxu0 }
 0x965   : > { %v1724_v38 = vsel %vm4436_vm3, %v1720_v36, -inf  ;;  %v4121_v39 = vpop.f32.mrb[11].mxu0 }
 0x966   : > { %v1725_v40 = vsel %vm766_vm2, %v1724_v38, -inf }
 0x967   : > { %1726 = vmax.xlane.f32.xlu0 %v1725_v40 }
 0x9d7   : > { %v1886_v37 = vpop.f32.mrb[10].mxu1 }
 0x9d8   : > { %v1890_v41 = vsel %vm4436_vm3, %v1886_v37, -inf  ;;  %v4131_v42 = vpop.f32.mrb[11].mxu1 }
 0x9d9   : > { %v1891_v43 = vsel %vm766_vm2, %v1890_v41, -inf }
 0x9da   : > { %1892 = vmax.xlane.f32.xlu1 %v1891_v43 }
 0x9db   : > { %v2052_v44 = vpop.f32.mrb[20].mxu1 }
 0x9dc   : > { %v2056_v45 = vsel %vm4436_vm3, %v2052_v44, -inf  ;;  %v4141_v46 = vpop.f32.mrb[21].mxu1 }
 0x9dd   : > { %v2057_v47 = vsel %vm766_vm2, %v2056_v45, -inf  ;;  %v3805_v46 = vld [vmem:[%s5798_s13] ss:$0 sm:$0xff] }
 0x9de   : > { %2058 = vmax.xlane.f32.xlu0 %v2057_v47 }
 0x9df   : > { %v2218_v48 = vpop.f32.mrb[22].mxu1 }
 0x9e0   : > { %v2222_v49 = vsel %vm4436_vm3, %v2218_v48, -inf  ;;  %v4151_v50 = vpop.f32.mrb[23].mxu1 }
 0x9e1   : > { %v2223_v51 = vsel %vm766_vm2, %v2222_v49, -inf }
 0x9e2   : > { %2224 = vmax.xlane.f32.xlu0 %v2223_v51 }
 0x9eb   : > { %2066 = vrot.lane.b32.xlu1 %v4576_v16, %s5841_s24  ;;  %s5844_s24 = smov 8  }
 0x9ef   : > { %2232 = vrot.lane.b32.xlu1 %v4576_v16, %s5842_s6  ;;  %s5845_s6 = smov 16  }
 0x9f4   : > { %v1727_v52 = vpop.xlane.xlu0 %1726 }
 0x9f5   : > { %v1728_v53 = vsub.f32 %v1724_v38, %v1727_v52 }
 0x9f7   : > { %v1729_v54 = vmul.f32 1.442695, %v1728_v53 }
 0x9f8   : > { %1900 = vrot.lane.b32.xlu0 %v4576_v16, %s5843_s2  ;;  %v2325_v16 = vld [vmem:[%s5797_s12] sm:$0xff]  ;;  %s5846_s2 = smov 24  }
 0x9f9   : > { %4208 = vpow2.f32 %v1729_v54  ;;  %v2330_v18 = vpack.c.bf16 %v2326_v17, %v2325_v16  ;;  %v2446_v16 = vld [vmem:[%s5801_s16 + $0x110] sm:$0xff] }
 0x9fa   : > { %v2462_v17 = vld [vmem:[%s5801_s16 + $0x190] sm:$0xff] }
 0x9fb   : > { %4158 = vmatpush3.bf16.msra.mxu1 %v2330_v18  ;;  %v2495_v18 = vpack.c.bf16 %v2462_v17, %v2446_v16  ;;  %v2443_v16 = vld [vmem:[%s5801_s16 + $0xf8] sm:$0xff] }
 0x9fc   : > { %4159 = vmatprep.subr.bf16.mxu1 %v4236_v3 }
 0x9ff   : > { %4160 = vmatpush3.bf16.msra.mxu1 %v2331_v24  ;;  %v4252_v24 = vmov 0  }
 0xa03   : > { %v4209_v7 = vpop.eup %4208 }
 0xa04   : > { %4125 = vmatmul.mubr.msk.f32.vlgmr.msra.gmra.mrb[16].mxu0 %vm766_vm2, %v4209_v7  ;;  %v1731_v10 = vsel %vm766_vm2, %v4209_v7, 0.0 }
 0xa05   : > { %4134 = vmatprep.mubr.msk.f32.mxu0 %vm4237_vm0, %v4236_v3 }
 0xa67   : > { %v1893_v21 = vpop.xlane.xlu1 %1892 }
 0xa68   : > { %v1894_v55 = vsub.f32 %v1890_v41, %v1893_v21 }
 0xa6a   : > { %v1895_v56 = vmul.f32 1.442695, %v1894_v55 }
 0xa6b   : > { %v2059_v57 = vpop.xlane.xlu0 %2058  ;;  %v2067_v0 = vpop.permute.xlu1 %2066 }
 0xa6c   : > { %4210 = vpow2.f32 %v1895_v56  ;;  %v2060_v58 = vsub.f32 %v2056_v45, %v2059_v57  ;;  %v2413_v57 = vld [vmem:[%s5801_s16 + $0x8] sm:$0xff] }
 0xa6e   : > { %v2061_v59 = vmul.f32 1.442695, %v2060_v58  ;;  %v2429_v58 = vld [vmem:[%s5801_s16 + $0x88] sm:$0xff] }
 0xa6f   : > { %v2225_v60 = vpop.xlane.xlu0 %2224  ;;  %v2233_v5 = vpop.permute.xlu1 %2232 }
 0xa70   : > { %4212 = vpow2.f32 %v2061_v59  ;;  %v2226_v61 = vsub.f32 %v2222_v49, %v2225_v60  ;;  %v2478_v59 = vpack.c.bf16 %v2429_v58, %v2413_v57  ;;  %v2431_v60 = vld [vmem:[%s5801_s16 + $0x98] sm:$0xff]  ;;  %v2420_v57 = vld [vmem:[%s5801_s16 + $0x40] sm:$0xff] }
 0xa71   : > { %v2436_v58 = vld [vmem:[%s5801_s16 + $0xc0] sm:$0xff] }
 0xa72   : > { %v2227_v62 = vmul.f32 1.442695, %v2226_v61  ;;  %v2412_v61 = vld [vmem:[%s5801_s16] sm:$0xff] }
 0xa73   : > { %v1901_v63 = vpop.permute.xlu0 %1900 }
 0xa74   : > { %4214 = vpow2.f32 %v2227_v62  ;;  %4133 = vmatpush3.msra.mxu0 %v1901_v63  ;;  %v2428_v62 = vld [vmem:[%s5801_s16 + $0x80] sm:$0xff] }
 0xa75   : > { %4142 = vmatprep.subr.mxu0 %v4236_v3 }
 0xa76   : > { %v4211_v1 = vpop.eup %4210 }
 0xa77   : > { %4135 = vmatmul.mubr.msk.f32.vlgmr.msra.gmra.mrb[18].mxu0 %vm766_vm2, %v4211_v1  ;;  %v1897_v2 = vsel %vm766_vm2, %v4211_v1, 0.0  ;;  %v2414_v1 = vld [vmem:[%s5801_s16 + $0x10] sm:$0xff] }
 0xa78   : > { %4143 = vmatpush3.msra.mxu0 %v2067_v0  ;;  %1898 = vadd.xlane.f32.xlu0 %v1897_v2  ;;  %v2477_v0 = vpack.c.bf16 %v2428_v62, %v2412_v61  ;;  %v2430_v2 = vld [vmem:[%s5801_s16 + $0x90] sm:$0xff]  ;;  %v2453_v62 = vld [vmem:[%s5801_s16 + $0x148] sm:$0xff] }
 0xa79   : > { %4144 = vmatprep.mubr.msk.f32.mxu0 %vm4237_vm0, %v4236_v3  ;;  %4152 = vmatprep.subr.mxu0 %v4236_v3  ;;  %v2438_v61 = vld [vmem:[%s5801_s16 + $0xd0] sm:$0xff] }
 0xa7a   : > { %v4213_v4 = vpop.eup %4212 }
 0xa7b   : > { %4145 = vmatmul.mubr.msk.f32.vlgmr.msra.gmra.mrb[20].mxu0 %vm766_vm2, %v4213_v4  ;;  %v2063_v6 = vsel %vm766_vm2, %v4213_v4, 0.0  ;;  %v2479_v4 = vpack.c.bf16 %v2430_v2, %v2414_v1  ;;  %v2471_v1 = vld [vmem:[%s5801_s16 + $0x1d8] sm:$0xff]  ;;  %v2485_v2 = vpack.c.bf16 %v2436_v58, %v2420_v57 }
 0xa7c   : > { %4153 = vmatpush3.msra.mxu0 %v2233_v5  ;;  %2064 = vadd.xlane.f32.xlu1 %v2063_v6  ;;  %v2445_v5 = vld [vmem:[%s5801_s16 + $0x108] sm:$0xff]  ;;  %v2943_v57 = vld [vmem:[%s5803_s18 + $0x18] sm:$0xff] }
 0xa7d   : > { %4154 = vmatprep.mubr.msk.f32.mxu0 %vm4237_vm0, %v4236_v3  ;;  %2596 = vmatprep.subr.bf16.mxu0 %v2478_v59  ;;  %v2461_v6 = vld [vmem:[%s5801_s16 + $0x188] sm:$0xff] }
 0xa7e   : > { %v4215_v8 = vpop.eup %4214 }
 0xa7f   : > { %4155 = vmatmul.mubr.msk.f32.vlgmr.msra.gmra.mrb[22].mxu0 %vm766_vm2, %v4215_v8  ;;  %v2229_v9 = vsel %vm766_vm2, %v4215_v8, 0.0  ;;  %v2447_v8 = vld [vmem:[%s5801_s16 + $0x118] sm:$0xff] }
 0xa80   : > { %2230 = vadd.xlane.f32.xlu0 %v2229_v9  ;;  %2597 = vmatpush1.bf16.msra.mxu0 %v2477_v0  ;;  %v2494_v9 = vpack.c.bf16 %v2461_v6, %v2445_v5  ;;  %v2455_v0 = vld [vmem:[%s5801_s16 + $0x158] sm:$0xff]  ;;  %v2452_v5 = vld [vmem:[%s5801_s16 + $0x140] sm:$0xff] }
 0xa81   : > { %2628 = vmatprep.mubr.bf16.mxu0 %v4252_v24  ;;  %v2468_v6 = vld [vmem:[%s5801_s16 + $0x1c0] sm:$0xff] }
 0xa82   : > { %2598 = vmatprep.subr.bf16.mxu0 %v2494_v9  ;;  %v2504_v9 = vpack.c.bf16 %v2471_v1, %v2455_v0  ;;  %v2501_v17 = vpack.c.bf16 %v2468_v6, %v2452_v5  ;;  %v2993_v0 = vld [vmem:[%s5803_s18 + $0x1a8] sm:$0xff] }
 0xa83   : > { %v2945_v5 = vld [vmem:[%s5803_s18 + $0x28] sm:$0xff] }
 0xa84   : > { %1732 = vadd.xlane.f32.xlu0 %v1731_v10  ;;  %v2463_v10 = vld [vmem:[%s5801_s16 + $0x198] sm:$0xff] }
 0xad7   : > { %v1806_v11 = vpop.f32.mrb[16].mxu0 }
 0xad8   : > { %v4126_v13 = vpop.f32.mrb[17].mxu0 }
 0xad9   : > { %v2460_v13 = vld [vmem:[%s5801_s16 + $0x180] sm:$0xff] }
 0xb05   : > { %v1899_v14 = vpop.xlane.xlu0 %1898 }
 0xb06   : > { %4216 = vrcp.f32 %v1899_v14  ;;  %v2496_v14 = vpack.c.bf16 %v2463_v10, %v2447_v8  ;;  %v2454_v10 = vld [vmem:[%s5801_s16 + $0x150] sm:$0xff] }
 0xb09   : > { %v2065_v15 = vpop.xlane.xlu1 %2064 }
 0xb0a   : > { %4218 = vrcp.f32 %v2065_v15 }
 0xb0d   : > { %v2231_v20 = vpop.xlane.xlu0 %2230 }
 0xb0e   : > { %4220 = vrcp.f32 %v2231_v20  ;;  %v2417_v20 = vld [vmem:[%s5801_s16 + $0x28] sm:$0xff] }
 0xb10   : > { %v4217_v25 = vpop.eup %4216 }
 0xb11   : > { %v1733_v36 = vpop.xlane.xlu0 %1732 }
 0xb12   : > { %4222 = vrcp.f32 %v1733_v36 }
 0xb14   : > { %v4219_v29 = vpop.eup %4218 }
 0xb18   : > { %v4221_v32 = vpop.eup %4220 }
 0xb1c   : > { %v4223_v38 = vpop.eup %4222 }
 0xb1d   : > { %v1811_v40 = vmul.f32 %v4223_v38, %v1806_v11  ;;  %v2444_v11 = vld [vmem:[%s5801_s16 + $0x100] sm:$0xff]  ;;  %v2418_v38 = vld [vmem:[%s5801_s16 + $0x30] sm:$0xff] }
 0xb1e   : > { %v2493_v15 = vpack.c.bf16 %v2460_v13, %v2444_v11  ;;  %v2470_v11 = vld [vmem:[%s5801_s16 + $0x1d0] sm:$0xff]  ;;  %v2425_v13 = vld [vmem:[%s5801_s16 + $0x68] sm:$0xff] }
 0xb20   : > { %2599 = vmatpush1.bf16.msra.mxu0 %v2493_v15  ;;  %v2427_v15 = vld [vmem:[%s5801_s16 + $0x78] sm:$0xff] }
 0xb4a   : > { %v1972_v26 = vpop.f32.mrb[18].mxu0 }
 0xb4b   : > { %v1977_v27 = vmul.f32 %v4217_v25, %v1972_v26  ;;  %v4136_v28 = vpop.f32.mrb[19].mxu0  ;;  %v2482_v25 = vpack.c.bf16 %v2433_v22, %v2417_v20  ;;  %v2435_v26 = vld [vmem:[%s5801_s16 + $0xb8] sm:$0xff]  ;;  %v2424_v20 = vld [vmem:[%s5801_s16 + $0x60] sm:$0xff] }
 0xb4c   : > { %v2440_v22 = vld [vmem:[%s5801_s16 + $0xe0] sm:$0xff] }
 0xb4d   : > { %2311 = vrot.lane.b32.xlu1 %v1977_v27, %s5844_s24  ;;  %v2484_v27 = vpack.c.bf16 %v2435_v26, %v2419_v23  ;;  %2678 = vmatprep.subr.bf16.mxu0 %v2482_v25  ;;  %v2492_v25 = vpack.c.bf16 %v2443_v16, %v2427_v15  ;;  %v2426_v26 = vld [vmem:[%s5801_s16 + $0x70] sm:$0xff] }
 0xb4e   : > { %v2138_v30 = vpop.f32.mrb[20].mxu0 }
 0xb4f   : > { %v2143_v3 = vmul.f32 %v4219_v29, %v2138_v30  ;;  %v4146_v31 = vpop.f32.mrb[21].mxu0 }
 0xb50   : > { %v3807_v31 = vld [vmem:[%s5799_s14] ss:$0 sm:$0xff] }
 0xb51   : > { %2315 = vrot.lane.b32.xlu0 %v2143_v3, %s5845_s6 }
 0xb52   : > { %v2304_v33 = vpop.f32.mrb[22].mxu0 }
 0xb53   : > { %v2309_v34 = vmul.f32 %v4221_v32, %v2304_v33  ;;  %v4156_v35 = vpop.f32.mrb[23].mxu0  ;;  %v3808_v33 = vld [vmem:[%s5800_s15] ss:$0 sm:$0xff] }
 0xb54   : > { %v2432_v35 = vld [vmem:[%s5801_s16 + $0xa0] sm:$0xff] }
 0xb55   : > { %2319 = vrot.lane.b32.xlu1 %v2309_v34, %s5846_s2  ;;  %v2416_v34 = vld [vmem:[%s5801_s16 + $0x20] sm:$0xff] }
 0xbbf   : > { %v2312_v39 = vpop.permute.xlu1 %2311 }
 0xbc0   : > { %v2322_v41 = vsel %vm766_vm2, %v1811_v40, %v2312_v39  ;;  %v2434_v39 = vld [vmem:[%s5801_s16 + $0xb0] sm:$0xff]  ;;  %v2449_v40 = vld [vmem:[%s5801_s16 + $0x128] sm:$0xff] }
 0xbc3   : > { %v2316_v37 = vpop.permute.xlu0 %2315 }
 0xbc4   : > { %v2323_v42 = vsel %vm1441_vm4, %v2322_v41, %v2316_v37  ;;  %v2465_v37 = vld [vmem:[%s5801_s16 + $0x1a8] sm:$0xff]  ;;  %v2451_v41 = vld [vmem:[%s5801_s16 + $0x138] sm:$0xff] }
 0xbc7   : > { %v2320_v43 = vpop.permute.xlu1 %2319 }
 0xbc8   : > { %v2324_v44 = vsel %vm1443_vm5, %v2323_v42, %v2320_v43  ;;  %v2467_v42 = vld [vmem:[%s5801_s16 + $0x1b8] sm:$0xff] }
 0xbc9   : > { %v2329_v45 = vpack.c.bf16 %v2324_v44, %v2324_v44  ;;  %v2481_v44 = vpack.c.bf16 %v2432_v35, %v2416_v34  ;;  %v2472_v34 = vld [vmem:[%s5801_s16 + $0x1e0] sm:$0xff] }
 0xbcb   : > { %4162 = vmatmul.mubr.msk.bf16.vlgmr.msra.gmra.mrb[24].mxu1 %vm713_vm1, %v2329_v45  ;;  %v2483_v45 = vpack.c.bf16 %v2434_v39, %v2418_v38  ;;  %v2458_v38 = vld [vmem:[%s5801_s16 + $0x170] sm:$0xff] }
 0xbcc   : > { %2669 = vmatprep.mubr.bf16.mxu1 %v4252_v24  ;;  %v2474_v39 = vld [vmem:[%s5801_s16 + $0x1f0] sm:$0xff] }
 0xc9e   : > { %v2376_v47 = vpop.f32.mrb[24].mxu1 }
 0xc9f   : > { %v2377_v48 = vadd.f32 %v3805_v46, %v2376_v47  ;;  %v4163_v49 = vpop.f32.mrb[25].mxu1  ;;  %v2448_v46 = vld [vmem:[%s5801_s16 + $0x120] sm:$0xff] }
 0xca0   : > { %v2379_v50 = vpop.f32.mrb[26].mxu1  ;;  %v2464_v47 = vld [vmem:[%s5801_s16 + $0x1a0] sm:$0xff]  ;;  %v2498_v49 = vpack.c.bf16 %v2465_v37, %v2449_v40  ;;  %v2957_v37 = vld [vmem:[%s5803_s18 + $0x88] sm:$0xff] }
 0xca1   : > { %v4164_v51 = vpop.f32.mrb[27].mxu1  ;;  %v2382_v52 = vadd.f32 %v2377_v48, %v4566_v12  ;;  %v2415_v12 = vld [vmem:[%s5801_s16 + $0x18] sm:$0xff]  ;;  %v2500_v50 = vpack.c.bf16 %v2467_v42, %v2451_v41  ;;  %v2956_v40 = vld [vmem:[%s5803_s18 + $0x80] sm:$0xff]  ;;  %v2989_v42 = vld [vmem:[%s5803_s18 + $0x188] sm:$0xff] }
 0xca2   : > { %v2480_v63 = vpack.c.bf16 %v2431_v60, %v2415_v12  ;;  %v2450_v51 = vld [vmem:[%s5801_s16 + $0x130] sm:$0xff]  ;;  %v2988_v41 = vld [vmem:[%s5803_s18 + $0x180] sm:$0xff] }
 0xca3   : > { %v2385_v53 = vsel %vm713_vm1, %v2382_v52, 0.0  ;;  %v2422_v60 = vld [vmem:[%s5801_s16 + $0x50] sm:$0xff] }
 0xca4   : > { %2386 = vadd.xlane.f32.xlu1 %v2385_v53  ;;  %2637 = vmatprep.subr.bf16.mxu1 %v2480_v63  ;;  %v2421_v53 = vld [vmem:[%s5801_s16 + $0x48] sm:$0xff] }
 0xca5   : > { %2638 = vmatpush1.bf16.msra.mxu1 %v2479_v4  ;;  %v2469_v63 = vld [vmem:[%s5801_s16 + $0x1c8] sm:$0xff]  ;;  %v2487_v4 = vpack.c.bf16 %v2438_v61, %v2422_v60  ;;  %v2975_v60 = vld [vmem:[%s5803_s18 + $0x118] sm:$0xff]  ;;  %v2960_v61 = vld [vmem:[%s5803_s18 + $0xa0] sm:$0xff] }
 0xca6   : > { %2639 = vmatprep.subr.bf16.mxu1 %v2496_v14  ;;  %v2502_v8 = vpack.c.bf16 %v2469_v63, %v2453_v62  ;;  %v2441_v14 = vld [vmem:[%s5801_s16 + $0xe8] sm:$0xff]  ;;  %v2992_v63 = vld [vmem:[%s5803_s18 + $0x1a0] sm:$0xff] }
 0xca7   : > { %v2490_v23 = vpack.c.bf16 %v2441_v14, %v2425_v13  ;;  %v2961_v62 = vld [vmem:[%s5803_s18 + $0xa8] sm:$0xff]  ;;  %v2994_v13 = vld [vmem:[%s5803_s18 + $0x1b0] sm:$0xff]  ;;  %v2995_v14 = vld [vmem:[%s5803_s18 + $0x1b8] sm:$0xff] }
 0xca8   : > { %v3222_v6 = vpack.c.bf16 %v2961_v62, %v2960_v61  ;;  %v2970_v61 = vld [vmem:[%s5803_s18 + $0xf0] sm:$0xff]  ;;  %v2971_v62 = vld [vmem:[%s5803_s18 + $0xf8] sm:$0xff] }
 0xca9   : > { %2640 = vmatpush1.bf16.msra.mxu1 %v2495_v18  ;;  %v2503_v18 = vpack.c.bf16 %v2470_v11, %v2454_v10  ;;  %v2962_v10 = vld [vmem:[%s5803_s18 + $0xb0] sm:$0xff]  ;;  %v2963_v11 = vld [vmem:[%s5803_s18 + $0xb8] sm:$0xff] }
 0xcaa   : > { %2719 = vmatprep.subr.bf16.mxu1 %v2484_v27  ;;  %v2442_v27 = vld [vmem:[%s5801_s16 + $0xf0] sm:$0xff] }
 0xd31   : > { %v2387_v54 = vpop.xlane.xlu1 %2386 }
 0xd32   : > { %v2388_v7 = vmul.f32 0.03125, %v2387_v54  ;;  %v2437_v54 = vld [vmem:[%s5801_s16 + $0xc8] sm:$0xff] }
 0xd33   : > { %v2486_v12 = vpack.c.bf16 %v2437_v54, %v2421_v53  ;;  %v2958_v53 = vld [vmem:[%s5803_s18 + $0x90] sm:$0xff]  ;;  %v2959_v54 = vld [vmem:[%s5803_s18 + $0x98] sm:$0xff] }
 0xd34   : > { %v2389_v21 = vsub.f32 %v2382_v52, %v2388_v7  ;;  %v2466_v52 = vld [vmem:[%s5801_s16 + $0x1b0] sm:$0xff]  ;;  %v2423_v7 = vld [vmem:[%s5801_s16 + $0x58] sm:$0xff]  ;;  %v3221_v58 = vpack.c.bf16 %v2959_v54, %v2958_v53  ;;  %v2968_v53 = vld [vmem:[%s5803_s18 + $0xe0] sm:$0xff] }
 0xd35   : > { %v2969_v54 = vld [vmem:[%s5803_s18 + $0xe8] sm:$0xff] }
 0xd36   : > { %v2390_v55 = vmul.f32 %v2389_v21, %v2389_v21 }
 0xd38   : > { %v2391_v56 = vsel %vm713_vm1, %v2390_v55, 0.0  ;;  %v2497_v55 = vpack.c.bf16 %v2464_v47, %v2448_v46  ;;  %v2940_v46 = vld [vmem:[%s5803_s18] sm:$0xff]  ;;  %v2941_v47 = vld [vmem:[%s5803_s18 + $0x8] sm:$0xff] }
 0xd39   : > { %2392 = vadd.xlane.f32.xlu0 %v2391_v56  ;;  %v2499_v56 = vpack.c.bf16 %v2466_v52, %v2450_v51  ;;  %v2972_v51 = vld [vmem:[%s5803_s18 + $0x100] sm:$0xff]  ;;  %v2973_v52 = vld [vmem:[%s5803_s18 + $0x108] sm:$0xff] }
 0xdc6   : > { %v2393_v28 = vpop.xlane.xlu0 %2392 }
 0xdc7   : > { %v2394_v29 = vmul.f32 0.03125, %v2393_v28  ;;  %v2457_v28 = vld [vmem:[%s5801_s16 + $0x168] sm:$0xff] }
 0xdc9   : > { %v2395_v30 = vadd.f32 1e-05, %v2394_v29  ;;  %v2473_v29 = vld [vmem:[%s5801_s16 + $0x1e8] sm:$0xff] }
 0xdca   : > { %v2506_v35 = vpack.c.bf16 %v2473_v29, %v2457_v28  ;;  %v2996_v28 = vld [vmem:[%s5803_s18 + $0x1c0] sm:$0xff]  ;;  %v2997_v29 = vld [vmem:[%s5803_s18 + $0x1c8] sm:$0xff] }
 0xdcb   : > { %4224 = vrsqrt.f32 %v2395_v30  ;;  %v2459_v30 = vld [vmem:[%s5801_s16 + $0x178] sm:$0xff] }
 0xdd5   : > { %v4225_v3 = vpop.eup %4224 }
 0xdd6   : > { %v2397_v32 = vmul.f32 %v4225_v3, %v2389_v21  ;;  %v2439_v21 = vld [vmem:[%s5801_s16 + $0xd8] sm:$0xff] }
 0xdd7   : > { %v2488_v59 = vpack.c.bf16 %v2439_v21, %v2423_v7  ;;  %v2475_v3 = vld [vmem:[%s5801_s16 + $0x1f8] sm:$0xff]  ;;  %v2990_v7 = vld [vmem:[%s5803_s18 + $0x190] sm:$0xff] }
 0xdd8   : > { %v2404_v36 = vmul.f32 %v3807_v31, %v2397_v32  ;;  %v2489_v31 = vpack.c.bf16 %v2440_v22, %v2424_v20  ;;  %v2491_v32 = vpack.c.bf16 %v2442_v27, %v2426_v26  ;;  %v2991_v21 = vld [vmem:[%s5803_s18 + $0x198] sm:$0xff]  ;;  %v3223_v20 = vpack.c.bf16 %v2963_v11, %v2962_v10  ;;  %v2964_v26 = vld [vmem:[%s5803_s18 + $0xc0] sm:$0xff]  ;;  %v2965_v27 = vld [vmem:[%s5803_s18 + $0xc8] sm:$0xff] }
 0xdd9   : > { %v3239_v22 = vpack.c.bf16 %v2995_v14, %v2994_v13  ;;  %v3020_v10 = vld [vmem:[%s5803_s18 + $0x280] sm:$0xff]  ;;  %v3021_v11 = vld [vmem:[%s5803_s18 + $0x288] sm:$0xff] }
 0xdda   : > { %v4766_v43 = vadd.f32 %v3808_v33, %v2404_v36  ;;  %v2456_v33 = vld [vmem:[%s5801_s16 + $0x160] sm:$0xff]  ;;  %v2508_v36 = vpack.c.bf16 %v2475_v3, %v2459_v30  ;;  %v3252_v14 = vpack.c.bf16 %v3021_v11, %v3020_v10  ;;  %v3057_v11 = vld [vmem:[%s5803_s18 + $0x3a8] sm:$0xff] }
 0xddb   : > { %v3052_v13 = vld [vmem:[%s5803_s18 + $0x380] sm:$0xff] }
 0xddc   : > { %v4776_v48 = vpack.c.bf16 %v4766_v43, %v4766_v43  ;;  %v3056_v10 = vld [vmem:[%s5803_s18 + $0x3a0] sm:$0xff] }
 0xdde   : > { %3809 = vmatmul.mubr.msk.bf16.vlgmr.msra.gmra.mrb[24].mxu0 %vm713_vm1, %v4776_v48  ;;  %3810 = vmatmul.mubr.msk.bf16.vlgmr.msra.gmra.mrb[28].mxu1 %vm713_vm1, %v4776_v48 }
 0xddf   : > { %2679 = vmatpush1.bf16.msra.mxu0 %v2481_v44  ;;  %2720 = vmatpush1.bf16.msra.mxu1 %v2483_v45  ;;  %v2505_v44 = vpack.c.bf16 %v2472_v34, %v2456_v33  ;;  %v2507_v45 = vpack.c.bf16 %v2474_v39, %v2458_v38  ;;  %v3224_v33 = vpack.c.bf16 %v2965_v27, %v2964_v26  ;;  %v2966_v38 = vld [vmem:[%s5803_s18 + $0xd0] sm:$0xff]  ;;  %v2967_v39 = vld [vmem:[%s5803_s18 + $0xd8] sm:$0xff]  ;;  %v2519_v26 = vsub.s32 1, %v4433_v19 }
 0xde0   : > { %2680 = vmatprep.subr.bf16.mxu0 %v2498_v49  ;;  %2721 = vmatprep.subr.bf16.mxu1 %v2500_v50  ;;  %v3220_v49 = vpack.c.bf16 %v2957_v37, %v2956_v40  ;;  %v3236_v50 = vpack.c.bf16 %v2989_v42, %v2988_v41  ;;  %v3240_v34 = vpack.c.bf16 %v2997_v29, %v2996_v28  ;;  %v2998_v40 = vld [vmem:[%s5803_s18 + $0x1d0] sm:$0xff]  ;;  %v2999_v37 = vld [vmem:[%s5803_s18 + $0x1d8] sm:$0xff]  ;;  %v2527_v27 = vsub.s32 3, %v4433_v19 }
 0xde1   : > { %2710 = vmatprep.mubr.bf16.mxu0 %v4252_v24  ;;  %2751 = vmatprep.mubr.bf16.mxu1 %v4252_v24 }
 0xde3   : > { %2681 = vmatpush1.bf16.msra.mxu0 %v2497_v55  ;;  %2722 = vmatpush1.bf16.msra.mxu1 %v2499_v56  ;;  %v3212_v55 = vpack.c.bf16 %v2941_v47, %v2940_v46  ;;  %v3228_v56 = vpack.c.bf16 %v2973_v52, %v2972_v51  ;;  %v3241_v46 = vpack.c.bf16 %v2999_v37, %v2998_v40  ;;  %v2951_v47 = vld [vmem:[%s5803_s18 + $0x58] sm:$0xff] }
 0xde4   : > { %2760 = vmatprep.subr.bf16.mxu0 %v2486_v12  ;;  %2801 = vmatprep.subr.bf16.mxu1 %v2488_v59  ;;  %v3237_v12 = vpack.c.bf16 %v2991_v21, %v2990_v7  ;;  %v2974_v59 = vld [vmem:[%s5803_s18 + $0x110] sm:$0xff]  ;;  %v3000_v7 = vld [vmem:[%s5803_s18 + $0x1e0] sm:$0xff]  ;;  %v3226_v21 = vpack.c.bf16 %v2969_v54, %v2968_v53 }
 0xde5   : > { %v3022_v53 = vld [vmem:[%s5803_s18 + $0x290] sm:$0xff] }
 0xde6   : > { %3811 = vmatmul.mubr.msk.bf16.vlgmr.msra.gmra.mrb[28].mxu0 %vm713_vm1, %v4776_v48  ;;  %3812 = vmatmul.mubr.msk.bf16.vlgmr.msra.gmra.mrb[32].mxu1 %vm713_vm1, %v4776_v48 }
 0xde7   : > { %2761 = vmatpush1.bf16.msra.mxu0 %v2485_v2  ;;  %2802 = vmatpush1.bf16.msra.mxu1 %v2487_v4  ;;  %v3229_v2 = vpack.c.bf16 %v2975_v60, %v2974_v59  ;;  %v2944_v4 = vld [vmem:[%s5803_s18 + $0x20] sm:$0xff]  ;;  %v2985_v59 = vld [vmem:[%s5803_s18 + $0x168] sm:$0xff] }
 0xde8   : > { %2762 = vmatprep.subr.bf16.mxu0 %v2502_v8  ;;  %2803 = vmatprep.subr.bf16.mxu1 %v2504_v9  ;;  %v3238_v8 = vpack.c.bf16 %v2993_v0, %v2992_v63  ;;  %v2977_v9 = vld [vmem:[%s5803_s18 + $0x128] sm:$0xff]  ;;  %v3214_v15 = vpack.c.bf16 %v2945_v5, %v2944_v4  ;;  %v3002_v63 = vld [vmem:[%s5803_s18 + $0x1f0] sm:$0xff]  ;;  %v3227_v0 = vpack.c.bf16 %v2971_v62, %v2970_v61  ;;  %v2955_v4 = vld [vmem:[%s5803_s18 + $0x78] sm:$0xff] }
 0xde9   : > { %2792 = vmatprep.mubr.bf16.mxu0 %v4252_v24  ;;  %2833 = vmatprep.mubr.bf16.mxu1 %v4252_v24  ;;  %v3006_v61 = vld [vmem:[%s5803_s18 + $0x210] sm:$0xff]  ;;  %v3007_v62 = vld [vmem:[%s5803_s18 + $0x218] sm:$0xff] }
 0xdeb   : > { %2763 = vmatpush1.bf16.msra.mxu0 %v2501_v17  ;;  %2804 = vmatpush1.bf16.msra.mxu1 %v2503_v18  ;;  %v2946_v17 = vld [vmem:[%s5803_s18 + $0x30] sm:$0xff]  ;;  %v2947_v18 = vld [vmem:[%s5803_s18 + $0x38] sm:$0xff] }
 0xdec   : > { %2842 = vmatprep.subr.bf16.mxu0 %v2490_v23  ;;  %2883 = vmatprep.subr.bf16.mxu1 %v2492_v25  ;;  %v2978_v23 = vld [vmem:[%s5803_s18 + $0x130] sm:$0xff]  ;;  %v2979_v25 = vld [vmem:[%s5803_s18 + $0x138] sm:$0xff]  ;;  %v3215_v30 = vpack.c.bf16 %v2947_v18, %v2946_v17  ;;  %v2539_v17 = vsub.s32 6, %v4433_v19  ;;  %v5110_v18 = vld [vmem:[%s5802_s17 + $0x8] sm:$0xff] }
 0xded   : > { %v3231_v3 = vpack.c.bf16 %v2979_v25, %v2978_v23  ;;  %v2523_v23 = vsub.s32 2, %v4433_v19  ;;  %v5122_v25 = vld [vmem:[%s5802_s17] sm:$0xff] }
 0xdee   : > { %3813 = vmatmul.mubr.msk.bf16.vlgmr.msra.gmra.mrb[32].mxu0 %vm713_vm1, %v4776_v48  ;;  %3814 = vmatmul.mubr.msk.bf16.vlgmr.msra.gmra.mrb[36].mxu1 %vm713_vm1, %v4776_v48 }
 0xdef   : > { %2843 = vmatpush1.bf16.msra.mxu0 %v2489_v31  ;;  %2884 = vmatpush1.bf16.msra.mxu1 %v2491_v32  ;;  %v2948_v31 = vld [vmem:[%s5803_s18 + $0x40] sm:$0xff]  ;;  %v2949_v32 = vld [vmem:[%s5803_s18 + $0x48] sm:$0xff]  ;;  %v2524_v29 = vrot.slane %v5122_v25, %v2523_v23 }
 0xdf0   : > { %2844 = vmatprep.subr.bf16.mxu0 %v2506_v35  ;;  %2885 = vmatprep.subr.bf16.mxu1 %v2508_v36  ;;  %v2980_v35 = vld [vmem:[%s5803_s18 + $0x140] sm:$0xff]  ;;  %v2981_v36 = vld [vmem:[%s5803_s18 + $0x148] sm:$0xff]  ;;  %v3216_v41 = vpack.c.bf16 %v2949_v32, %v2948_v31 }
 0xdf1   : > { %2874 = vmatprep.mubr.bf16.mxu0 %v4252_v24  ;;  %2915 = vmatprep.mubr.bf16.mxu1 %v4252_v24  ;;  %v2942_v24 = vld [vmem:[%s5803_s18 + $0x10] sm:$0xff]  ;;  %v3232_v42 = vpack.c.bf16 %v2981_v36, %v2980_v35 }
 0xdf2   : > { %v3213_v1 = vpack.c.bf16 %v2943_v57, %v2942_v24  ;;  %v2953_v24 = vld [vmem:[%s5803_s18 + $0x68] sm:$0xff] }
 0xdf3   : > { %2845 = vmatpush1.bf16.msra.mxu0 %v2505_v44  ;;  %2886 = vmatpush1.bf16.msra.mxu1 %v2507_v45  ;;  %v2950_v44 = vld [vmem:[%s5803_s18 + $0x50] sm:$0xff]  ;;  %v3225_v45 = vpack.c.bf16 %v2967_v39, %v2966_v38  ;;  %v2535_v38 = vsub.s32 5, %v4433_v19 }
 0xdf4   : > { %3869 = vmatprep.subr.bf16.mxu0 %v3220_v49  ;;  %3891 = vmatprep.subr.bf16.mxu1 %v3236_v50  ;;  %v2982_v49 = vld [vmem:[%s5803_s18 + $0x150] sm:$0xff]  ;;  %v2983_v50 = vld [vmem:[%s5803_s18 + $0x158] sm:$0xff]  ;;  %v3217_v51 = vpack.c.bf16 %v2951_v47, %v2950_v44  ;;  %v3004_v44 = vld [vmem:[%s5803_s18 + $0x200] sm:$0xff] }
 0xdf5   : > { %v3233_v52 = vpack.c.bf16 %v2983_v50, %v2982_v49 }
 0xdf6   : > { %3815 = vmatmul.mubr.msk.bf16.vlgmr.msra.gmra.mrb[36].mxu0 %vm713_vm1, %v4776_v48  ;;  %3816 = vmatmul.mubr.msk.bf16.vlgmr.msra.gmra.mrb[40].mxu1 %vm713_vm1, %v4776_v48  ;;  %v2976_v48 = vld [vmem:[%s5803_s18 + $0x120] sm:$0xff] }
 0xdf7   : > { %3870 = vmatpush3.bf16.msra.mxu0 %v3212_v55  ;;  %3892 = vmatpush3.bf16.msra.mxu1 %v3228_v56  ;;  %v3230_v16 = vpack.c.bf16 %v2977_v9, %v2976_v48  ;;  %v3001_v55 = vld [vmem:[%s5803_s18 + $0x1e8] sm:$0xff]  ;;  %v2952_v56 = vld [vmem:[%s5803_s18 + $0x60] sm:$0xff]  ;;  %v2987_v48 = vld [vmem:[%s5803_s18 + $0x178] sm:$0xff] }
 0xdf8   : > { %3871 = vmatprep.subr.bf16.mxu0 %v3221_v58  ;;  %3893 = vmatprep.subr.bf16.mxu1 %v3237_v12  ;;  %v3242_v57 = vpack.c.bf16 %v3001_v55, %v3000_v7  ;;  %v3218_v58 = vpack.c.bf16 %v2953_v24, %v2952_v56  ;;  %v2984_v12 = vld [vmem:[%s5803_s18 + $0x160] sm:$0xff]  ;;  %v3054_v55 = vld [vmem:[%s5803_s18 + $0x390] sm:$0xff]  ;;  %v3055_v56 = vld [vmem:[%s5803_s18 + $0x398] sm:$0xff]  ;;  %v2536_v24 = vrot.slane %v5122_v25, %v2535_v38 }
 0xdf9   : > { %v3234_v60 = vpack.c.bf16 %v2985_v59, %v2984_v12 }
 0xdfb   : > { %3872 = vmatpush3.bf16.msra.mxu0 %v3213_v1  ;;  %3894 = vmatpush3.bf16.msra.mxu1 %v3229_v2  ;;  %v3003_v1 = vld [vmem:[%s5803_s18 + $0x1f8] sm:$0xff]  ;;  %v2954_v2 = vld [vmem:[%s5803_s18 + $0x70] sm:$0xff] }
 0xdfc   : > { %3873 = vmatprep.subr.bf16.mxu0 %v3222_v6  ;;  %3895 = vmatprep.subr.bf16.mxu1 %v3238_v8  ;;  %v3243_v5 = vpack.c.bf16 %v3003_v1, %v3002_v63  ;;  %v3219_v6 = vpack.c.bf16 %v2955_v4, %v2954_v2  ;;  %v2986_v8 = vld [vmem:[%s5803_s18 + $0x170] sm:$0xff]  ;;  %v3269_v2 = vpack.c.bf16 %v3055_v56, %v3054_v55  ;;  %v3043_v56 = vld [vmem:[%s5803_s18 + $0x338] sm:$0xff] }
 0xdfd   : > { %v3235_v9 = vpack.c.bf16 %v2987_v48, %v2986_v8  ;;  %v3038_v4 = vld [vmem:[%s5803_s18 + $0x310] sm:$0xff] }
 0xdff   : > { %3874 = vmatpush3.bf16.msra.mxu0 %v3214_v15  ;;  %3896 = vmatpush3.bf16.msra.mxu1 %v3230_v16  ;;  %v3053_v15 = vld [vmem:[%s5803_s18 + $0x388] sm:$0xff] }
 0xe00   : > { %3875 = vmatprep.subr.bf16.mxu0 %v3223_v20  ;;  %3897 = vmatprep.subr.bf16.mxu1 %v3239_v22  ;;  %v3268_v16 = vpack.c.bf16 %v3053_v15, %v3052_v13  ;;  %v5115_v20 = vrot.slane %v5110_v18, %v2539_v17  ;;  %v2515_v22 = vsub.s32 0, %v4433_v19  ;;  %v3245_v15 = vpack.c.bf16 %v3007_v62, %v3006_v61 }
 0xe02   : > { %v2516_v28 = vrot.slane %v5122_v25, %v2515_v22 }
 0xe03   : > { %3876 = vmatpush3.bf16.msra.mxu0 %v3215_v30  ;;  %3898 = vmatpush3.bf16.msra.mxu1 %v3231_v3  ;;  %v2520_v30 = vrot.slane %v5122_v25, %v2519_v26  ;;  %v2528_v3 = vrot.slane %v5122_v25, %v2527_v27 }
 0xe04   : > { %3877 = vmatprep.subr.bf16.mxu0 %v3224_v33  ;;  %3899 = vmatprep.subr.bf16.mxu1 %v3240_v34 }
 0xe07   : > { %3878 = vmatpush3.bf16.msra.mxu0 %v3216_v41  ;;  %3900 = vmatpush3.bf16.msra.mxu1 %v3232_v42  ;;  %v2543_v42 = vsub.s32 7, %v4433_v19 }
 0xe08   : > { %3879 = vmatprep.subr.bf16.mxu0 %v3225_v45  ;;  %3901 = vmatprep.subr.bf16.mxu1 %v3241_v46  ;;  %v3005_v45 = vld [vmem:[%s5803_s18 + $0x208] sm:$0xff]  ;;  %v3036_v46 = vld [vmem:[%s5803_s18 + $0x300] sm:$0xff] }
 0xe09   : > { %v2544_v59 = vrot.slane %v5122_v25, %v2543_v42 }
 0xe0b   : > { %3880 = vmatpush3.bf16.msra.mxu0 %v3217_v51  ;;  %3902 = vmatpush3.bf16.msra.mxu1 %v3233_v52  ;;  %v3037_v52 = vld [vmem:[%s5803_s18 + $0x308] sm:$0xff] }
 0xe0c   : > { %3881 = vmatprep.subr.bf16.mxu0 %v3226_v21  ;;  %3903 = vmatprep.subr.bf16.mxu1 %v3242_v57  ;;  %v3023_v21 = vld [vmem:[%s5803_s18 + $0x298] sm:$0xff]  ;;  %v3244_v57 = vpack.c.bf16 %v3005_v45, %v3004_v44 }
 0xe0d   : > { %v3253_v1 = vpack.c.bf16 %v3023_v21, %v3022_v53  ;;  %v3027_v45 = vld [vmem:[%s5803_s18 + $0x2b8] sm:$0xff] }
 0xe0e   : > { %v3011_v21 = vld [vmem:[%s5803_s18 + $0x238] sm:$0xff] }
 0xe0f   : > { %3882 = vmatpush3.bf16.msra.mxu0 %v3218_v58  ;;  %3904 = vmatpush3.bf16.msra.mxu1 %v3234_v60  ;;  %v3260_v60 = vpack.c.bf16 %v3037_v52, %v3036_v46  ;;  %v3058_v46 = vld [vmem:[%s5803_s18 + $0x3b0] sm:$0xff] }
 0xe10   : > { %3883 = vmatprep.subr.bf16.mxu0 %v3227_v0  ;;  %3905 = vmatprep.subr.bf16.mxu1 %v3243_v5  ;;  %v3039_v5 = vld [vmem:[%s5803_s18 + $0x318] sm:$0xff] }
 0xe13   : > { %3884 = vmatpush3.bf16.msra.mxu0 %v3219_v6  ;;  %3906 = vmatpush3.bf16.msra.mxu1 %v3235_v9  ;;  %v3024_v6 = vld [vmem:[%s5803_s18 + $0x2a0] sm:$0xff]  ;;  %v3025_v9 = vld [vmem:[%s5803_s18 + $0x2a8] sm:$0xff] }
 0xe14   : > { %3913 = vmatprep.subr.bf16.mxu0 %v3252_v14  ;;  %3935 = vmatprep.subr.bf16.mxu1 %v3268_v16 }
 0xeb1   : > { %v2630_v31 = vpop.f32.mrb[24].mxu0  ;;  %v2671_v32 = vpop.f32.mrb[28].mxu1 }
 0xeb2   : > { %v2631_v33 = vadd.f32 %v2630_v31, %v2516_v28  ;;  %v2672_v34 = vadd.f32 %v2671_v32, %v2524_v29  ;;  %v2632_v35 = vpop.f32.mrb[25].mxu0  ;;  %v2673_v36 = vpop.f32.mrb[29].mxu1  ;;  %v3008_v31 = vld [vmem:[%s5803_s18 + $0x220] sm:$0xff]  ;;  %v3009_v32 = vld [vmem:[%s5803_s18 + $0x228] sm:$0xff] }
 0xeb3   : > { %v2633_v39 = vadd.f32 %v2632_v35, %v2520_v30  ;;  %v2674_v40 = vadd.f32 %v2673_v36, %v2528_v3  ;;  %v2634_v37 = vpop.f32.mrb[26].mxu0  ;;  %v2675_v41 = vpop.f32.mrb[30].mxu1  ;;  %v3261_v3 = vpack.c.bf16 %v3039_v5, %v3038_v4  ;;  %v3254_v35 = vpack.c.bf16 %v3025_v9, %v3024_v6  ;;  %v3012_v6 = vld [vmem:[%s5803_s18 + $0x240] sm:$0xff]  ;;  %v3013_v9 = vld [vmem:[%s5803_s18 + $0x248] sm:$0xff] }
 0xeb4   : > { %v2924_v47 = vmax.f32 %v2631_v33, 0.0  ;;  %v2926_v49 = vmax.f32 %v2672_v34, 0.0  ;;  %v2635_v50 = vpop.f32.mrb[27].mxu0  ;;  %v2676_v51 = vpop.f32.mrb[31].mxu1  ;;  %v3270_v36 = vpack.c.bf16 %v3057_v11, %v3056_v10  ;;  %v3026_v37 = vld [vmem:[%s5803_s18 + $0x2b0] sm:$0xff]  ;;  %v2531_v10 = vsub.s32 4, %v4433_v19 }
 0xeb5   : > { %v2925_v54 = vmax.f32 %v2633_v39, 0.0  ;;  %v2927_v7 = vmax.f32 %v2674_v40, 0.0  ;;  %v3040_v39 = vld [vmem:[%s5803_s18 + $0x320] sm:$0xff]  ;;  %v3041_v40 = vld [vmem:[%s5803_s18 + $0x328] sm:$0xff]  ;;  %v2556_v50 = vrot.slane %v5110_v18, %v2523_v23  ;;  %v3246_v51 = vpack.c.bf16 %v3009_v32, %v3008_v31  ;;  %v3042_v23 = vld [vmem:[%s5803_s18 + $0x330] sm:$0xff] }
 0xeb6   : > { %v3196_v63 = vpack.c.bf16 %v2924_v47, %v2924_v47  ;;  %v3198_v0 = vpack.c.bf16 %v2926_v49, %v2926_v49  ;;  %v3059_v47 = vld [vmem:[%s5803_s18 + $0x3b8] sm:$0xff]  ;;  %v2548_v49 = vrot.slane %v5110_v18, %v2515_v22  ;;  %v3255_v22 = vpack.c.bf16 %v3027_v45, %v3026_v37  ;;  %v3046_v37 = vld [vmem:[%s5803_s18 + $0x350] sm:$0xff] }
 0xeb7   : > { %v3197_v58 = vpack.c.bf16 %v2925_v54, %v2925_v54  ;;  %v3199_v12 = vpack.c.bf16 %v2927_v7, %v2927_v7  ;;  %v3262_v54 = vpack.c.bf16 %v3041_v40, %v3040_v39  ;;  %v3010_v7 = vld [vmem:[%s5803_s18 + $0x230] sm:$0xff]  ;;  %v3271_v55 = vpack.c.bf16 %v3059_v47, %v3058_v46  ;;  %v3063_v31 = vld [vmem:[%s5803_s18 + $0x3d8] sm:$0xff]  ;;  %v3033_v47 = vld [vmem:[%s5803_s18 + $0x2e8] sm:$0xff] }
 0xeb8   : > { %v3247_v4 = vpack.c.bf16 %v3011_v21, %v3010_v7  ;;  %v3263_v5 = vpack.c.bf16 %v3043_v56, %v3042_v23  ;;  %v2564_v32 = vrot.slane %v5110_v18, %v2531_v10  ;;  %v2532_v7 = vrot.slane %v5122_v25, %v2531_v10  ;;  %v3016_v56 = vld [vmem:[%s5803_s18 + $0x260] sm:$0xff]  ;;  %v3114_v19 = vld [vmem:[%s5803_s18 + $0x570] sm:$0xff] }
 0xeb9   : > { %v5185_v8 = vpop.f32.mrb[28].mxu0  ;;  %v5187_v48 = vpop.f32.mrb[32].mxu1  ;;  %3379 = vmatprep.mubr.bf16.mxu0 %v3197_v58  ;;  %3419 = vmatprep.mubr.bf16.mxu1 %v3199_v12  ;;  %v3029_v12 = vld [vmem:[%s5803_s18 + $0x2c8] sm:$0xff] }
 0xeba   : > { %v2714_v13 = vpop.f32.mrb[29].mxu0  ;;  %v2755_v14 = vpop.f32.mrb[33].mxu1  ;;  %3380 = vmatmul.mubr.bf16.vlgmr.msra.gmra.mrb[40].mxu0 %v3196_v63  ;;  %3420 = vmatmul.mubr.bf16.vlgmr.msra.gmra.mrb[44].mxu1 %v3198_v0 }
 0xebb   : > { %v2715_v16 = vadd.f32 %v2714_v13, %v2536_v24  ;;  %v2756_v28 = vadd.f32 %v2755_v14, %v2544_v59  ;;  %3914 = vmatpush3.bf16.msra.mxu0 %v3244_v57  ;;  %3936 = vmatpush3.bf16.msra.mxu1 %v3260_v60  ;;  %v2716_v29 = vpop.f32.mrb[30].mxu0  ;;  %v2757_v30 = vpop.f32.mrb[34].mxu1  ;;  %v3028_v24 = vld [vmem:[%s5803_s18 + $0x2c0] sm:$0xff]  ;;  %v3061_v60 = vld [vmem:[%s5803_s18 + $0x3c8] sm:$0xff] }
 0xebc   : > { %v2717_v33 = vpop.f32.mrb[31].mxu0  ;;  %v2758_v34 = vpop.f32.mrb[35].mxu1  ;;  %3915 = vmatprep.subr.bf16.mxu0 %v3253_v1  ;;  %3937 = vmatprep.subr.bf16.mxu1 %v3269_v2  ;;  %v3060_v59 = vld [vmem:[%s5803_s18 + $0x3c0] sm:$0xff]  ;;  %v3256_v14 = vpack.c.bf16 %v3029_v12, %v3028_v24  ;;  %v3030_v29 = vld [vmem:[%s5803_s18 + $0x2d0] sm:$0xff]  ;;  %v3031_v30 = vld [vmem:[%s5803_s18 + $0x2d8] sm:$0xff] }
 0xebd   : > { %v2929_v41 = vmax.f32 %v2715_v16, 0.0  ;;  %v2931_v44 = vmax.f32 %v2756_v28, 0.0  ;;  %v3044_v16 = vld [vmem:[%s5803_s18 + $0x340] sm:$0xff]  ;;  %v3045_v28 = vld [vmem:[%s5803_s18 + $0x348] sm:$0xff]  ;;  %v3248_v33 = vpack.c.bf16 %v3013_v9, %v3012_v6  ;;  %v3257_v39 = vpack.c.bf16 %v3031_v30, %v3030_v29 }
 0xebe   : > { %v3264_v34 = vpack.c.bf16 %v3045_v28, %v3044_v16  ;;  %v3048_v24 = vld [vmem:[%s5803_s18 + $0x360] sm:$0xff]  ;;  %v2560_v6 = vrot.slane %v5110_v18, %v2527_v27  ;;  %v3050_v16 = vld [vmem:[%s5803_s18 + $0x370] sm:$0xff]  ;;  %v3051_v28 = vld [vmem:[%s5803_s18 + $0x378] sm:$0xff] }
 0xebf   : > { %v3201_v52 = vpack.c.bf16 %v2929_v41, %v2929_v41  ;;  %v3203_v53 = vpack.c.bf16 %v2931_v44, %v2931_v44  ;;  %3916 = vmatpush3.bf16.msra.mxu0 %v3245_v15  ;;  %3938 = vmatpush3.bf16.msra.mxu1 %v3261_v3  ;;  %v3272_v15 = vpack.c.bf16 %v3061_v60, %v3060_v59  ;;  %v3062_v3 = vld [vmem:[%s5803_s18 + $0x3d0] sm:$0xff]  ;;  %v3047_v41 = vld [vmem:[%s5803_s18 + $0x358] sm:$0xff]  ;;  %v3032_v44 = vld [vmem:[%s5803_s18 + $0x2e0] sm:$0xff] }
 0xec0   : > { %3917 = vmatprep.subr.bf16.mxu0 %v3254_v35  ;;  %3939 = vmatprep.subr.bf16.mxu1 %v3270_v36  ;;  %v3014_v35 = vld [vmem:[%s5803_s18 + $0x250] sm:$0xff]  ;;  %v3015_v36 = vld [vmem:[%s5803_s18 + $0x258] sm:$0xff]  ;;  %v3273_v40 = vpack.c.bf16 %v3063_v31, %v3062_v3  ;;  %v3265_v23 = vpack.c.bf16 %v3047_v41, %v3046_v37  ;;  %v3258_v59 = vpack.c.bf16 %v3033_v47, %v3032_v44  ;;  %v3084_v29 = vld [vmem:[%s5803_s18 + $0x480] sm:$0xff] }
 0xec1   : > { %v2794_v57 = vpop.f32.mrb[32].mxu0  ;;  %v2835_v58 = vpop.f32.mrb[36].mxu1  ;;  %3459 = vmatprep.mubr.bf16.mxu0 %v3201_v52  ;;  %3499 = vmatprep.mubr.bf16.mxu1 %v3203_v53  ;;  %v3117_v3 = vld [vmem:[%s5803_s18 + $0x588] sm:$0xff]  ;;  %v3086_v44 = vld [vmem:[%s5803_s18 + $0x490] sm:$0xff] }
 0xec2   : > { %v5252_v61 = vadd.f32 %v2794_v57, %v2548_v49  ;;  %v5254_v62 = vadd.f32 %v2835_v58, %v2556_v50  ;;  %v5256_v63 = vpop.f32.mrb[33].mxu0  ;;  %v5258_v0 = vpop.f32.mrb[37].mxu1  ;;  %v3064_v49 = vld [vmem:[%s5803_s18 + $0x3e0] sm:$0xff]  ;;  %v3065_v50 = vld [vmem:[%s5803_s18 + $0x3e8] sm:$0xff]  ;;  %v2540_v57 = vrot.slane %v5122_v25, %v2539_v17  ;;  %v2552_v17 = vrot.slane %v5110_v18, %v2519_v26  ;;  %v3066_v25 = vld [vmem:[%s5803_s18 + $0x3f0] sm:$0xff] }
 0xec3   : > { %3918 = vmatpush3.bf16.msra.mxu0 %v3246_v51  ;;  %3940 = vmatpush3.bf16.msra.mxu1 %v3262_v54  ;;  %v2798_v1 = vpop.f32.mrb[34].mxu0  ;;  %v2839_v2 = vpop.f32.mrb[38].mxu1  ;;  %v3274_v60 = vpack.c.bf16 %v3065_v50, %v3064_v49  ;;  %v3018_v26 = vld [vmem:[%s5803_s18 + $0x270] sm:$0xff]  ;;  %v2838_v31 = vadd.f32 %v5258_v0, %v2560_v6  ;;  %v3100_v0 = vld [vmem:[%s5803_s18 + $0x500] sm:$0xff]  ;;  %v3101_v41 = vld [vmem:[%s5803_s18 + $0x508] sm:$0xff] }
 0xec4   : > { %v2799_v11 = vpop.f32.mrb[35].mxu0  ;;  %v2840_v13 = vpop.f32.mrb[39].mxu1  ;;  %3919 = vmatprep.subr.bf16.mxu0 %v3255_v22  ;;  %3941 = vmatprep.subr.bf16.mxu1 %v3271_v55  ;;  %v3249_v55 = vpack.c.bf16 %v3015_v36, %v3014_v35  ;;  %v3049_v1 = vld [vmem:[%s5803_s18 + $0x368] sm:$0xff]  ;;  %v3034_v2 = vld [vmem:[%s5803_s18 + $0x2f0] sm:$0xff]  ;;  %v2797_v30 = vadd.f32 %v5256_v63, %v2552_v17  ;;  %v3119_v49 = vld [vmem:[%s5803_s18 + $0x598] sm:$0xff] }
 0xec5   : > { %v3266_v10 = vpack.c.bf16 %v3049_v1, %v3048_v24  ;;  %v3019_v13 = vld [vmem:[%s5803_s18 + $0x278] sm:$0xff]  ;;  %v3118_v47 = vld [vmem:[%s5803_s18 + $0x590] sm:$0xff]  ;;  %v3120_v1 = vld [vmem:[%s5803_s18 + $0x5a0] sm:$0xff] }
 0xec6   : > { %v2933_v37 = vmax.f32 %v2797_v30, 0.0  ;;  %v3073_v6 = vld [vmem:[%s5803_s18 + $0x428] sm:$0xff]  ;;  %v3075_v30 = vld [vmem:[%s5803_s18 + $0x438] sm:$0xff] }
 0xec7   : > { %3920 = vmatpush3.bf16.msra.mxu0 %v3247_v4  ;;  %3942 = vmatpush3.bf16.msra.mxu1 %v3263_v5  ;;  %v3035_v4 = vld [vmem:[%s5803_s18 + $0x2f8] sm:$0xff] }
 0xec8   : > { %3921 = vmatprep.subr.bf16.mxu0 %v3256_v14  ;;  %3943 = vmatprep.subr.bf16.mxu1 %v3272_v15  ;;  %v3067_v5 = vld [vmem:[%s5803_s18 + $0x3f8] sm:$0xff]  ;;  %v3259_v11 = vpack.c.bf16 %v3035_v4, %v3034_v2  ;;  %v2713_v14 = vadd.f32 %v5185_v8, %v2532_v7  ;;  %v2754_v15 = vadd.f32 %v5187_v48, %v2540_v57  ;;  %v3085_v8 = vld [vmem:[%s5803_s18 + $0x488] sm:$0xff]  ;;  %v3116_v48 = vld [vmem:[%s5803_s18 + $0x580] sm:$0xff] }
 0xec9   : > { %v2876_v45 = vpop.f32.mrb[36].mxu0  ;;  %v2917_v46 = vpop.f32.mrb[40].mxu1  ;;  %v3275_v27 = vpack.c.bf16 %v3067_v5, %v3066_v25  ;;  %v3284_v35 = vpack.c.bf16 %v3085_v8, %v3084_v29  ;;  %v3300_v36 = vpack.c.bf16 %v3117_v3, %v3116_v48  ;;  %v3301_v57 = vpack.c.bf16 %v3119_v49, %v3118_v47  ;;  %v3121_v2 = vld [vmem:[%s5803_s18 + $0x5a8] sm:$0xff]  ;;  %v3072_v5 = vld [vmem:[%s5803_s18 + $0x420] sm:$0xff]  ;;  %v3074_v29 = vld [vmem:[%s5803_s18 + $0x430] sm:$0xff] }
 0xeca   : > { %v5310_v51 = vadd.f32 %v2876_v45, %v2564_v32  ;;  %v5313_v52 = vadd.f32 %v2917_v46, %v5115_v20  ;;  %v5315_v53 = vpop.f32.mrb[37].mxu0  ;;  %v5317_v54 = vpop.f32.mrb[41].mxu1  ;;  %v3017_v20 = vld [vmem:[%s5803_s18 + $0x268] sm:$0xff]  ;;  %v3251_v32 = vpack.c.bf16 %v3019_v13, %v3018_v26  ;;  %v2930_v63 = vmax.f32 %v2754_v15, 0.0  ;;  %v3087_v46 = vld [vmem:[%s5803_s18 + $0x498] sm:$0xff]  ;;  %v3090_v26 = vld [vmem:[%s5803_s18 + $0x4b0] sm:$0xff] }
 0xecb   : > { %3922 = vmatpush3.bf16.msra.mxu0 %v3248_v33  ;;  %3944 = vmatpush3.bf16.msra.mxu1 %v3264_v34  ;;  %v2880_v21 = vpop.f32.mrb[38].mxu0  ;;  %v2921_v22 = vpop.f32.mrb[42].mxu1  ;;  %v3250_v9 = vpack.c.bf16 %v3017_v20, %v3016_v56  ;;  %v3267_v33 = vpack.c.bf16 %v3051_v28, %v3050_v16  ;;  %v2928_v34 = vmax.f32 %v2713_v14, 0.0  ;;  %v2935_v45 = vmax.f32 %v2838_v31, 0.0  ;;  %v3102_v56 = vld [vmem:[%s5803_s18 + $0x510] sm:$0xff]  ;;  %v3091_v13 = vld [vmem:[%s5803_s18 + $0x4b8] sm:$0xff] }
 0xecc   : > { %v2881_v58 = vpop.f32.mrb[39].mxu0  ;;  %v2922_v12 = vpop.f32.mrb[43].mxu1  ;;  %3923 = vmatprep.subr.bf16.mxu0 %v3257_v39  ;;  %3945 = vmatprep.subr.bf16.mxu1 %v3273_v40  ;;  %v3068_v39 = vld [vmem:[%s5803_s18 + $0x400] sm:$0xff]  ;;  %v3069_v40 = vld [vmem:[%s5803_s18 + $0x408] sm:$0xff]  ;;  %v3202_v21 = vpack.c.bf16 %v2930_v63, %v2930_v63  ;;  %v3292_v22 = vpack.c.bf16 %v3101_v41, %v3100_v0  ;;  %v3205_v20 = vpack.c.bf16 %v2933_v37, %v2933_v37  ;;  %v3122_v14 = vld [vmem:[%s5803_s18 + $0x5b0] sm:$0xff] }
 0xecd   : > { %v3276_v50 = vpack.c.bf16 %v3069_v40, %v3068_v39  ;;  %v3200_v7 = vpack.c.bf16 %v2928_v34, %v2928_v34  ;;  %v3285_v24 = vpack.c.bf16 %v3087_v46, %v3086_v44  ;;  %v3103_v58 = vld [vmem:[%s5803_s18 + $0x518] sm:$0xff]  ;;  %v3088_v12 = vld [vmem:[%s5803_s18 + $0x4a0] sm:$0xff]  ;;  %v3287_v28 = vpack.c.bf16 %v3091_v13, %v3090_v26  ;;  %v3106_v8 = vld [vmem:[%s5803_s18 + $0x530] sm:$0xff] }
 0xece   : > { %v3293_v17 = vpack.c.bf16 %v3103_v58, %v3102_v56  ;;  %v3123_v15 = vld [vmem:[%s5803_s18 + $0x5b8] sm:$0xff]  ;;  %v3092_v31 = vld [vmem:[%s5803_s18 + $0x4c0] sm:$0xff]  ;;  %v3125_v34 = vld [vmem:[%s5803_s18 + $0x5c8] sm:$0xff]  ;;  %v3279_v63 = vpack.c.bf16 %v3075_v30, %v3074_v29  ;;  %v2576_v26 = vrot.slane %v5110_v18, %v2543_v42 }
 0xecf   : > { %3924 = vmatpush3.bf16.msra.mxu0 %v3249_v55  ;;  %3946 = vmatpush3.bf16.msra.mxu1 %v3265_v23  ;;  %v3070_v55 = vld [vmem:[%s5803_s18 + $0x410] sm:$0xff]  ;;  %v3071_v23 = vld [vmem:[%s5803_s18 + $0x418] sm:$0xff]  ;;  %v3303_v48 = vpack.c.bf16 %v3123_v15, %v3122_v14  ;;  %v3076_v39 = vld [vmem:[%s5803_s18 + $0x440] sm:$0xff] }
 0xed0   : > { %3925 = vmatprep.subr.bf16.mxu0 %v3258_v59  ;;  %3947 = vmatprep.subr.bf16.mxu1 %v3274_v60  ;;  %v3089_v59 = vld [vmem:[%s5803_s18 + $0x4a8] sm:$0xff]  ;;  %v3207_v60 = vpack.c.bf16 %v2935_v45, %v2935_v45  ;;  %v3277_v4 = vpack.c.bf16 %v3071_v23, %v3070_v55  ;;  %v3107_v3 = vld [vmem:[%s5803_s18 + $0x538] sm:$0xff]  ;;  %v3108_v37 = vld [vmem:[%s5803_s18 + $0x540] sm:$0xff] }
 0xed1   : > { %v3286_v25 = vpack.c.bf16 %v3089_v59, %v3088_v12  ;;  %v3077_v40 = vld [vmem:[%s5803_s18 + $0x448] sm:$0xff]  ;;  %v3094_v44 = vld [vmem:[%s5803_s18 + $0x4d0] sm:$0xff]  ;;  %v3095_v45 = vld [vmem:[%s5803_s18 + $0x4d8] sm:$0xff] }
 0xed2   : > { %v3109_v41 = vld [vmem:[%s5803_s18 + $0x548] sm:$0xff]  ;;  %v3126_v46 = vld [vmem:[%s5803_s18 + $0x5d0] sm:$0xff]  ;;  %v3127_v47 = vld [vmem:[%s5803_s18 + $0x5d8] sm:$0xff]  ;;  %v3280_v49 = vpack.c.bf16 %v3077_v40, %v3076_v39 }
 0xed3   : > { %3926 = vmatpush3.bf16.msra.mxu0 %v3250_v9  ;;  %3948 = vmatpush3.bf16.msra.mxu1 %v3266_v10  ;;  %v3104_v9 = vld [vmem:[%s5803_s18 + $0x520] sm:$0xff]  ;;  %v3302_v10 = vpack.c.bf16 %v3121_v2, %v3120_v1  ;;  %v3110_v55 = vld [vmem:[%s5803_s18 + $0x550] sm:$0xff]  ;;  %v3305_v23 = vpack.c.bf16 %v3127_v47, %v3126_v46  ;;  %v3111_v56 = vld [vmem:[%s5803_s18 + $0x558] sm:$0xff] }
 0xed4   : > { %3927 = vmatprep.subr.bf16.mxu0 %v3259_v11  ;;  %3949 = vmatprep.subr.bf16.mxu1 %v3275_v27  ;;  %v3105_v11 = vld [vmem:[%s5803_s18 + $0x528] sm:$0xff]  ;;  %v3278_v27 = vpack.c.bf16 %v3073_v6, %v3072_v5  ;;  %v3297_v59 = vpack.c.bf16 %v3111_v56, %v3110_v55  ;;  %v3080_v1 = vld [vmem:[%s5803_s18 + $0x460] sm:$0xff]  ;;  %v3098_v5 = vld [vmem:[%s5803_s18 + $0x4f0] sm:$0xff] }
 0xed5   : > { %v3294_v16 = vpack.c.bf16 %v3105_v11, %v3104_v9  ;;  %v3129_v58 = vld [vmem:[%s5803_s18 + $0x5e8] sm:$0xff]  ;;  %v3099_v6 = vld [vmem:[%s5803_s18 + $0x4f8] sm:$0xff]  ;;  %v2568_v9 = vrot.slane %v5110_v18, %v2535_v38  ;;  %v3082_v38 = vld [vmem:[%s5803_s18 + $0x470] sm:$0xff] }
 0xed6   : > { %v3081_v2 = vld [vmem:[%s5803_s18 + $0x468] sm:$0xff]  ;;  %v3131_v11 = vld [vmem:[%s5803_s18 + $0x5f8] sm:$0xff]  ;;  %v3291_v15 = vpack.c.bf16 %v3099_v6, %v3098_v5  ;;  %v3180_v30 = vld [vmem:[%s5803_s18 + $0x780] sm:$0xff] }
 0xed7   : > { %3928 = vmatpush3.bf16.msra.mxu0 %v3251_v32  ;;  %3950 = vmatpush3.bf16.msra.mxu1 %v3267_v33  ;;  %v3093_v32 = vld [vmem:[%s5803_s18 + $0x4c8] sm:$0xff]  ;;  %v3124_v33 = vld [vmem:[%s5803_s18 + $0x5c0] sm:$0xff]  ;;  %v3282_v13 = vpack.c.bf16 %v3081_v2, %v3080_v1  ;;  %v3115_v42 = vld [vmem:[%s5803_s18 + $0x578] sm:$0xff]  ;;  %v2879_v29 = vadd.f32 %v5315_v53, %v2568_v9 }
 0xed8   : > { %3957 = vmatprep.subr.bf16.mxu0 %v3284_v35  ;;  %3979 = vmatprep.subr.bf16.mxu1 %v3300_v36  ;;  %v3295_v35 = vpack.c.bf16 %v3107_v3, %v3106_v8  ;;  %v3288_v36 = vpack.c.bf16 %v3093_v32, %v3092_v31  ;;  %v3304_v0 = vpack.c.bf16 %v3125_v34, %v3124_v33  ;;  %v3181_v8 = vld [vmem:[%s5803_s18 + $0x788] sm:$0xff]  ;;  %v2932_v31 = vmax.f32 %v5252_v61, 0.0  ;;  %v3132_v53 = vld [vmem:[%s5803_s18 + $0x600] sm:$0xff]  ;;  %v3150_v39 = vld [vmem:[%s5803_s18 + $0x690] sm:$0xff] }
 0xed9   : > { %v3299_v32 = vpack.c.bf16 %v3115_v42, %v3114_v19  ;;  %v3133_v34 = vld [vmem:[%s5803_s18 + $0x608] sm:$0xff]  ;;  %v3164_v61 = vld [vmem:[%s5803_s18 + $0x700] sm:$0xff]  ;;  %v3151_v40 = vld [vmem:[%s5803_s18 + $0x698] sm:$0xff] }
 0xeda   : > { %3460 = vmatmul.mubr.bf16.vlgmr.msra.gmra.mrb[44].mxu0 %v3200_v7  ;;  %3500 = vmatmul.mubr.bf16.vlgmr.msra.gmra.mrb[48].mxu1 %v3202_v21  ;;  %v3289_v7 = vpack.c.bf16 %v3095_v45, %v3094_v44  ;;  %v3078_v21 = vld [vmem:[%s5803_s18 + $0x450] sm:$0xff]  ;;  %v3204_v44 = vpack.c.bf16 %v2932_v31, %v2932_v31  ;;  %v3135_v47 = vld [vmem:[%s5803_s18 + $0x618] sm:$0xff]  ;;  %v3153_v55 = vld [vmem:[%s5803_s18 + $0x6a8] sm:$0xff] }
 0xedb   : > { %3958 = vmatpush3.bf16.msra.mxu0 %v3276_v50  ;;  %3539 = vmatprep.mubr.bf16.mxu0 %v3205_v20  ;;  %v3296_v50 = vpack.c.bf16 %v3109_v41, %v3108_v37  ;;  %v3096_v20 = vld [vmem:[%s5803_s18 + $0x4e0] sm:$0xff]  ;;  %v3308_v37 = vpack.c.bf16 %v3133_v34, %v3132_v53  ;;  %v3183_v41 = vld [vmem:[%s5803_s18 + $0x798] sm:$0xff]  ;;  %v3134_v46 = vld [vmem:[%s5803_s18 + $0x610] sm:$0xff] }
 0xedc   : > { %3980 = vmatpush3.bf16.msra.mxu1 %v3292_v22  ;;  %3579 = vmatprep.mubr.bf16.mxu1 %v3207_v60  ;;  %v3079_v22 = vld [vmem:[%s5803_s18 + $0x458] sm:$0xff]  ;;  %v3137_v1 = vld [vmem:[%s5803_s18 + $0x628] sm:$0xff]  ;;  %v3168_v2 = vld [vmem:[%s5803_s18 + $0x720] sm:$0xff] }
 0xedd   : > { %3959 = vmatprep.subr.bf16.mxu0 %v3285_v24  ;;  %3981 = vmatprep.subr.bf16.mxu1 %v3301_v57  ;;  %v3097_v24 = vld [vmem:[%s5803_s18 + $0x4e8] sm:$0xff]  ;;  %v3128_v57 = vld [vmem:[%s5803_s18 + $0x5e0] sm:$0xff]  ;;  %v3281_v12 = vpack.c.bf16 %v3079_v22, %v3078_v21  ;;  %v3167_v21 = vld [vmem:[%s5803_s18 + $0x718] sm:$0xff] }
 0xede   : > { %v3290_v60 = vpack.c.bf16 %v3097_v24, %v3096_v20  ;;  %v3152_v22 = vld [vmem:[%s5803_s18 + $0x6a0] sm:$0xff]  ;;  %v3185_v24 = vld [vmem:[%s5803_s18 + $0x7a8] sm:$0xff]  ;;  %v3155_v5 = vld [vmem:[%s5803_s18 + $0x6b8] sm:$0xff] }
 0xedf   : > { %3960 = vmatpush3.bf16.msra.mxu0 %v3277_v4  ;;  %v3112_v4 = vld [vmem:[%s5803_s18 + $0x560] sm:$0xff]  ;;  %v3186_v6 = vld [vmem:[%s5803_s18 + $0x7b0] sm:$0xff]  ;;  %v3187_v9 = vld [vmem:[%s5803_s18 + $0x7b8] sm:$0xff] }
 0xee0   : > { %3982 = vmatpush3.bf16.msra.mxu1 %v3293_v17  ;;  %3961 = vmatprep.subr.bf16.mxu0 %v3286_v25  ;;  %v3306_v17 = vpack.c.bf16 %v3129_v58, %v3128_v57  ;;  %v3113_v25 = vld [vmem:[%s5803_s18 + $0x568] sm:$0xff]  ;;  %v3184_v20 = vld [vmem:[%s5803_s18 + $0x7a0] sm:$0xff]  ;;  %v3309_v58 = vpack.c.bf16 %v3135_v47, %v3134_v46  ;;  %v3159_v53 = vld [vmem:[%s5803_s18 + $0x6d8] sm:$0xff] }
 0xee1   : > { %3983 = vmatprep.subr.bf16.mxu1 %v3302_v10  ;;  %v3130_v10 = vld [vmem:[%s5803_s18 + $0x5f0] sm:$0xff]  ;;  %v3298_v14 = vpack.c.bf16 %v3113_v25, %v3112_v4  ;;  %v3334_v4 = vpack.c.bf16 %v3185_v24, %v3184_v20  ;;  %v3156_v19 = vld [vmem:[%s5803_s18 + $0x6c0] sm:$0xff]  ;;  %v3195_v24 = vld [vmem:[%s5803_s18 + $0x7f8] sm:$0xff] }
 0xee2   : > { %v3307_v18 = vpack.c.bf16 %v3131_v11, %v3130_v10  ;;  %v3154_v25 = vld [vmem:[%s5803_s18 + $0x6b0] sm:$0xff]  ;;  %v3188_v42 = vld [vmem:[%s5803_s18 + $0x7c0] sm:$0xff] }
 0xee3   : > { %3962 = vmatpush3.bf16.msra.mxu0 %v3278_v27  ;;  %v3083_v27 = vld [vmem:[%s5803_s18 + $0x478] sm:$0xff]  ;;  %v3190_v34 = vld [vmem:[%s5803_s18 + $0x7d0] sm:$0xff] }
 0xee4   : > { %3984 = vmatpush3.bf16.msra.mxu1 %v3294_v16  ;;  %3963 = vmatprep.subr.bf16.mxu0 %v3287_v28  ;;  %v3148_v16 = vld [vmem:[%s5803_s18 + $0x680] sm:$0xff]  ;;  %v3149_v28 = vld [vmem:[%s5803_s18 + $0x688] sm:$0xff]  ;;  %v3283_v3 = vpack.c.bf16 %v3083_v27, %v3082_v38  ;;  %v3335_v38 = vpack.c.bf16 %v3187_v9, %v3186_v6  ;;  %v3171_v27 = vld [vmem:[%s5803_s18 + $0x738] sm:$0xff]  ;;  %v2938_v6 = vmax.f32 %v5313_v52, 0.0 }
 0xee5   : > { %3985 = vmatprep.subr.bf16.mxu1 %v3303_v48  ;;  %v2920_v48 = vadd.f32 %v5317_v54, %v2576_v26  ;;  %v3316_v33 = vpack.c.bf16 %v3149_v28, %v3148_v16  ;;  %v3332_v54 = vpack.c.bf16 %v3181_v8, %v3180_v30  ;;  %v3319_v26 = vpack.c.bf16 %v3155_v5, %v3154_v25  ;;  %v3189_v16 = vld [vmem:[%s5803_s18 + $0x7c8] sm:$0xff]  ;;  %v3140_v8 = vld [vmem:[%s5803_s18 + $0x640] sm:$0xff]  ;;  %v3194_v20 = vld [vmem:[%s5803_s18 + $0x7f0] sm:$0xff] }
 0xee6   : > { %v3336_v31 = vpack.c.bf16 %v3189_v16, %v3188_v42  ;;  %v2936_v25 = vmax.f32 %v5310_v51, 0.0 }
 0xee7   : > { %3964 = vmatpush3.bf16.msra.mxu0 %v3279_v63  ;;  %v2934_v63 = vmax.f32 %v5254_v62, 0.0  ;;  %v2939_v62 = vmax.f32 %v2920_v48, 0.0  ;;  %v3141_v48 = vld [vmem:[%s5803_s18 + $0x648] sm:$0xff] }
 0xee8   : > { %3986 = vmatpush3.bf16.msra.mxu1 %v3295_v35  ;;  %3965 = vmatprep.subr.bf16.mxu0 %v3288_v36  ;;  %v3165_v35 = vld [vmem:[%s5803_s18 + $0x708] sm:$0xff]  ;;  %v2937_v36 = vmax.f32 %v2879_v29, 0.0  ;;  %v3208_v9 = vpack.c.bf16 %v2936_v25, %v2936_v25 }
 0xee9   : > { %3987 = vmatprep.subr.bf16.mxu1 %v3304_v0  ;;  %v3182_v0 = vld [vmem:[%s5803_s18 + $0x790] sm:$0xff]  ;;  %v3324_v45 = vpack.c.bf16 %v3165_v35, %v3164_v61  ;;  %v3211_v57 = vpack.c.bf16 %v2939_v62, %v2939_v62 }
 0xeea   : > { %v3333_v56 = vpack.c.bf16 %v3183_v41, %v3182_v0  ;;  %v3160_v0 = vld [vmem:[%s5803_s18 + $0x6e0] sm:$0xff]  ;;  %v3161_v41 = vld [vmem:[%s5803_s18 + $0x6e8] sm:$0xff] }
 0xeeb   : > { %3966 = vmatpush3.bf16.msra.mxu0 %v3280_v49  ;;  %v3166_v49 = vld [vmem:[%s5803_s18 + $0x710] sm:$0xff] }
 0xeec   : > { %3988 = vmatpush3.bf16.msra.mxu1 %v3296_v50  ;;  %3967 = vmatprep.subr.bf16.mxu0 %v3289_v7  ;;  %v3206_v50 = vpack.c.bf16 %v2934_v63, %v2934_v63  ;;  %v3317_v7 = vpack.c.bf16 %v3151_v40, %v3150_v39  ;;  %v3191_v63 = vld [vmem:[%s5803_s18 + $0x7d8] sm:$0xff]  ;;  %v3174_v40 = vld [vmem:[%s5803_s18 + $0x750] sm:$0xff] }
 0xeed   : > { %3989 = vmatprep.subr.bf16.mxu1 %v3305_v23  ;;  %v3209_v23 = vpack.c.bf16 %v2937_v36, %v2937_v36  ;;  %v3142_v36 = vld [vmem:[%s5803_s18 + $0x650] sm:$0xff]  ;;  %v3143_v39 = vld [vmem:[%s5803_s18 + $0x658] sm:$0xff]  ;;  %v3337_v62 = vpack.c.bf16 %v3191_v63, %v3190_v34 }
 0xeee   : > { %v3313_v46 = vpack.c.bf16 %v3143_v39, %v3142_v36 }
 0xeef   : > { %3968 = vmatpush3.bf16.msra.mxu0 %v3281_v12  ;;  %v3325_v12 = vpack.c.bf16 %v3167_v21, %v3166_v49  ;;  %v3322_v49 = vpack.c.bf16 %v3161_v41, %v3160_v0  ;;  %v3176_v21 = vld [vmem:[%s5803_s18 + $0x760] sm:$0xff] }
 0xef0   : > { %3990 = vmatpush3.bf16.msra.mxu1 %v3297_v59  ;;  %3969 = vmatprep.subr.bf16.mxu0 %v3290_v60  ;;  %v3318_v59 = vpack.c.bf16 %v3153_v55, %v3152_v22  ;;  %v3136_v60 = vld [vmem:[%s5803_s18 + $0x620] sm:$0xff]  ;;  %v3177_v55 = vld [vmem:[%s5803_s18 + $0x768] sm:$0xff] }
 0xef1   : > { %3991 = vmatprep.subr.bf16.mxu1 %v3306_v17  ;;  %v3169_v17 = vld [vmem:[%s5803_s18 + $0x728] sm:$0xff]  ;;  %v3310_v10 = vpack.c.bf16 %v3137_v1, %v3136_v60  ;;  %v3147_v60 = vld [vmem:[%s5803_s18 + $0x678] sm:$0xff]  ;;  %v3339_v1 = vpack.c.bf16 %v3195_v24, %v3194_v20 }
 0xef2   : > { %v3326_v11 = vpack.c.bf16 %v3169_v17, %v3168_v2  ;;  %v3178_v2 = vld [vmem:[%s5803_s18 + $0x770] sm:$0xff] }
 0xef3   : > { %3970 = vmatpush3.bf16.msra.mxu0 %v3282_v13  ;;  %v3138_v13 = vld [vmem:[%s5803_s18 + $0x630] sm:$0xff] }
 0xef4   : > { %3992 = vmatpush3.bf16.msra.mxu1 %v3298_v14  ;;  %3971 = vmatprep.subr.bf16.mxu0 %v3291_v15  ;;  %v3139_v14 = vld [vmem:[%s5803_s18 + $0x638] sm:$0xff]  ;;  %v3170_v15 = vld [vmem:[%s5803_s18 + $0x730] sm:$0xff] }
 0xef5   : > { %3993 = vmatprep.subr.bf16.mxu1 %v3307_v18  ;;  %v3157_v18 = vld [vmem:[%s5803_s18 + $0x6c8] sm:$0xff]  ;;  %v3311_v28 = vpack.c.bf16 %v3139_v14, %v3138_v13  ;;  %v3327_v29 = vpack.c.bf16 %v3171_v27, %v3170_v15  ;;  %v3817_v13 = vld [vmem:[%s5804_s19] ss:$0 sm:$0xff] }
 0xef6   : > { %v3320_v30 = vpack.c.bf16 %v3157_v18, %v3156_v19 }
 0xef7   : > { %3972 = vmatpush3.bf16.msra.mxu0 %v3283_v3  ;;  %v3172_v3 = vld [vmem:[%s5803_s18 + $0x740] sm:$0xff] }
 0xef8   : > { %3994 = vmatpush3.bf16.msra.mxu1 %v3299_v32  ;;  %4001 = vmatprep.subr.bf16.mxu0 %v3316_v33  ;;  %v3173_v32 = vld [vmem:[%s5803_s18 + $0x748] sm:$0xff]  ;;  %v3158_v33 = vld [vmem:[%s5803_s18 + $0x6d0] sm:$0xff] }
 0xef9   : > { %4023 = vmatprep.subr.bf16.mxu1 %v3332_v54  ;;  %v3312_v54 = vpack.c.bf16 %v3141_v48, %v3140_v8  ;;  %v3328_v61 = vpack.c.bf16 %v3173_v32, %v3172_v3  ;;  %v3321_v35 = vpack.c.bf16 %v3159_v53, %v3158_v33 }
 0xefa   : > { %3540 = vmatmul.mubr.bf16.vlgmr.msra.gmra.mrb[48].mxu0 %v3204_v44  ;;  %v3192_v44 = vld [vmem:[%s5803_s18 + $0x7e0] sm:$0xff] }
 0xefb   : > { %3580 = vmatmul.mubr.bf16.vlgmr.msra.gmra.mrb[52].mxu1 %v3206_v50  ;;  %4002 = vmatpush3.bf16.msra.mxu0 %v3308_v37  ;;  %v3175_v37 = vld [vmem:[%s5803_s18 + $0x758] sm:$0xff]  ;;  %v3144_v50 = vld [vmem:[%s5803_s18 + $0x660] sm:$0xff] }
 0xefc   : > { %3619 = vmatprep.mubr.bf16.mxu0 %v3209_v23  ;;  %4024 = vmatpush3.bf16.msra.mxu1 %v3324_v45  ;;  %v3193_v45 = vld [vmem:[%s5803_s18 + $0x7e8] sm:$0xff]  ;;  %v3329_v47 = vpack.c.bf16 %v3175_v37, %v3174_v40  ;;  %v3162_v23 = vld [vmem:[%s5803_s18 + $0x6f0] sm:$0xff] }
 0xefd   : > { %3659 = vmatprep.mubr.bf16.mxu1 %v3211_v57  ;;  %4003 = vmatprep.subr.bf16.mxu0 %v3317_v7  ;;  %v3145_v7 = vld [vmem:[%s5803_s18 + $0x668] sm:$0xff]  ;;  %v3338_v22 = vpack.c.bf16 %v3193_v45, %v3192_v44 }
 0xefe   : > { %4025 = vmatprep.subr.bf16.mxu1 %v3333_v56  ;;  %v3163_v56 = vld [vmem:[%s5803_s18 + $0x6f8] sm:$0xff]  ;;  %v3314_v57 = vpack.c.bf16 %v3145_v7, %v3144_v50 }
 0xeff   : > { %4004 = vmatpush3.bf16.msra.mxu0 %v3309_v58  ;;  %v3330_v58 = vpack.c.bf16 %v3177_v55, %v3176_v21 }
 0xf00   : > { %4026 = vmatpush3.bf16.msra.mxu1 %v3325_v12  ;;  %4005 = vmatprep.subr.bf16.mxu0 %v3318_v59  ;;  %v3323_v12 = vpack.c.bf16 %v3163_v56, %v3162_v23  ;;  %v3146_v59 = vld [vmem:[%s5803_s18 + $0x670] sm:$0xff] }
 0xf01   : > { %4027 = vmatprep.subr.bf16.mxu1 %v3334_v4  ;;  %v3179_v4 = vld [vmem:[%s5803_s18 + $0x778] sm:$0xff]  ;;  %v3315_v17 = vpack.c.bf16 %v3147_v60, %v3146_v59 }
 0xf02   : > { %v3331_v5 = vpack.c.bf16 %v3179_v4, %v3178_v2 }
 0xf03   : > { %4006 = vmatpush3.bf16.msra.mxu0 %v3310_v10  ;;  %v3210_v10 = vpack.c.bf16 %v2938_v6, %v2938_v6 }
 0xf04   : > { %4028 = vmatpush3.bf16.msra.mxu1 %v3326_v11  ;;  %4007 = vmatprep.subr.bf16.mxu0 %v3319_v26 }
 0xf05   : > { %4029 = vmatprep.subr.bf16.mxu1 %v3335_v38 }
 0xf07   : > { %4008 = vmatpush3.bf16.msra.mxu0 %v3311_v28 }
 0xf08   : > { %4030 = vmatpush3.bf16.msra.mxu1 %v3327_v29  ;;  %4009 = vmatprep.subr.bf16.mxu0 %v3320_v30 }
 0xf09   : > { %4031 = vmatprep.subr.bf16.mxu1 %v3336_v31 }
 0xf0b   : > { %4010 = vmatpush3.bf16.msra.mxu0 %v3312_v54 }
 0xf0c   : > { %4032 = vmatpush3.bf16.msra.mxu1 %v3328_v61  ;;  %4011 = vmatprep.subr.bf16.mxu0 %v3321_v35 }
 0xf0d   : > { %4033 = vmatprep.subr.bf16.mxu1 %v3337_v62 }
 0xf0f   : > { %4012 = vmatpush3.bf16.msra.mxu0 %v3313_v46 }
 0xf10   : > { %4034 = vmatpush3.bf16.msra.mxu1 %v3329_v47  ;;  %4013 = vmatprep.subr.bf16.mxu0 %v3322_v49 }
 0xf11   : > { %4035 = vmatprep.subr.bf16.mxu1 %v3338_v22 }
 0xf13   : > { %4014 = vmatpush3.bf16.msra.mxu0 %v3314_v57 }
 0xf14   : > { %4036 = vmatpush3.bf16.msra.mxu1 %v3330_v58  ;;  %4015 = vmatprep.subr.bf16.mxu0 %v3323_v12 }
 0xf15   : > { %4037 = vmatprep.subr.bf16.mxu1 %v3339_v1 }
 0xf17   : > { %4016 = vmatpush3.bf16.msra.mxu0 %v3315_v17 }
 0xf18   : > { %4038 = vmatpush3.bf16.msra.mxu1 %v3331_v5 }
 0xf1a   : > { %3620 = vmatmul.mubr.bf16.vlgmr.msra.gmra.mrb[52].mxu0 %v3208_v9  ;;  %v3819_v9 = vld [vmem:[%s5806_s21] ss:$0 sm:$0xff] }
 0xf1b   : > { %3660 = vmatmul.mubr.bf16.vlgmr.msra.gmra.mrb[56].mxu1 %v3210_v10 }
 0xf8d   : > { %v3885_v11 = vpop.f32.mrb[40].mxu0  ;;  %v3907_v26 = vpop.f32.mrb[44].mxu1 }
 0xf8e   : > { %v3886_v14 = vpop.f32.mrb[41].mxu0  ;;  %v3908_v51 = vpop.f32.mrb[45].mxu1 }
 0xf8f   : > { %v3887_v15 = vadd.f32 %v3886_v14, %v3885_v11  ;;  %v3909_v38 = vadd.f32 %v3908_v51, %v3907_v26  ;;  %v3888_v27 = vpop.f32.mrb[42].mxu0  ;;  %v3910_v19 = vpop.f32.mrb[46].mxu1 }
 0xf90   : > { %v3889_v52 = vpop.f32.mrb[43].mxu0  ;;  %v3911_v18 = vpop.f32.mrb[47].mxu1 }
 0xf91   : > { %v3382_v42 = vadd.f32 %v3887_v15, %v3817_v13 }
 0xf93   : > { %v3422_v16 = vadd.f32 %v3909_v38, %v3382_v42 }
 0xfad   : > { %v3929_v28 = vpop.f32.mrb[44].mxu0  ;;  %v3951_v29 = vpop.f32.mrb[48].mxu1 }
 0xfae   : > { %v3930_v30 = vpop.f32.mrb[45].mxu0  ;;  %v3952_v8 = vpop.f32.mrb[49].mxu1 }
 0xfaf   : > { %v3931_v48 = vadd.f32 %v3930_v30, %v3929_v28  ;;  %v3953_v3 = vadd.f32 %v3952_v8, %v3951_v29  ;;  %v3932_v31 = vpop.f32.mrb[46].mxu0  ;;  %v3954_v32 = vpop.f32.mrb[50].mxu1 }
 0xfb0   : > { %v3933_v33 = vpop.f32.mrb[47].mxu0  ;;  %v3955_v53 = vpop.f32.mrb[51].mxu1 }
 0xfb1   : > { %v3462_v34 = vadd.f32 %v3931_v48, %v3422_v16 }
 0xfb3   : > { %v3502_v63 = vadd.f32 %v3953_v3, %v3462_v34 }
 0xfcd   : > { %v3973_v54 = vpop.f32.mrb[48].mxu0 }
 0xfce   : > { %v3995_v61 = vpop.f32.mrb[52].mxu1  ;;  %v3974_v35 = vpop.f32.mrb[49].mxu0 }
 0xfcf   : > { %v3975_v36 = vadd.f32 %v3974_v35, %v3973_v54  ;;  %v3996_v39 = vpop.f32.mrb[53].mxu1  ;;  %v3976_v40 = vpop.f32.mrb[50].mxu0 }
 0xfd0   : > { %v3997_v62 = vadd.f32 %v3996_v39, %v3995_v61  ;;  %v3998_v37 = vpop.f32.mrb[54].mxu1  ;;  %v3977_v0 = vpop.f32.mrb[51].mxu0 }
 0xfd1   : > { %v3542_v41 = vadd.f32 %v3975_v36, %v3502_v63  ;;  %v3999_v44 = vpop.f32.mrb[55].mxu1 }
 0xfd3   : > { %v3582_v45 = vadd.f32 %v3997_v62, %v3542_v41 }
 0xfed   : > { %v4017_v46 = vpop.f32.mrb[52].mxu0 }
 0xfee   : > { %v4039_v47 = vpop.f32.mrb[56].mxu1  ;;  %v4018_v49 = vpop.f32.mrb[53].mxu0 }
 0xfef   : > { %v4019_v50 = vadd.f32 %v4018_v49, %v4017_v46  ;;  %v4040_v7 = vpop.f32.mrb[57].mxu1  ;;  %v4020_v21 = vpop.f32.mrb[54].mxu0 }
 0xff0   : > { %v4041_v22 = vadd.f32 %v4040_v7, %v4039_v47  ;;  %v4042_v55 = vpop.f32.mrb[58].mxu1  ;;  %v4021_v23 = vpop.f32.mrb[55].mxu0 }
 0xff1   : > { %v3622_v56 = vadd.f32 %v4019_v50, %v3582_v45  ;;  %v4043_v20 = vpop.f32.mrb[59].mxu1 }
 0xff3   : > { %v3662_v24 = vadd.f32 %v4041_v22, %v3622_v56 }
 0xff5   : > { %v3667_v57 = vadd.f32 %v3662_v24, %v4766_v43  ;;  %v3818_v43 = vld [vmem:[%s5805_s20] ss:$0 sm:$0xff] }
 0xff7   : > { %v3670_v58 = vsel %vm713_vm1, %v3667_v57, 0.0 }
 0xff8   : > { %3671 = vadd.xlane.f32.xlu0 %v3670_v58 }
0x1085   : > { %v3672_v12 = vpop.xlane.xlu0 %3671 }
0x1086   : > { %v3673_v59 = vmul.f32 0.03125, %v3672_v12 }
0x1088   : > { %v3674_v60 = vsub.f32 %v3667_v57, %v3673_v59 }
0x108a   : > { %v3675_v1 = vmul.f32 %v3674_v60, %v3674_v60 }
0x108c   : > { %v3676_v2 = vsel %vm713_vm1, %v3675_v1, 0.0 }
0x108d   : > { %3677 = vadd.xlane.f32.xlu1 %v3676_v2 }
0x111a   : > { %v3678_v4 = vpop.xlane.xlu1 %3677 }
0x111b   : > { %v3679_v17 = vmul.f32 0.03125, %v3678_v4 }
0x111d   : > { %v3680_v25 = vadd.f32 1e-05, %v3679_v17 }
0x111f   : > { %4226 = vrsqrt.f32 %v3680_v25 }
0x1129   : > { %v4227_v5 = vpop.eup %4226 }
0x112a   : > { %v3682_v6 = vmul.f32 %v4227_v5, %v3674_v60 }
0x112c   : > { %v3689_v10 = vmul.f32 %v3818_v43, %v3682_v6 }
0x112e   : > { %v3696_v11 = vadd.f32 %v3819_v9, %v3689_v10 }
0x1130   : > { %3697 = vst.msk [vmem:[%s695_s27] sm:$0xff] %vm713_vm1, %v3696_v11 }
0x1131 PF: > { %s32_s3 = sadd.s32 1, %s4234_s3  }
0x1132   : > { %p29_p4 = scmp.ge.s32.totalorder %s32_s3, 4  }
0x1134   :  { %31 = sbr.rel (!%p29_p4) target bundleno = 8 (0x8), region = 141 }

</bundles_post_ra>
